<compile_context>
chip_gen: v7x
topology: tpu7x:2x2x1
jax: 0.10.0
libtpu: 0.0.40
codegen_flags: <defaults>
</compile_context>

<pallas_src>
import jax
import jax.numpy as jnp
from jax.experimental import pallas as pl
from jax.experimental.pallas import tpu as pltpu


def make_divisible(v, divisor=8, min_value=None):
    if min_value is None:
        min_value = divisor
    new_v = max(min_value, int(v + divisor / 2) // divisor * divisor)
    if new_v < 0.9 * v:
        new_v += divisor
    return new_v


def _silu(y):
    # Exact sigmoid: exp runs on the EUP; the divide is cheap and keeps the
    # f32 path bit-close to the XLA reference.
    return y * (1.0 / (1.0 + jnp.exp(-y)))


def _vmem_limit_bytes():
    """Per-generation VMEM cap: ~3/4 of physical, clamped to [32, 100] MiB."""
    try:
        cap = int(pltpu.get_tpu_info().vmem_capacity_bytes)
    except Exception:
        cap = 64 * 1024 * 1024      # conservative (v7x-sized) fallback
    return min(max(cap * 3 // 4, 32 * 1024 * 1024), 100 * 1024 * 1024)


# ---------------------------------------------------------------------------
# Fused Pallas kernel: expand 1x1 -> depthwise 3x3 -> reduce 1x1 (+ residual)
# ---------------------------------------------------------------------------

def _make_fused_kernel(*, H, W, Cin, Ch, Cout, stride, expand, use_res,
                       compute_dtype):
    Ho = (H - 1) // stride + 1
    Wo = (W - 1) // stride + 1
    Wp = W + 2                       # scratch W extent (1-wide zero halo each side)
    # Stream the expand matmul into scratch in row bands to bound the live
    # f32 footprint (the whole image fits in one band at demo sizes).
    row_chunk = H if H <= 16 else 16

    def _body(x_ref, wexp_ref, be_ref, wdw_ref, bd_ref, wred_ref, br_ref,
              o_ref, hid_ref):
        # ---- zero ONLY the 1-wide halo (the interior is fully overwritten
        #      below).  Removes the full-scratch vst burst of the old version.
        zrow = jnp.zeros((1, Wp, Ch), jnp.float32)
        hid_ref[0:1, :, :] = zrow
        hid_ref[H + 1:H + 2, :, :] = zrow
        zcol = jnp.zeros((H + 2, 1, Ch), jnp.float32)
        hid_ref[:, 0:1, :] = zcol
        hid_ref[:, W + 1:W + 2, :] = zcol

        # ---- exp_1x1: 1x1 conv (MXU, BN scale pre-folded into weights) +
        #      bias + SiLU, streamed into the hidden scratch in row chunks.
        if expand:
            wexp = wexp_ref[...]                               # (Cin, Ch)
            for r0 in range(0, H, row_chunk):
                rows = min(row_chunk, H - r0)
                xa = x_ref[r0:r0 + rows, :, :].reshape(rows * W, Cin)
                hc = jnp.dot(xa.astype(compute_dtype), wexp,
                             preferred_element_type=jnp.float32)
                hc = _silu(hc + be_ref[...])
                hid_ref[1 + r0:1 + r0 + rows, 1:W + 1, :] = hc.reshape(rows, W, Ch)
        else:
            hid_ref[1:H + 1, 1:W + 1, :] = x_ref[...].astype(jnp.float32)

        # ---- conv_3x3: depthwise 3x3 (BN scale pre-folded) + bias + SiLU.
        #      VPU math stays f32 (no bf16 VPU on v5e).
        wdw = wdw_ref[...]                                     # (3, 3, Ch)
        if stride == 1:
            # 3 aligned full-width row-band loads (instead of 9 sublane-
            # unaligned window reads); the column taps are value-level slices
            # of the per-tap partial sums.
            b0 = hid_ref[0:Ho, :, :]                           # (Ho, W+2, Ch)
            b1 = hid_ref[1:1 + Ho, :, :]
            b2 = hid_ref[2:2 + Ho, :, :]
            acc = jnp.zeros((Ho, Wo, Ch), jnp.float32)
            for kj in range(3):
                p = (b0 * wdw[0, kj, :] + b1 * wdw[1, kj, :]
                     + b2 * wdw[2, kj, :])                     # (Ho, W+2, Ch)
                acc = acc + p[:, kj:kj + Wo, :]
        else:
            # stride-2 output computed directly via strided window reads.
            # TODO(synk): deinterleave W at scratch-write time so these become
            #             unit-stride reads.
            acc = jnp.zeros((Ho, Wo, Ch), jnp.float32)
            for ki in range(3):
                for kj in range(3):
                    win = hid_ref[pl.ds(ki, Ho, stride=stride),
                                  pl.ds(kj, Wo, stride=stride), :]
                    acc = acc + win * wdw[ki, kj, :]
        acc = _silu(acc + bd_ref[0, :])

        # ---- red_1x1: 1x1 conv (MXU, BN scale pre-folded) + bias, fused residual.
        y = jnp.dot(acc.reshape(Ho * Wo, Ch).astype(compute_dtype),
                    wred_ref[...],
                    preferred_element_type=jnp.float32)
        y = (y + br_ref[...]).reshape(Ho, Wo, Cout)
        if use_res:
            y = y + x_ref[...].astype(jnp.float32)
        o_ref[...] = y.astype(o_ref.dtype)

    if expand:
        kernel = _body
    else:
        def kernel(x_ref, wdw_ref, bd_ref, wred_ref, br_ref, o_ref, hid_ref):
            _body(x_ref, None, None, wdw_ref, bd_ref, wred_ref, br_ref,
                  o_ref, hid_ref)

    return kernel, Ho, Wo, Wp


def inverted_residual_forward_nhwc(x_nhwc, params, *, stride, expand, use_res,
                                   compute_dtype=jnp.bfloat16, out_dtype=None):
    """Fused InvertedResidual forward.  x_nhwc: (N, H, W, Cin)."""
    N, H, W, Cin = x_nhwc.shape
    Ch = params["w_dw"].shape[-1]
    Cout = params["w_red"].shape[-1]
    if not expand:
        assert Ch == Cin, "expand_ratio==1 requires hidden_dim == in_channels"
    out_dtype = x_nhwc.dtype if out_dtype is None else out_dtype

    kernel, Ho, Wo, Wp = _make_fused_kernel(
        H=H, W=W, Cin=Cin, Ch=Ch, Cout=Cout, stride=stride, expand=expand,
        use_res=use_res, compute_dtype=compute_dtype)

    inputs = [x_nhwc]
    in_specs = [pl.BlockSpec((None, H, W, Cin), lambda n: (n, 0, 0, 0))]

    if expand:
        inputs += [params["w_exp"].astype(compute_dtype), params["b_exp"]]
        in_specs += [pl.BlockSpec((Cin, Ch), lambda n: (0, 0)),
                     pl.BlockSpec((1, Ch), lambda n: (0, 0))]

    inputs += [params["w_dw"],                      # depthwise stays f32 (VPU)
               params["b_dw"],
               params["w_red"].astype(compute_dtype),
               params["b_red"]]
    in_specs += [pl.BlockSpec((3, 3, Ch), lambda n: (0, 0, 0)),
                 pl.BlockSpec((1, Ch), lambda n: (0, 0)),
                 pl.BlockSpec((Ch, Cout), lambda n: (0, 0)),
                 pl.BlockSpec((1, Cout), lambda n: (0, 0))]
    # NOTE: weight/bias index_maps are constant so they are fetched once; a
    # further (small) VMEM saving would be pipeline_mode=pl.Buffered(1) on them.

    return pl.pallas_call(
        kernel,
        out_shape=jax.ShapeDtypeStruct((N, Ho, Wo, Cout), out_dtype),
        grid=(N,),
        in_specs=in_specs,
        out_specs=pl.BlockSpec((None, Ho, Wo, Cout), lambda n: (n, 0, 0, 0)),
        scratch_shapes=[pltpu.VMEM((H + 2, Wp, Ch), jnp.float32)],
        compiler_params=pltpu.CompilerParams(
            dimension_semantics=("parallel",),        # batch sharded across TCs
            vmem_limit_bytes=_vmem_limit_bytes()),    # per-generation cap
    )(*inputs)


# ---------------------------------------------------------------------------
# InvertedResidual module (parameters held as JAX arrays)
# ---------------------------------------------------------------------------

class InvertedResidualPallas:
    def __init__(self, in_channels, out_channels, stride, expand_ratio,
                 skip_connection=True, key=None):
        assert stride in (1, 2)
        self.in_channels = in_channels
        self.out_channels = out_channels
        self.stride = stride
        self.expand = expand_ratio != 1
        self.hidden = make_divisible(int(round(in_channels * expand_ratio)), 8)
        self.use_res_connect = (stride == 1 and in_channels == out_channels
                                and skip_connection)

        key = jax.random.PRNGKey(0) if key is None else key
        ks = jax.random.split(key, 6)
        eps = 1e-5

        def bn_params(k, c):
            k1, k2, k3, k4 = jax.random.split(k, 4)
            gamma = jax.random.uniform(k1, (c,), jnp.float32, 0.5, 1.5)
            beta = 0.1 * jax.random.normal(k2, (c,), dtype=jnp.float32)
            mean = 0.1 * jax.random.normal(k3, (c,), dtype=jnp.float32)
            var = jax.random.uniform(k4, (c,), jnp.float32, 0.5, 1.5)
            scale = gamma / jnp.sqrt(var + eps)
            bias = beta - mean * scale
            return scale, bias

        # PyTorch Conv2d layouts (O, I/groups, kH, kW) kept for the reference.
        if self.expand:
            self.w_exp_oihw = 0.1 * jax.random.normal(
                ks[0], (self.hidden, in_channels, 1, 1), dtype=jnp.float32)
            self.scale_exp, self.bias_exp = bn_params(ks[1], self.hidden)
        else:
            self.w_exp_oihw = None
            self.scale_exp = self.bias_exp = None
        self.w_dw_oihw = 0.1 * jax.random.normal(
            ks[2], (self.hidden, 1, 3, 3), dtype=jnp.float32)
        self.scale_dw, self.bias_dw = bn_params(ks[3], self.hidden)
        self.w_red_oihw = 0.1 * jax.random.normal(
            ks[4], (out_channels, self.hidden, 1, 1), dtype=jnp.float32)
        self.scale_red, self.bias_red = bn_params(ks[5], out_channels)

        # Kernel-friendly layouts with the BN scales FOLDED into the weights
        # (only the bias adds stay in-kernel).
        Ch, Co = self.hidden, out_channels
        w_dw = jnp.transpose(self.w_dw_oihw[:, 0], (1, 2, 0))           # (3,3,Ch)
        w_red = jnp.transpose(self.w_red_oihw[:, :, 0, 0], (1, 0))      # (Ch,Co)
        params = {
            "w_dw": w_dw * self.scale_dw[None, None, :],
            "b_dw": self.bias_dw.reshape(1, Ch),
            "w_red": w_red * self.scale_red[None, :],
            "b_red": self.bias_red.reshape(1, Co),
        }
        if self.expand:
            w_exp = jnp.transpose(self.w_exp_oihw[:, :, 0, 0], (1, 0))  # (Cin,Ch)
            params["w_exp"] = w_exp * self.scale_exp[None, :]
            params["b_exp"] = self.bias_exp.reshape(1, Ch)
        self.params = params

    def forward_nhwc(self, x_nhwc, compute_dtype=jnp.bfloat16, out_dtype=None):
        # Preferred entry point when composing blocks (no boundary transposes;
        # pass out_dtype=jnp.bfloat16 to halve output writeback bandwidth).
        return inverted_residual_forward_nhwc(
            x_nhwc, self.params, stride=self.stride, expand=self.expand,
            use_res=self.use_res_connect, compute_dtype=compute_dtype,
            out_dtype=out_dtype)

    def __call__(self, x_nchw, compute_dtype=jnp.bfloat16, out_dtype=None):
        # NCHW wrapper kept for parity with the PyTorch module interface.
        x = jnp.transpose(x_nchw, (0, 2, 3, 1))  # NCHW -> NHWC
        y = self.forward_nhwc(x, compute_dtype=compute_dtype, out_dtype=out_dtype)
        return jnp.transpose(y, (0, 3, 1, 2))    # NHWC -> NCHW


# ---------------------------------------------------------------------------
# Pure-JAX (XLA conv) reference for correctness checking
# ---------------------------------------------------------------------------

def reference_forward(mod: InvertedResidualPallas, x_nchw):
    dn = ("NCHW", "OIHW", "NCHW")

    def bn(y, scale, bias):
        return y * scale[None, :, None, None] + bias[None, :, None, None]

    def silu(y):
        return y * (1.0 / (1.0 + jnp.exp(-y)))

    y = x_nchw
    if mod.expand:
        y = jax.lax.conv_general_dilated(y, mod.w_exp_oihw, (1, 1), "VALID",
                                         dimension_numbers=dn)
        y = silu(bn(y, mod.scale_exp, mod.bias_exp))
    y = jax.lax.conv_general_dilated(y, mod.w_dw_oihw, (mod.stride, mod.stride),
                                     ((1, 1), (1, 1)), dimension_numbers=dn,
                                     feature_group_count=mod.hidden)
    y = silu(bn(y, mod.scale_dw, mod.bias_dw))
    y = jax.lax.conv_general_dilated(y, mod.w_red_oihw, (1, 1), "VALID",
                                     dimension_numbers=dn)
    y = bn(y, mod.scale_red, mod.bias_red)
    if mod.use_res_connect:
        y = y + x_nchw
    return y


if __name__ == "__main__":
    key = jax.random.PRNGKey(0)
    kx, kp = jax.random.split(key)

    # N=2, C_in=C_out=4, H=W=16, stride=1, expand_ratio=4 -> hidden=16, residual on.
    x = jax.random.normal(kx, (2, 4, 16, 16), dtype=jnp.float32)  # NCHW
    mod = InvertedResidualPallas(in_channels=4, out_channels=4, stride=1,
                                 expand_ratio=4, skip_connection=True, key=kp)

    ref = jax.block_until_ready(reference_forward(mod, x))

    # f32 MXU path: tight check against the XLA-conv reference (exact sigmoid).
    out_f32 = jax.block_until_ready(mod(x, compute_dtype=jnp.float32))
    assert out_f32.shape == (2, 4, 16, 16), out_f32.shape
    assert jnp.allclose(out_f32, ref, atol=1e-2, rtol=1e-2), float(
        jnp.max(jnp.abs(out_f32 - ref)))

    # Default bf16-MXU path (f32 accumulation): looser tolerance.
    out_bf16 = jax.block_until_ready(mod(x))
    assert out_bf16.shape == (2, 4, 16, 16), out_bf16.shape
    assert jnp.allclose(out_bf16, ref, atol=1e-1, rtol=1e-1), float(
        jnp.max(jnp.abs(out_bf16 - ref)))

    print("KERNEL_OK")
</pallas_src>

<mosaic_0001>
module attributes {stable_mosaic.version = 11 : i64} {
  func.func @_body(%arg0: i32, %arg1: memref<1x16x16x4xf32, #tpu.memory_space<vmem>>, %arg2: memref<4x16xf32, #tpu.memory_space<vmem>>, %arg3: memref<1x16xf32, #tpu.memory_space<vmem>>, %arg4: memref<3x3x16xf32, #tpu.memory_space<vmem>>, %arg5: memref<1x16xf32, #tpu.memory_space<vmem>>, %arg6: memref<16x4xf32, #tpu.memory_space<vmem>>, %arg7: memref<1x4xf32, #tpu.memory_space<vmem>>, %arg8: memref<1x16x16x4xf32, #tpu.memory_space<vmem>>, %arg9: memref<18x18x16xf32, #tpu.memory_space<vmem>>) attributes {dimension_semantics = [#tpu.dimension_semantics<parallel>], iteration_bounds = array<i64: 2>, scalar_prefetch = 0 : i64, scratch_operands = 1 : i64, tpu.core_type = #tpu.core_type<tc>, window_params = [{transform_indices = @transform_0, window_bounds = array<i64: 1, 16, 16, 4>}, {pipeline_mode = #tpu.pipeline_mode<synchronous>, transform_indices = @transform_1, window_bounds = array<i64: 4, 16>}, {pipeline_mode = #tpu.pipeline_mode<synchronous>, transform_indices = @transform_2, window_bounds = array<i64: 1, 16>}, {pipeline_mode = #tpu.pipeline_mode<synchronous>, transform_indices = @transform_3, window_bounds = array<i64: 3, 3, 16>}, {pipeline_mode = #tpu.pipeline_mode<synchronous>, transform_indices = @transform_4, window_bounds = array<i64: 1, 16>}, {pipeline_mode = #tpu.pipeline_mode<synchronous>, transform_indices = @transform_5, window_bounds = array<i64: 16, 4>}, {pipeline_mode = #tpu.pipeline_mode<synchronous>, transform_indices = @transform_6, window_bounds = array<i64: 1, 4>}, {transform_indices = @transform_7, window_bounds = array<i64: 1, 16, 16, 4>}]} {
    %cst = arith.constant 0.000000e+00 : f32
    %0 = vector.broadcast %cst : f32 to vector<1x18x16xf32>
    %c0 = arith.constant 0 : index
    %c0_0 = arith.constant 0 : index
    %c0_1 = arith.constant 0 : index
    %1 = vector.load %arg9[%c0, %c0_0, %c0_1] : memref<18x18x16xf32, #tpu.memory_space<vmem>>, vector<1x18x16xf32>
    tpu.vector_store %arg9[%c0, %c0_0, %c0_1], %0 {strides = array<i32>} : memref<18x18x16xf32, #tpu.memory_space<vmem>>, vector<1x18x16xf32>,
    %c17 = arith.constant 17 : index
    %c0_2 = arith.constant 0 : index
    %c0_3 = arith.constant 0 : index
    %2 = vector.load %arg9[%c17, %c0_2, %c0_3] : memref<18x18x16xf32, #tpu.memory_space<vmem>>, vector<1x18x16xf32>
    tpu.vector_store %arg9[%c17, %c0_2, %c0_3], %0 {strides = array<i32>} : memref<18x18x16xf32, #tpu.memory_space<vmem>>, vector<1x18x16xf32>,
    %cst_4 = arith.constant 0.000000e+00 : f32
    %3 = vector.broadcast %cst_4 : f32 to vector<18x1x16xf32>
    %c0_5 = arith.constant 0 : index
    %c0_6 = arith.constant 0 : index
    %c0_7 = arith.constant 0 : index
    %4 = vector.load %arg9[%c0_5, %c0_6, %c0_7] : memref<18x18x16xf32, #tpu.memory_space<vmem>>, vector<18x1x16xf32>
    tpu.vector_store %arg9[%c0_5, %c0_6, %c0_7], %3 {strides = array<i32>} : memref<18x18x16xf32, #tpu.memory_space<vmem>>, vector<18x1x16xf32>,
    %c0_8 = arith.constant 0 : index
    %c17_9 = arith.constant 17 : index
    %c0_10 = arith.constant 0 : index
    %5 = vector.load %arg9[%c0_8, %c17_9, %c0_10] : memref<18x18x16xf32, #tpu.memory_space<vmem>>, vector<18x1x16xf32>
    tpu.vector_store %arg9[%c0_8, %c17_9, %c0_10], %3 {strides = array<i32>} : memref<18x18x16xf32, #tpu.memory_space<vmem>>, vector<18x1x16xf32>,
    %c0_11 = arith.constant 0 : index
    %c0_12 = arith.constant 0 : index
    %6 = vector.load %arg2[%c0_11, %c0_12] : memref<4x16xf32, #tpu.memory_space<vmem>>, vector<4x16xf32>
    %c0_13 = arith.constant 0 : index
    %c0_14 = arith.constant 0 : index
    %c0_15 = arith.constant 0 : index
    %c0_16 = arith.constant 0 : index
    %7 = vector.load %arg1[%c0_13, %c0_14, %c0_15, %c0_16] : memref<1x16x16x4xf32, #tpu.memory_space<vmem>>, vector<1x16x16x4xf32>
    %8 = vector.shape_cast %7 : vector<1x16x16x4xf32> to vector<16x16x4xf32>
    %9 = vector.shape_cast %8 : vector<16x16x4xf32> to vector<256x4xf32>
    %cst_17 = arith.constant dense<0.000000e+00> : vector<256x16xf32>
    %10 = tpu.matmul %9, %6, %cst_17 {dimension_numbers = #tpu.dot_dimension_numbers<[1], [0], [0], [1], [0, 0, 1, 1], [], []>} : vector<256x4xf32>, vector<4x16xf32>, vector<256x16xf32> -> vector<256x16xf32>
    %c0_18 = arith.constant 0 : index
    %c0_19 = arith.constant 0 : index
    %11 = vector.load %arg3[%c0_18, %c0_19] : memref<1x16xf32, #tpu.memory_space<vmem>>, vector<1x16xf32>
    %12 = vector.broadcast %11 : vector<1x16xf32> to vector<256x16xf32>
    %13 = arith.addf %10, %12 : vector<256x16xf32>
    %cst_20 = arith.constant 0.000000e+00 : f32
    %14 = vector.broadcast %cst_20 : f32 to vector<256x16xf32>
    %15 = arith.subf %14, %13 : vector<256x16xf32>
    %16 = math.exp %15 : vector<256x16xf32>
    %cst_21 = arith.constant 1.000000e+00 : f32
    %17 = vector.broadcast %cst_21 : f32 to vector<256x16xf32>
    %18 = arith.addf %17, %16 : vector<256x16xf32>
    %cst_22 = arith.constant 1.000000e+00 : f32
    %19 = vector.broadcast %cst_22 : f32 to vector<256x16xf32>
    %20 = arith.divf %19, %18 : vector<256x16xf32>
    %21 = arith.mulf %13, %20 : vector<256x16xf32>
    %22 = vector.shape_cast %21 : vector<256x16xf32> to vector<16x16x16xf32>
    %c1 = arith.constant 1 : index
    %c1_23 = arith.constant 1 : index
    %c0_24 = arith.constant 0 : index
    %23 = vector.load %arg9[%c1, %c1_23, %c0_24] : memref<18x18x16xf32, #tpu.memory_space<vmem>>, vector<16x16x16xf32>
    tpu.vector_store %arg9[%c1, %c1_23, %c0_24], %22 {strides = array<i32>} : memref<18x18x16xf32, #tpu.memory_space<vmem>>, vector<16x16x16xf32>,
    %c0_25 = arith.constant 0 : index
    %c0_26 = arith.constant 0 : index
    %c0_27 = arith.constant 0 : index
    %24 = vector.load %arg4[%c0_25, %c0_26, %c0_27] : memref<3x3x16xf32, #tpu.memory_space<vmem>>, vector<3x3x16xf32>
    %c0_28 = arith.constant 0 : index
    %c0_29 = arith.constant 0 : index
    %c0_30 = arith.constant 0 : index
    %25 = vector.load %arg9[%c0_28, %c0_29, %c0_30] : memref<18x18x16xf32, #tpu.memory_space<vmem>>, vector<16x18x16xf32>
    %c1_31 = arith.constant 1 : index
    %c0_32 = arith.constant 0 : index
    %c0_33 = arith.constant 0 : index
    %26 = vector.load %arg9[%c1_31, %c0_32, %c0_33] : memref<18x18x16xf32, #tpu.memory_space<vmem>>, vector<16x18x16xf32>
    %c2 = arith.constant 2 : index
    %c0_34 = arith.constant 0 : index
    %c0_35 = arith.constant 0 : index
    %27 = vector.load %arg9[%c2, %c0_34, %c0_35] : memref<18x18x16xf32, #tpu.memory_space<vmem>>, vector<16x18x16xf32>
    %cst_36 = arith.constant 0.000000e+00 : f32
    %28 = vector.broadcast %cst_36 : f32 to vector<16x16x16xf32>
    %29 = vector.extract_strided_slice %24 {offsets = [0, 0, 0], sizes = [1, 1, 16], strides = [1, 1, 1]} : vector<3x3x16xf32> to vector<1x1x16xf32>
    %30 = vector.shape_cast %29 : vector<1x1x16xf32> to vector<16xf32>
    %31 = vector.shape_cast %30 : vector<16xf32> to vector<1x1x16xf32>
    %32 = vector.broadcast %31 : vector<1x1x16xf32> to vector<16x18x16xf32>
    %33 = arith.mulf %25, %32 : vector<16x18x16xf32>
    %34 = vector.extract_strided_slice %24 {offsets = [1, 0, 0], sizes = [1, 1, 16], strides = [1, 1, 1]} : vector<3x3x16xf32> to vector<1x1x16xf32>
    %35 = vector.shape_cast %34 : vector<1x1x16xf32> to vector<16xf32>
    %36 = vector.shape_cast %35 : vector<16xf32> to vector<1x1x16xf32>
    %37 = vector.broadcast %36 : vector<1x1x16xf32> to vector<16x18x16xf32>
    %38 = arith.mulf %26, %37 : vector<16x18x16xf32>
    %39 = arith.addf %33, %38 : vector<16x18x16xf32>
    %40 = vector.extract_strided_slice %24 {offsets = [2, 0, 0], sizes = [1, 1, 16], strides = [1, 1, 1]} : vector<3x3x16xf32> to vector<1x1x16xf32>
    %41 = vector.shape_cast %40 : vector<1x1x16xf32> to vector<16xf32>
    %42 = vector.shape_cast %41 : vector<16xf32> to vector<1x1x16xf32>
    %43 = vector.broadcast %42 : vector<1x1x16xf32> to vector<16x18x16xf32>
    %44 = arith.mulf %27, %43 : vector<16x18x16xf32>
    %45 = arith.addf %39, %44 : vector<16x18x16xf32>
    %46 = vector.extract_strided_slice %45 {offsets = [0, 0, 0], sizes = [16, 16, 16], strides = [1, 1, 1]} : vector<16x18x16xf32> to vector<16x16x16xf32>
    %47 = arith.addf %28, %46 : vector<16x16x16xf32>
    %48 = vector.extract_strided_slice %24 {offsets = [0, 1, 0], sizes = [1, 1, 16], strides = [1, 1, 1]} : vector<3x3x16xf32> to vector<1x1x16xf32>
    %49 = vector.shape_cast %48 : vector<1x1x16xf32> to vector<16xf32>
    %50 = vector.shape_cast %49 : vector<16xf32> to vector<1x1x16xf32>
    %51 = vector.broadcast %50 : vector<1x1x16xf32> to vector<16x18x16xf32>
    %52 = arith.mulf %25, %51 : vector<16x18x16xf32>
    %53 = vector.extract_strided_slice %24 {offsets = [1, 1, 0], sizes = [1, 1, 16], strides = [1, 1, 1]} : vector<3x3x16xf32> to vector<1x1x16xf32>
    %54 = vector.shape_cast %53 : vector<1x1x16xf32> to vector<16xf32>
    %55 = vector.shape_cast %54 : vector<16xf32> to vector<1x1x16xf32>
    %56 = vector.broadcast %55 : vector<1x1x16xf32> to vector<16x18x16xf32>
    %57 = arith.mulf %26, %56 : vector<16x18x16xf32>
    %58 = arith.addf %52, %57 : vector<16x18x16xf32>
    %59 = vector.extract_strided_slice %24 {offsets = [2, 1, 0], sizes = [1, 1, 16], strides = [1, 1, 1]} : vector<3x3x16xf32> to vector<1x1x16xf32>
    %60 = vector.shape_cast %59 : vector<1x1x16xf32> to vector<16xf32>
    %61 = vector.shape_cast %60 : vector<16xf32> to vector<1x1x16xf32>
    %62 = vector.broadcast %61 : vector<1x1x16xf32> to vector<16x18x16xf32>
    %63 = arith.mulf %27, %62 : vector<16x18x16xf32>
    %64 = arith.addf %58, %63 : vector<16x18x16xf32>
    %65 = vector.extract_strided_slice %64 {offsets = [0, 1, 0], sizes = [16, 16, 16], strides = [1, 1, 1]} : vector<16x18x16xf32> to vector<16x16x16xf32>
    %66 = arith.addf %47, %65 : vector<16x16x16xf32>
    %67 = vector.extract_strided_slice %24 {offsets = [0, 2, 0], sizes = [1, 1, 16], strides = [1, 1, 1]} : vector<3x3x16xf32> to vector<1x1x16xf32>
    %68 = vector.shape_cast %67 : vector<1x1x16xf32> to vector<16xf32>
    %69 = vector.shape_cast %68 : vector<16xf32> to vector<1x1x16xf32>
    %70 = vector.broadcast %69 : vector<1x1x16xf32> to vector<16x18x16xf32>
    %71 = arith.mulf %25, %70 : vector<16x18x16xf32>
    %72 = vector.extract_strided_slice %24 {offsets = [1, 2, 0], sizes = [1, 1, 16], strides = [1, 1, 1]} : vector<3x3x16xf32> to vector<1x1x16xf32>
    %73 = vector.shape_cast %72 : vector<1x1x16xf32> to vector<16xf32>
    %74 = vector.shape_cast %73 : vector<16xf32> to vector<1x1x16xf32>
    %75 = vector.broadcast %74 : vector<1x1x16xf32> to vector<16x18x16xf32>
    %76 = arith.mulf %26, %75 : vector<16x18x16xf32>
    %77 = arith.addf %71, %76 : vector<16x18x16xf32>
    %78 = vector.extract_strided_slice %24 {offsets = [2, 2, 0], sizes = [1, 1, 16], strides = [1, 1, 1]} : vector<3x3x16xf32> to vector<1x1x16xf32>
    %79 = vector.shape_cast %78 : vector<1x1x16xf32> to vector<16xf32>
    %80 = vector.shape_cast %79 : vector<16xf32> to vector<1x1x16xf32>
    %81 = vector.broadcast %80 : vector<1x1x16xf32> to vector<16x18x16xf32>
    %82 = arith.mulf %27, %81 : vector<16x18x16xf32>
    %83 = arith.addf %77, %82 : vector<16x18x16xf32>
    %84 = vector.extract_strided_slice %83 {offsets = [0, 2, 0], sizes = [16, 16, 16], strides = [1, 1, 1]} : vector<16x18x16xf32> to vector<16x16x16xf32>
    %85 = arith.addf %66, %84 : vector<16x16x16xf32>
    %c0_37 = arith.constant 0 : index
    %c0_38 = arith.constant 0 : index
    %86 = vector.load %arg5[%c0_37, %c0_38] : memref<1x16xf32, #tpu.memory_space<vmem>>, vector<1x16xf32>
    %87 = vector.shape_cast %86 : vector<1x16xf32> to vector<16xf32>
    %88 = vector.shape_cast %87 : vector<16xf32> to vector<1x1x16xf32>
    %89 = vector.broadcast %88 : vector<1x1x16xf32> to vector<16x16x16xf32>
    %90 = arith.addf %85, %89 : vector<16x16x16xf32>
    %cst_39 = arith.constant 0.000000e+00 : f32
    %91 = vector.broadcast %cst_39 : f32 to vector<16x16x16xf32>
    %92 = arith.subf %91, %90 : vector<16x16x16xf32>
    %93 = math.exp %92 : vector<16x16x16xf32>
    %cst_40 = arith.constant 1.000000e+00 : f32
    %94 = vector.broadcast %cst_40 : f32 to vector<16x16x16xf32>
    %95 = arith.addf %94, %93 : vector<16x16x16xf32>
    %cst_41 = arith.constant 1.000000e+00 : f32
    %96 = vector.broadcast %cst_41 : f32 to vector<16x16x16xf32>
    %97 = arith.divf %96, %95 : vector<16x16x16xf32>
    %98 = arith.mulf %90, %97 : vector<16x16x16xf32>
    %99 = vector.shape_cast %98 : vector<16x16x16xf32> to vector<256x16xf32>
    %c0_42 = arith.constant 0 : index
    %c0_43 = arith.constant 0 : index
    %100 = vector.load %arg6[%c0_42, %c0_43] : memref<16x4xf32, #tpu.memory_space<vmem>>, vector<16x4xf32>
    %cst_44 = arith.constant dense<0.000000e+00> : vector<256x4xf32>
    %101 = tpu.matmul %99, %100, %cst_44 {dimension_numbers = #tpu.dot_dimension_numbers<[1], [0], [0], [1], [0, 0, 1, 1], [], []>} : vector<256x16xf32>, vector<16x4xf32>, vector<256x4xf32> -> vector<256x4xf32>
    %c0_45 = arith.constant 0 : index
    %c0_46 = arith.constant 0 : index
    %102 = vector.load %arg7[%c0_45, %c0_46] : memref<1x4xf32, #tpu.memory_space<vmem>>, vector<1x4xf32>
    %103 = vector.broadcast %102 : vector<1x4xf32> to vector<256x4xf32>
    %104 = arith.addf %101, %103 : vector<256x4xf32>
    %105 = vector.shape_cast %104 : vector<256x4xf32> to vector<16x16x4xf32>
    %c0_47 = arith.constant 0 : index
    %c0_48 = arith.constant 0 : index
    %c0_49 = arith.constant 0 : index
    %c0_50 = arith.constant 0 : index
    %106 = vector.load %arg1[%c0_47, %c0_48, %c0_49, %c0_50] : memref<1x16x16x4xf32, #tpu.memory_space<vmem>>, vector<1x16x16x4xf32>
    %107 = vector.shape_cast %106 : vector<1x16x16x4xf32> to vector<16x16x4xf32>
    %108 = arith.addf %105, %107 : vector<16x16x4xf32>
    %c0_51 = arith.constant 0 : index
    %c0_52 = arith.constant 0 : index
    %c0_53 = arith.constant 0 : index
    %c0_54 = arith.constant 0 : index
    %109 = vector.load %arg8[%c0_51, %c0_52, %c0_53, %c0_54] : memref<1x16x16x4xf32, #tpu.memory_space<vmem>>, vector<1x16x16x4xf32>
    %110 = vector.shape_cast %109 : vector<1x16x16x4xf32> to vector<16x16x4xf32>
    %111 = vector.shape_cast %108 : vector<16x16x4xf32> to vector<1x16x16x4xf32>
    tpu.vector_store %arg8[%c0_51, %c0_52, %c0_53, %c0_54], %111 {strides = array<i32>} : memref<1x16x16x4xf32, #tpu.memory_space<vmem>>, vector<1x16x16x4xf32>,
    return
  }
  func.func @transform_0(%arg0: i32) -> (i32, i32, i32, i32) {
    %c0_i32 = arith.constant 0 : i32
    %c0_i32_0 = arith.constant 0 : i32
    %c0_i32_1 = arith.constant 0 : i32
    %c0_i32_2 = arith.constant 0 : i32
    return %arg0, %c0_i32, %c0_i32_0, %c0_i32_1 : i32, i32, i32, i32
  }
  func.func @transform_1(%arg0: i32) -> (i32, i32) {
    %c0_i32 = arith.constant 0 : i32
    %c0_i32_0 = arith.constant 0 : i32
    %c0_i32_1 = arith.constant 0 : i32
    return %c0_i32, %c0_i32_0 : i32, i32
  }
  func.func @transform_2(%arg0: i32) -> (i32, i32) {
    %c0_i32 = arith.constant 0 : i32
    %c0_i32_0 = arith.constant 0 : i32
    %c0_i32_1 = arith.constant 0 : i32
    return %c0_i32, %c0_i32_0 : i32, i32
  }
  func.func @transform_3(%arg0: i32) -> (i32, i32, i32) {
    %c0_i32 = arith.constant 0 : i32
    %c0_i32_0 = arith.constant 0 : i32
    %c0_i32_1 = arith.constant 0 : i32
    %c0_i32_2 = arith.constant 0 : i32
    return %c0_i32, %c0_i32_0, %c0_i32_1 : i32, i32, i32
  }
  func.func @transform_4(%arg0: i32) -> (i32, i32) {
    %c0_i32 = arith.constant 0 : i32
    %c0_i32_0 = arith.constant 0 : i32
    %c0_i32_1 = arith.constant 0 : i32
    return %c0_i32, %c0_i32_0 : i32, i32
  }
  func.func @transform_5(%arg0: i32) -> (i32, i32) {
    %c0_i32 = arith.constant 0 : i32
    %c0_i32_0 = arith.constant 0 : i32
    %c0_i32_1 = arith.constant 0 : i32
    return %c0_i32, %c0_i32_0 : i32, i32
  }
  func.func @transform_6(%arg0: i32) -> (i32, i32) {
    %c0_i32 = arith.constant 0 : i32
    %c0_i32_0 = arith.constant 0 : i32
    %c0_i32_1 = arith.constant 0 : i32
    return %c0_i32, %c0_i32_0 : i32, i32
  }
  func.func @transform_7(%arg0: i32) -> (i32, i32, i32, i32) {
    %c0_i32 = arith.constant 0 : i32
    %c0_i32_0 = arith.constant 0 : i32
    %c0_i32_1 = arith.constant 0 : i32
    %c0_i32_2 = arith.constant 0 : i32
    return %arg0, %c0_i32, %c0_i32_0, %c0_i32_1 : i32, i32, i32, i32
  }
}

</mosaic_0001>

<bundles_post_ra>
// kernel: tpu_custom_call.1
= control target key start
LH: loop header
LB: loop body
LE: loop exit
PB: predicated region body
PF: predicated region fallthrough
CT: control target
= control target key end

     0   :  { %s3504_s24 = smov 0   ;;  %s5088_s0 = inlined_call_operand.vmem [shape: f32[2,16,16,4], index: 0, kind: input, shape index: {}]   ;;  %s5089_s1 = inlined_call_operand.vmem [shape: f32[4,16], index: 1, kind: input, shape index: {}]   ;;  %s5090_s2 = inlined_call_operand.vmem [shape: f32[1,16], index: 2, kind: input, shape index: {}]   ;;  %s5091_s3 = inlined_call_operand.vmem [shape: f32[3,3,16], index: 3, kind: input, shape index: {}]   ;;  %s5092_s4 = inlined_call_operand.vmem [shape: f32[1,16], index: 4, kind: input, shape index: {}]   ;;  %s5093_s5 = inlined_call_operand.vmem [shape: f32[16,4], index: 5, kind: input, shape index: {}]   ;;  %s5094_s6 = inlined_call_operand.vmem [shape: f32[1,4], index: 6, kind: input, shape index: {}]   ;;  %s5095_s7 = inlined_call_operand.vmem [shape: f32[2,16,16,4], index: 7, kind: output, shape index: {}]  }
   0x1 LB: > { %s2934_s25 = sadd.s32 4294967295, %s3461_s24   ;;  %p2938_p0 = scmp.ge.s32.totalorder %s3461_s24, 1  ;;  %s3461_s24 = sphi %s3504_s24, %s17_s24  }
   0x2   : > { %p237_p1 = scmp.lt.s32.totalorder %s3461_s24, 3 }
   0x4   : > { %p238_p2 = pnand %p2938_p0, %p237_p1 }
   0x5   : > { %v325_v0 = vld [vmem:[%s5089_s1] sm:$0xf] (!%p238_p2)  ;;  %vm462_vm0 = vcmask (!%p238_p2), 1043456   ;;  %p269_p3 = scmp.lt.s32.totalorder (!%p238_p2), %s2934_s25, 1  ;;  %vm365_vm1 = vcmask (!%p238_p2), 31744   ;;  %vm279_vm2 = vcmask (!%p238_p2), 130048   ;;  %v1096_v53 = vlaneseq (!%p238_p2) }
   0x6   : > { %241 = sbr.rel (%p238_p2) target bundleno = 822 (0x336), region = 48  ;;  %3082 = vmatprep.subr.msk.mxu0 (!%p238_p2), %vm462_vm0, %v325_v0  ;;  %v3463_v33 = vmov (!%p238_p2), 0.0   ;;  %vm288_vm3 = vcmask (!%p238_p2), 122880   ;;  %vm282_vm4 = vcmask (!%p238_p2), 123904   ;;  %v2453_v34 = vld [vmem:[%s5093_s5] sm:$0xff] (!%p238_p2)  ;;  %v2454_v35 = vld [vmem:[%s5093_s5 + $0x8] sm:$0xff] (!%p238_p2) }
   0x7   : > { %3083 = vmatpush3.msk.msra.mxu0 (!%p238_p2), %vm462_vm0, %v325_v0  ;;  %280 = vst.msk [vmem:[#allocation2] sm:$0xff] (!%p238_p2), %vm279_vm2, %v3463_v33  ;;  %281 = vst.msk [vmem:[#allocation2 + $0x8] sm:$0xff] (!%p238_p2), %vm279_vm2, %v3463_v33  ;;  %v3184_v36 = vpack.c.bf16 (!%p238_p2), %v2454_v35, %v2453_v34  ;;  %v3638_v37 = vld [vmem:[%s5090_s2] ss:$0 sm:$0xff] (!%p238_p2)  ;;  %v1097_v62 = vshrl.u32 (!%p238_p2), %v1096_v53, 7  ;;  %vm1600_vm5 = vcmask (!%p238_p2), 1046528  }
   0x8   : > { %285 = vst.msk [vmem:[#allocation2 + $0x198] sm:$0xff] (!%p238_p2), %vm279_vm2, %v3463_v33  ;;  %286 = vst.msk [vmem:[#allocation2 + $0x1a0] sm:$0xff] (!%p238_p2), %vm279_vm2, %v3463_v33  ;;  %vm2045_vm6 = vcmask (!%p238_p2), 1045504  }
   0x9   : > { %289 = vst.msk [vmem:[#allocation2] sm:$0x1] (!%p238_p2), %vm288_vm3, %v3463_v33  ;;  %290 = vst.msk [vmem:[#allocation2 + $0x18] sm:$0x1] (!%p238_p2), %vm288_vm3, %v3463_v33  ;;  %3185 = vmatprep.subr.bf16.mxu1 (!%p238_p2), %v3184_v36 }
   0xa   : > { %291 = vst.msk [vmem:[#allocation2 + $0x30] sm:$0x1] (!%p238_p2), %vm288_vm3, %v3463_v33  ;;  %292 = vst.msk [vmem:[#allocation2 + $0x48] sm:$0x1] (!%p238_p2), %vm288_vm3, %v3463_v33  ;;  %3187 = vmatpush3.bf16.msra.mxu1 (!%p238_p2), %v3184_v36 }
   0xb   : > { %293 = vst.msk [vmem:[#allocation2 + $0x60] sm:$0x1] (!%p238_p2), %vm288_vm3, %v3463_v33  ;;  %294 = vst.msk [vmem:[#allocation2 + $0x78] sm:$0x1] (!%p238_p2), %vm288_vm3, %v3463_v33 }
   0xc   : > { %295 = vst.msk [vmem:[#allocation2 + $0x90] sm:$0x1] (!%p238_p2), %vm288_vm3, %v3463_v33  ;;  %296 = vst.msk [vmem:[#allocation2 + $0xa8] sm:$0x1] (!%p238_p2), %vm288_vm3, %v3463_v33 }
   0xd   : > { %s5097_s25 = smov (!%p269_p3, %s2934_s25), 1  ;;  %297 = vst.msk [vmem:[#allocation2 + $0xc0] sm:$0x1] %vm288_vm3, %v3463_v33  ;;  %298 = vst.msk [vmem:[#allocation2 + $0xd8] sm:$0x1] %vm288_vm3, %v3463_v33 }
   0xe   : > { %s3013_s28 = sshll.u32 %s5097_s25, 8  ;;  %299 = vst.msk [vmem:[#allocation2 + $0xf0] sm:$0x1] %vm288_vm3, %v3463_v33  ;;  %300 = vst.msk [vmem:[#allocation2 + $0x108] sm:$0x1] %vm288_vm3, %v3463_v33 }
   0xf   : > { %s3523_s8 = scalar_lea.vmem %s5088_s0, %s3013_s28  ;;  %301 = vst.msk [vmem:[#allocation2 + $0x120] sm:$0x1] %vm288_vm3, %v3463_v33  ;;  %302 = vst.msk [vmem:[#allocation2 + $0x138] sm:$0x1] %vm288_vm3, %v3463_v33  ;;  %s4946_s12 = scalar_lea.vmem %s5095_s7, %s3013_s28 }
  0x10   : > { %v326_v1 = vld [vmem:[%s3523_s8] sm:$0xff]  ;;  %v327_v2 = vld [vmem:[%s3523_s8 + $0x8] sm:$0xff]  ;;  %v328_v3 = vld [vmem:[%s3523_s8 + $0x10] sm:$0xff]  ;;  %303 = vst.msk [vmem:[#allocation2 + $0x150] sm:$0x1] %vm288_vm3, %v3463_v33 }
  0x11   : > { %3084 = vmatprep.mubr.msk.f32.mxu0 %vm365_vm1, %v326_v1  ;;  %v329_v4 = vld [vmem:[%s3523_s8 + $0x18] sm:$0xff]  ;;  %v330_v5 = vld [vmem:[%s3523_s8 + $0x20] sm:$0xff]  ;;  %v331_v6 = vld [vmem:[%s3523_s8 + $0x28] sm:$0xff]  ;;  %304 = vst.msk [vmem:[#allocation2 + $0x168] sm:$0x1] %vm288_vm3, %v3463_v33 }
  0x12   : > { %3085 = vmatmul.mubr.msk.f32.vlgmr.msra.gmra.mrb[0].mxu0 %vm365_vm1, %v327_v2  ;;  %v332_v7 = vld [vmem:[%s3523_s8 + $0x30] sm:$0xff]  ;;  %v333_v8 = vld [vmem:[%s3523_s8 + $0x38] sm:$0xff]  ;;  %v334_v9 = vld [vmem:[%s3523_s8 + $0x40] sm:$0xff]  ;;  %305 = vst.msk [vmem:[#allocation2 + $0x180] sm:$0x1] %vm288_vm3, %v3463_v33 }
  0x13   : > { %3087 = vmatprep.mubr.msk.f32.mxu0 %vm365_vm1, %v328_v3  ;;  %v335_v10 = vld [vmem:[%s3523_s8 + $0x48] sm:$0xff]  ;;  %v336_v11 = vld [vmem:[%s3523_s8 + $0x50] sm:$0xff]  ;;  %v337_v12 = vld [vmem:[%s3523_s8 + $0x58] sm:$0xff]  ;;  %308 = vst.msk [vmem:[#allocation2 + $0x29] sm:$0x1] %vm288_vm3, %v3463_v33 }
  0x14   : > { %v338_v13 = vld [vmem:[%s3523_s8 + $0x60] sm:$0xff]  ;;  %v339_v14 = vld [vmem:[%s3523_s8 + $0x68] sm:$0xff]  ;;  %v340_v15 = vld [vmem:[%s3523_s8 + $0x70] sm:$0xff]  ;;  %309 = vst.msk [vmem:[#allocation2 + $0x41] sm:$0x1] %vm288_vm3, %v3463_v33 }
  0x15   : > { %v341_v16 = vld [vmem:[%s3523_s8 + $0x78] sm:$0xff]  ;;  %v342_v17 = vld [vmem:[%s3523_s8 + $0x80] sm:$0xff]  ;;  %v343_v18 = vld [vmem:[%s3523_s8 + $0x88] sm:$0xff]  ;;  %310 = vst.msk [vmem:[#allocation2 + $0x59] sm:$0x1] %vm288_vm3, %v3463_v33 }
  0x16   : > { %3088 = vmatmul.mubr.msk.f32.gmra.mrb[2].mxu0 %vm365_vm1, %v329_v4  ;;  %v344_v19 = vld [vmem:[%s3523_s8 + $0x90] sm:$0xff]  ;;  %v345_v20 = vld [vmem:[%s3523_s8 + $0x98] sm:$0xff]  ;;  %v346_v21 = vld [vmem:[%s3523_s8 + $0xa0] sm:$0xff]  ;;  %311 = vst.msk [vmem:[#allocation2 + $0x71] sm:$0x1] %vm288_vm3, %v3463_v33 }
  0x17   : > { %3090 = vmatprep.mubr.msk.f32.mxu0 %vm365_vm1, %v330_v5  ;;  %v347_v22 = vld [vmem:[%s3523_s8 + $0xa8] sm:$0xff]  ;;  %v348_v23 = vld [vmem:[%s3523_s8 + $0xb0] sm:$0xff]  ;;  %v349_v24 = vld [vmem:[%s3523_s8 + $0xb8] sm:$0xff]  ;;  %312 = vst.msk [vmem:[#allocation2 + $0x89] sm:$0x1] %vm288_vm3, %v3463_v33 }
  0x18   : > { %v350_v25 = vld [vmem:[%s3523_s8 + $0xc0] sm:$0xff]  ;;  %v351_v26 = vld [vmem:[%s3523_s8 + $0xc8] sm:$0xff]  ;;  %v352_v27 = vld [vmem:[%s3523_s8 + $0xd0] sm:$0xff]  ;;  %313 = vst.msk [vmem:[#allocation2 + $0xa1] sm:$0x1] %vm288_vm3, %v3463_v33 }
  0x19   : > { %v353_v28 = vld [vmem:[%s3523_s8 + $0xd8] sm:$0xff]  ;;  %v354_v29 = vld [vmem:[%s3523_s8 + $0xe0] sm:$0xff]  ;;  %v355_v30 = vld [vmem:[%s3523_s8 + $0xe8] sm:$0xff]  ;;  %314 = vst.msk [vmem:[#allocation2 + $0xb9] sm:$0x1] %vm288_vm3, %v3463_v33 }
  0x1a   : > { %3091 = vmatmul.mubr.msk.f32.gmra.mrb[4].mxu0 %vm365_vm1, %v331_v6  ;;  %v356_v31 = vld [vmem:[%s3523_s8 + $0xf0] sm:$0xff]  ;;  %v357_v32 = vld [vmem:[%s3523_s8 + $0xf8] sm:$0xff]  ;;  %315 = vst.msk [vmem:[#allocation2 + $0xd1] sm:$0x1] %vm288_vm3, %v3463_v33  ;;  %316 = vst.msk [vmem:[#allocation2 + $0xe9] sm:$0x1] %vm288_vm3, %v3463_v33 }
  0x1b   : > { %3093 = vmatprep.mubr.msk.f32.mxu0 %vm365_vm1, %v332_v7  ;;  %317 = vst.msk [vmem:[#allocation2 + $0x101] sm:$0x1] %vm288_vm3, %v3463_v33  ;;  %318 = vst.msk [vmem:[#allocation2 + $0x119] sm:$0x1] %vm288_vm3, %v3463_v33  ;;  %v1098_v7 = vsub.s32 0, %v1097_v62 }
  0x1c   : > { %319 = vst.msk [vmem:[#allocation2 + $0x131] sm:$0x1] %vm288_vm3, %v3463_v33  ;;  %320 = vst.msk [vmem:[#allocation2 + $0x149] sm:$0x1] %vm288_vm3, %v3463_v33 }
  0x1d   : > { %321 = vst.msk [vmem:[#allocation2 + $0x161] sm:$0x1] %vm288_vm3, %v3463_v33  ;;  %322 = vst.msk [vmem:[#allocation2 + $0x179] sm:$0x1] %vm288_vm3, %v3463_v33 }
  0x1e   : > { %3094 = vmatmul.mubr.msk.f32.gmra.mrb[6].mxu0 %vm365_vm1, %v333_v8  ;;  %323 = vst.msk [vmem:[#allocation2 + $0x191] sm:$0x1] %vm288_vm3, %v3463_v33  ;;  %306 = vst.msk [vmem:[#allocation2 + $0x198] sm:$0x1] %vm288_vm3, %v3463_v33  ;;  %v3672_v8 = vsub.s32 1, %v1097_v62 }
  0x1f   : > { %3096 = vmatprep.mubr.msk.f32.mxu0 %vm365_vm1, %v334_v9  ;;  %283 = vst.msk [vmem:[#allocation2 + $0x10] sm:$0x3] %vm282_vm4, %v3463_v33  ;;  %287 = vst.msk [vmem:[#allocation2 + $0x1a8] sm:$0x3] %vm282_vm4, %v3463_v33 }
  0x20   : > { %307 = vst.msk [vmem:[#allocation2 + $0x11] sm:$0x1] %vm288_vm3, %v3463_v33  ;;  %324 = vst.msk [vmem:[#allocation2 + $0x1a9] sm:$0x1] %vm288_vm3, %v3463_v33 }
  0x22   : > { %3097 = vmatmul.mubr.msk.f32.gmra.mrb[8].mxu0 %vm365_vm1, %v335_v10 }
  0x23   : > { %3099 = vmatprep.mubr.msk.f32.mxu0 %vm365_vm1, %v336_v11 }
  0x26   : > { %3100 = vmatmul.mubr.msk.f32.gmra.mrb[10].mxu0 %vm365_vm1, %v337_v12 }
  0x27   : > { %3102 = vmatprep.mubr.msk.f32.mxu0 %vm365_vm1, %v338_v13  ;;  %v948_v13 = vld [vmem:[%s5091_s3] sm:$0x7] }
  0x2a   : > { %3103 = vmatmul.mubr.msk.f32.gmra.mrb[12].mxu0 %vm365_vm1, %v339_v14 }
  0x2b   : > { %3105 = vmatprep.mubr.msk.f32.mxu0 %vm365_vm1, %v340_v15 }
  0x2e   : > { %3106 = vmatmul.mubr.msk.f32.gmra.mrb[14].mxu0 %vm365_vm1, %v341_v16 }
  0x2f   : > { %3108 = vmatprep.mubr.msk.f32.mxu0 %vm365_vm1, %v342_v17 }
  0x32   : > { %3109 = vmatmul.mubr.msk.f32.gmra.mrb[16].mxu0 %vm365_vm1, %v343_v18  ;;  %v3686_v18 = vld [vmem:[%s5091_s3 + $0x4] sm:$0x7] }
  0x33   : > { %3111 = vmatprep.mubr.msk.f32.mxu0 %vm365_vm1, %v344_v19 }
  0x36   : > { %3112 = vmatmul.mubr.msk.f32.gmra.mrb[18].mxu0 %vm365_vm1, %v345_v20 }
  0x37   : > { %3114 = vmatprep.mubr.msk.f32.mxu0 %vm365_vm1, %v346_v21 }
  0x3a   : > { %3115 = vmatmul.mubr.msk.f32.gmra.mrb[20].mxu0 %vm365_vm1, %v347_v22 }
  0x3b   : > { %3117 = vmatprep.mubr.msk.f32.mxu0 %vm365_vm1, %v348_v23  ;;  %v3690_v23 = vrot.slane %v948_v13, %v1098_v7 }
  0x3e   : > { %3118 = vmatmul.mubr.msk.f32.gmra.mrb[22].mxu0 %vm365_vm1, %v349_v24  ;;  %v3693_v24 = vrot.slane %v948_v13, %v3672_v8 }
  0x3f   : > { %3120 = vmatprep.mubr.msk.f32.mxu0 %vm365_vm1, %v350_v25 }
  0x42   : > { %3121 = vmatmul.mubr.msk.f32.gmra.mrb[24].mxu0 %vm365_vm1, %v351_v26 }
  0x43   : > { %3123 = vmatprep.mubr.msk.f32.mxu0 %vm365_vm1, %v352_v27 }
  0x46   : > { %3124 = vmatmul.mubr.msk.f32.gmra.mrb[26].mxu0 %vm365_vm1, %v353_v28 }
  0x47   : > { %3126 = vmatprep.mubr.msk.f32.mxu0 %vm365_vm1, %v354_v29  ;;  %v951_v29 = vld [vmem:[#allocation2] sm:$0xff] }
  0x48   : > { %v3724_v53 = vmul.f32 %v3693_v24, %v951_v29 }
  0x4a   : > { %3127 = vmatmul.mubr.msk.f32.gmra.mrb[28].mxu0 %vm365_vm1, %v355_v30  ;;  %v3700_v30 = vrot.slane %v3686_v18, %v3672_v8 }
  0x4b   : > { %3129 = vmatprep.mubr.msk.f32.mxu0 %vm365_vm1, %v356_v31 }
  0x4e   : > { %3130 = vmatmul.mubr.msk.f32.gmra.mrb[30].mxu0 %vm365_vm1, %v357_v32 }
  0xe5   : > { %v3086_v38 = vpop.f32.mrb[0].mxu0 }
  0xe6   : > { %v3641_v39 = vadd.f32 %v3086_v38, %v3638_v37  ;;  %v532_v40 = vpop.f32.mrb[1].mxu0  ;;  %v3707_v38 = vrot.slane %v3686_v18, %v1098_v7 }
  0xe7   : > { %v3644_v41 = vadd.f32 %v3638_v37, %v532_v40 }
  0xe8   : > { %v692_v42 = vsub.f32 0.0, %v3641_v39 }
  0xe9   : > { %v691_v43 = vsub.f32 0.0, %v3644_v41  ;;  %v3089_v44 = vpop.f32.mrb[2].mxu0 }
  0xea   : > { %v725_v45 = vmul.f32 1.442695, %v692_v42  ;;  %v3649_v46 = vadd.f32 %v3089_v44, %v3638_v37  ;;  %v542_v47 = vpop.f32.mrb[3].mxu0  ;;  %v3713_v44 = vmul.f32 %v3690_v23, %v951_v29 }
  0xeb   : > { %v723_v48 = vmul.f32 1.442695, %v691_v43  ;;  %v3652_v49 = vadd.f32 %v3638_v37, %v542_v47  ;;  %v3710_v43 = vld [vmem:[#allocation2 + $0x8] sm:$0xff] }
  0xec   : > { %3197 = vpow2.f32 %v725_v45  ;;  %v694_v50 = vsub.f32 0.0, %v3649_v46  ;;  %v3715_v45 = vsub.s32 2, %v1097_v62  ;;  %v3732_v62 = vmul.f32 %v3693_v24, %v3710_v43 }
  0xed   : > { %3199 = vpow2.f32 %v723_v48  ;;  %v693_v51 = vsub.f32 0.0, %v3652_v49  ;;  %v3092_v52 = vpop.f32.mrb[4].mxu0 }
  0xee   : > { %v729_v54 = vmul.f32 1.442695, %v694_v50  ;;  %v3657_v55 = vadd.f32 %v3092_v52, %v3638_v37  ;;  %v552_v56 = vpop.f32.mrb[5].mxu0  ;;  %v950_v52 = vld [vmem:[%s5091_s3 + $0x8] sm:$0x7] }
  0xef   : > { %v727_v57 = vmul.f32 1.442695, %v693_v51  ;;  %v3660_v58 = vadd.f32 %v3638_v37, %v552_v56 }
  0xf0   : > { %3201 = vpow2.f32 %v729_v54  ;;  %v696_v59 = vsub.f32 0.0, %v3657_v55 }
  0xf1   : > { %3203 = vpow2.f32 %v727_v57  ;;  %v695_v60 = vsub.f32 0.0, %v3660_v58  ;;  %v3095_v61 = vpop.f32.mrb[6].mxu0 }
  0xf2   : > { %v733_v63 = vmul.f32 1.442695, %v696_v59  ;;  %v3665_v0 = vadd.f32 %v3095_v61, %v3638_v37  ;;  %v562_v1 = vpop.f32.mrb[7].mxu0 }
  0xf3   : > { %v731_v2 = vmul.f32 1.442695, %v695_v60  ;;  %v3668_v3 = vadd.f32 %v3638_v37, %v562_v1 }
  0xf4   : > { %3205 = vpow2.f32 %v733_v63  ;;  %v698_v4 = vsub.f32 0.0, %v3665_v0 }
  0xf5   : > { %3207 = vpow2.f32 %v731_v2  ;;  %v697_v5 = vsub.f32 0.0, %v3668_v3  ;;  %v3098_v6 = vpop.f32.mrb[8].mxu0  ;;  %v3735_v2 = vrot.slane %v950_v52, %v1098_v7 }
  0xf6   : > { %v3198_v9 = vpop.eup %3197  ;;  %v737_v10 = vmul.f32 1.442695, %v698_v4  ;;  %v3675_v11 = vadd.f32 %v3098_v6, %v3638_v37  ;;  %v572_v12 = vpop.f32.mrb[9].mxu0  ;;  %v3738_v4 = vrot.slane %v948_v13, %v3715_v45 }
  0xf7   : > { %v3200_v14 = vpop.eup %3199  ;;  %v788_v15 = vadd.f32 1.0, %v3198_v9  ;;  %v735_v16 = vmul.f32 1.442695, %v697_v5  ;;  %v3681_v17 = vadd.f32 %v3638_v37, %v572_v12  ;;  %v3744_v12 = vrot.slane %v950_v52, %v3672_v8 }
  0xf8   : > { %v787_v19 = vadd.f32 1.0, %v3200_v14  ;;  %3209 = vpow2.f32 %v737_v10  ;;  %v700_v20 = vsub.f32 0.0, %v3675_v11 }
  0xf9   : > { %3211 = vrcp.f32 %v788_v15  ;;  %v699_v21 = vsub.f32 0.0, %v3681_v17  ;;  %v3101_v22 = vpop.f32.mrb[10].mxu0 }
  0xfa   : > { %v3202_v25 = vpop.eup %3201  ;;  %3213 = vrcp.f32 %v787_v19  ;;  %v741_v26 = vmul.f32 1.442695, %v700_v20  ;;  %v3696_v27 = vadd.f32 %v3101_v22, %v3638_v37  ;;  %v582_v28 = vpop.f32.mrb[11].mxu0 }
  0xfb   : > { %v3204_v31 = vpop.eup %3203  ;;  %v790_v32 = vadd.f32 1.0, %v3202_v25  ;;  %3215 = vpow2.f32 %v735_v16  ;;  %v739_v33 = vmul.f32 1.442695, %v699_v21  ;;  %v3703_v34 = vadd.f32 %v3638_v37, %v582_v28 }
  0xfc   : > { %v789_v35 = vadd.f32 1.0, %v3204_v31  ;;  %3217 = vpow2.f32 %v741_v26  ;;  %v702_v36 = vsub.f32 0.0, %v3696_v27  ;;  %v3753_v21 = vrot.slane %v3686_v18, %v3715_v45 }
  0xfd   : > { %3219 = vrcp.f32 %v790_v32  ;;  %v701_v40 = vsub.f32 0.0, %v3703_v34  ;;  %v3104_v42 = vpop.f32.mrb[12].mxu0  ;;  %v3758_v28 = vmul.f32 %v3738_v4, %v951_v29  ;;  %v3770_v29 = vmul.f32 %v3738_v4, %v3710_v43 }
  0xfe   : > { %v3206_v47 = vpop.eup %3205  ;;  %3221 = vrcp.f32 %v789_v35  ;;  %v745_v48 = vmul.f32 1.442695, %v702_v36  ;;  %v3718_v50 = vadd.f32 %v3104_v42, %v3638_v37  ;;  %v592_v51 = vpop.f32.mrb[13].mxu0 }
  0xff   : > { %v3208_v54 = vpop.eup %3207  ;;  %v792_v56 = vadd.f32 1.0, %v3206_v47  ;;  %3223 = vpow2.f32 %v739_v33  ;;  %v743_v57 = vmul.f32 1.442695, %v701_v40  ;;  %v3727_v59 = vadd.f32 %v3638_v37, %v592_v51 }
 0x100   : > { %v791_v60 = vadd.f32 1.0, %v3208_v54  ;;  %3225 = vpow2.f32 %v745_v48  ;;  %v704_v61 = vsub.f32 0.0, %v3718_v50  ;;  %v3776_v51 = vmul.f32 %v3690_v23, %v3710_v43 }
 0x101   : > { %3227 = vrcp.f32 %v792_v56  ;;  %v703_v63 = vsub.f32 0.0, %v3727_v59  ;;  %v3107_v1 = vpop.f32.mrb[14].mxu0 }
 0x102   : > { %v3210_v5 = vpop.eup %3209  ;;  %3229 = vrcp.f32 %v791_v60  ;;  %v749_v6 = vmul.f32 1.442695, %v704_v61  ;;  %v3741_v9 = vadd.f32 %v3107_v1, %v3638_v37  ;;  %v602_v10 = vpop.f32.mrb[15].mxu0  ;;  %v3781_v61 = vrot.slane %v950_v52, %v3715_v45 }
 0x103   : > { %v3212_v14 = vpop.eup %3211  ;;  %v794_v15 = vadd.f32 1.0, %v3210_v5  ;;  %3231 = vpow2.f32 %v743_v57  ;;  %v747_v16 = vmul.f32 1.442695, %v703_v63  ;;  %v3747_v7 = vadd.f32 %v3638_v37, %v602_v10  ;;  %v953_v63 = vld [vmem:[#allocation2 + $0x10] sm:$0x3] }
 0x104   : > { %v3214_v19 = vpop.eup %3213  ;;  %v884_v13 = vmul.f32 %v3212_v14, %v3641_v39  ;;  %3233 = vpow2.f32 %v749_v6  ;;  %v706_v20 = vsub.f32 0.0, %v3741_v9 }
 0x105   : > { %v3216_v22 = vpop.eup %3215  ;;  %v883_v8 = vmul.f32 %v3214_v19, %v3644_v41  ;;  %3235 = vrcp.f32 %v794_v15  ;;  %v705_v25 = vsub.f32 0.0, %v3747_v7  ;;  %v3110_v26 = vpop.f32.mrb[16].mxu0  ;;  %v3794_v19 = vmul.f32 %v3693_v24, %v953_v63 }
 0x106   : > { %v3218_v31 = vpop.eup %3217  ;;  %917 = vst.msk [vmem:[#allocation2 + $0x21] sm:$0xff] %vm279_vm2, %v884_v13  ;;  %v793_v39 = vadd.f32 1.0, %v3216_v22  ;;  %3237 = vpow2.f32 %v747_v16  ;;  %v753_v32 = vmul.f32 1.442695, %v706_v20  ;;  %v3762_v33 = vadd.f32 %v3110_v26, %v3638_v37  ;;  %v612_v18 = vpop.f32.mrb[17].mxu0 }
 0x107   : > { %v3220_v35 = vpop.eup %3219  ;;  %916 = vst.msk [vmem:[#allocation2 + $0x19] sm:$0xff] %vm279_vm2, %v883_v8  ;;  %v796_v41 = vadd.f32 1.0, %v3218_v31  ;;  %v751_v36 = vmul.f32 1.442695, %v705_v25  ;;  %v3766_v40 = vadd.f32 %v3638_v37, %v612_v18  ;;  %v3799_v25 = vmul.f32 %v3738_v4, %v953_v63 }
 0x108   : > { %v3222_v42 = vpop.eup %3221  ;;  %v886_v47 = vmul.f32 %v3220_v35, %v3649_v46  ;;  %3239 = vrcp.f32 %v793_v39  ;;  %v708_v48 = vsub.f32 0.0, %v3762_v33 }
 0x109   : > { %v3224_v54 = vpop.eup %3223  ;;  %v885_v56 = vmul.f32 %v3222_v42, %v3652_v49  ;;  %3241 = vrcp.f32 %v796_v41  ;;  %v707_v57 = vsub.f32 0.0, %v3766_v40  ;;  %v3113_v60 = vpop.f32.mrb[18].mxu0 }
 0x10a   : > { %v3226_v1 = vpop.eup %3225  ;;  %919 = vst.msk [vmem:[#allocation2 + $0x39] sm:$0xff] %vm279_vm2, %v886_v47  ;;  %v795_v46 = vadd.f32 1.0, %v3224_v54  ;;  %3243 = vpow2.f32 %v753_v32  ;;  %v757_v5 = vmul.f32 1.442695, %v708_v48  ;;  %v3785_v43 = vadd.f32 %v3113_v60, %v3638_v37  ;;  %v622_v6 = vpop.f32.mrb[19].mxu0 }
 0x10b   : > { %v3228_v10 = vpop.eup %3227  ;;  %918 = vst.msk [vmem:[#allocation2 + $0x31] sm:$0xff] %vm279_vm2, %v885_v56  ;;  %v798_v49 = vadd.f32 1.0, %v3226_v1  ;;  %3245 = vpow2.f32 %v751_v36  ;;  %v755_v14 = vmul.f32 1.442695, %v707_v57  ;;  %v3789_v45 = vadd.f32 %v3638_v37, %v622_v6 }
 0x10c   : > { %v3230_v52 = vpop.eup %3229  ;;  %v888_v15 = vmul.f32 %v3228_v10, %v3657_v55  ;;  %3247 = vrcp.f32 %v795_v46  ;;  %v710_v16 = vsub.f32 0.0, %v3785_v43 }
 0x10d   : > { %v3232_v13 = vpop.eup %3231  ;;  %v887_v20 = vmul.f32 %v3230_v52, %v3660_v58  ;;  %3249 = vrcp.f32 %v798_v49  ;;  %v709_v22 = vsub.f32 0.0, %v3789_v45  ;;  %v3116_v8 = vpop.f32.mrb[20].mxu0 }
 0x10e   : > { %v3234_v26 = vpop.eup %3233  ;;  %921 = vst.msk [vmem:[#allocation2 + $0x51] sm:$0xff] %vm279_vm2, %v888_v15  ;;  %v797_v55 = vadd.f32 1.0, %v3232_v13  ;;  %3251 = vpow2.f32 %v757_v5  ;;  %v761_v31 = vmul.f32 1.442695, %v710_v16  ;;  %v3803_v39 = vadd.f32 %v3116_v8, %v3638_v37  ;;  %v632_v32 = vpop.f32.mrb[21].mxu0  ;;  %v3805_v18 = vld [vmem:[#allocation2 + $0x18] sm:$0xff] }
 0x10f   : > { %v3236_v58 = vpop.eup %3235  ;;  %920 = vst.msk [vmem:[#allocation2 + $0x49] sm:$0xff] %vm279_vm2, %v887_v20  ;;  %v800_v35 = vadd.f32 1.0, %v3234_v26  ;;  %3253 = vpow2.f32 %v755_v14  ;;  %v759_v41 = vmul.f32 1.442695, %v709_v22  ;;  %v3809_v36 = vadd.f32 %v3638_v37, %v632_v32  ;;  %v3822_v6 = vld [vmem:[#allocation2 + $0x20] sm:$0xff] }
 0x110   : > { %v3238_v42 = vpop.eup %3237  ;;  %v890_v47 = vmul.f32 %v3236_v58, %v3665_v0  ;;  %3255 = vrcp.f32 %v797_v55  ;;  %v712_v48 = vsub.f32 0.0, %v3803_v39  ;;  %v1136_v54 = vmul.f32 %v3707_v38, %v3805_v18 }
 0x111   : > { %3257 = vrcp.f32 %v800_v35  ;;  %v799_v56 = vadd.f32 1.0, %v3238_v42  ;;  %v711_v57 = vsub.f32 0.0, %v3809_v36  ;;  %v3119_v60 = vpop.f32.mrb[22].mxu0  ;;  %v1356_v63 = vmul.f32 %v3700_v30, %v3805_v18 }
 0x112   : > { %v3240_v1 = vpop.eup %3239  ;;  %923 = vst.msk [vmem:[#allocation2 + $0x69] sm:$0xff] %vm279_vm2, %v890_v47  ;;  %3259 = vpow2.f32 %v761_v31  ;;  %v765_v46 = vmul.f32 1.442695, %v712_v48  ;;  %v3820_v0 = vadd.f32 %v3119_v60, %v3638_v37  ;;  %v642_v5 = vpop.f32.mrb[23].mxu0  ;;  %v3824_v10 = vld [vmem:[#allocation2 + $0x30] sm:$0xff]  ;;  %v1168_v49 = vadd.f32 %v1136_v54, %v3713_v44 }
 0x113   : > { %v3242_v14 = vpop.eup %3241  ;;  %v889_v52 = vmul.f32 %v3240_v1, %v3668_v3  ;;  %3261 = vrcp.f32 %v799_v56  ;;  %v763_v15 = vmul.f32 1.442695, %v711_v57  ;;  %v3829_v16 = vadd.f32 %v3638_v37, %v642_v5 }
 0x114   : > { %v3244_v13 = vpop.eup %3243  ;;  %v892_v20 = vmul.f32 %v3242_v14, %v3675_v11  ;;  %3263 = vpow2.f32 %v759_v41  ;;  %v714_v22 = vsub.f32 0.0, %v3820_v0  ;;  %v1204_v8 = vmul.f32 %v3735_v2, %v3824_v10 }
 0x115   : > { %v3246_v26 = vpop.eup %3245  ;;  %922 = vst.msk [vmem:[#allocation2 + $0x61] sm:$0xff] %vm279_vm2, %v889_v52  ;;  %v802_v44 = vadd.f32 1.0, %v3244_v13  ;;  %3265 = vpow2.f32 %v765_v46  ;;  %v713_v3 = vsub.f32 0.0, %v3829_v16  ;;  %v3122_v55 = vpop.f32.mrb[24].mxu0  ;;  %v1357_v31 = vmul.f32 %v3700_v30, %v3822_v6 }
 0x116   : > { %v3248_v32 = vpop.eup %3247  ;;  %925 = vst.msk [vmem:[#allocation2 + $0x81] sm:$0xff] %vm279_vm2, %v892_v20  ;;  %v801_v11 = vadd.f32 1.0, %v3246_v26  ;;  %3267 = vpow2.f32 %v763_v15  ;;  %v769_v58 = vmul.f32 1.442695, %v714_v22  ;;  %v3841_v35 = vadd.f32 %v3122_v55, %v3638_v37  ;;  %v652_v41 = vpop.f32.mrb[25].mxu0 }
 0x117   : > { %v3250_v42 = vpop.eup %3249  ;;  %v891_v47 = vmul.f32 %v3248_v32, %v3681_v17  ;;  %3269 = vrcp.f32 %v802_v44  ;;  %v767_v48 = vmul.f32 1.442695, %v713_v3  ;;  %v3845_v54 = vadd.f32 %v3638_v37, %v652_v41  ;;  %v3867_v41 = vld [vmem:[#allocation2 + $0x38] sm:$0xff] }
 0x118   : > { %v3252_v56 = vpop.eup %3251  ;;  %v894_v57 = vmul.f32 %v3250_v42, %v3696_v27  ;;  %3271 = vrcp.f32 %v801_v11  ;;  %v716_v60 = vsub.f32 0.0, %v3841_v35  ;;  %v3849_v1 = vadd.f32 %v1204_v8, %v1168_v49 }
 0x119   : > { %v3254_v46 = vpop.eup %3253  ;;  %924 = vst.msk [vmem:[#allocation2 + $0x79] sm:$0xff] %vm279_vm2, %v891_v47  ;;  %v804_v5 = vadd.f32 1.0, %v3252_v56  ;;  %3273 = vpow2.f32 %v769_v58  ;;  %v715_v17 = vsub.f32 0.0, %v3845_v54  ;;  %v3125_v14 = vpop.f32.mrb[26].mxu0  ;;  %v1404_v52 = vadd.f32 %v1356_v63, %v3724_v53 }
 0x11a   : > { %v3256_v15 = vpop.eup %3255  ;;  %927 = vst.msk [vmem:[#allocation2 + $0x99] sm:$0xff] %vm279_vm2, %v894_v57  ;;  %v803_v13 = vadd.f32 1.0, %v3254_v46  ;;  %3275 = vpow2.f32 %v767_v48  ;;  %v773_v27 = vmul.f32 1.442695, %v716_v60  ;;  %v3856_v20 = vadd.f32 %v3125_v14, %v3638_v37  ;;  %v662_v49 = vpop.f32.mrb[27].mxu0 }
 0x11b   : > { %v3258_v22 = vpop.eup %3257  ;;  %v893_v8 = vmul.f32 %v3256_v15, %v3703_v34  ;;  %3277 = vrcp.f32 %v804_v5  ;;  %v771_v26 = vmul.f32 1.442695, %v715_v17  ;;  %v3860_v44 = vadd.f32 %v3638_v37, %v662_v49 }
 0x11c   : > { %v3260_v3 = vpop.eup %3259  ;;  %v896_v53 = vmul.f32 %v3258_v22, %v3718_v50  ;;  %3279 = vrcp.f32 %v803_v13  ;;  %v718_v63 = vsub.f32 0.0, %v3856_v20  ;;  %v1405_v55 = vadd.f32 %v1357_v31, %v3732_v62 }
 0x11d   : > { %v3262_v32 = vpop.eup %3261  ;;  %926 = vst.msk [vmem:[#allocation2 + $0x91] sm:$0xff] %vm279_vm2, %v893_v8  ;;  %v806_v11 = vadd.f32 1.0, %v3260_v3  ;;  %3281 = vpow2.f32 %v773_v27  ;;  %v717_v34 = vsub.f32 0.0, %v3860_v44  ;;  %v3128_v58 = vpop.f32.mrb[28].mxu0  ;;  %v1456_v42 = vmul.f32 %v3744_v12, %v3824_v10 }
 0x11e   : > { %v3264_v50 = vpop.eup %3263  ;;  %929 = vst.msk [vmem:[#allocation2 + $0xb1] sm:$0xff] %vm279_vm2, %v896_v53  ;;  %v895_v47 = vmul.f32 %v3262_v32, %v3727_v59  ;;  %3283 = vpow2.f32 %v771_v26  ;;  %v777_v62 = vmul.f32 1.442695, %v718_v63  ;;  %v3874_v31 = vadd.f32 %v3128_v58, %v3638_v37  ;;  %v672_v48 = vpop.f32.mrb[29].mxu0 }
 0x11f   : > { %v3266_v56 = vpop.eup %3265  ;;  %3285 = vrcp.f32 %v806_v11  ;;  %v805_v57 = vadd.f32 1.0, %v3264_v50  ;;  %v775_v60 = vmul.f32 1.442695, %v717_v34  ;;  %v3877_v46 = vadd.f32 %v3638_v37, %v672_v48 }
 0x120   : > { %v3268_v5 = vpop.eup %3267  ;;  %928 = vst.msk [vmem:[#allocation2 + $0xa9] sm:$0xff] %vm279_vm2, %v895_v47  ;;  %v808_v17 = vadd.f32 1.0, %v3266_v56  ;;  %3287 = vpow2.f32 %v777_v62  ;;  %v720_v59 = vsub.f32 0.0, %v3874_v31  ;;  %v1457_v14 = vmul.f32 %v3744_v12, %v3867_v41 }
 0x121   : > { %v3270_v15 = vpop.eup %3269  ;;  %3289 = vrcp.f32 %v805_v57  ;;  %v807_v13 = vadd.f32 1.0, %v3268_v5  ;;  %v719_v27 = vsub.f32 0.0, %v3877_v46  ;;  %v3131_v49 = vpop.f32.mrb[30].mxu0  ;;  %v1504_v22 = vadd.f32 %v1456_v42, %v1404_v52 }
 0x122   : > { %v3272_v8 = vpop.eup %3271  ;;  %v898_v26 = vmul.f32 %v3270_v15, %v3741_v9  ;;  %3291 = vrcp.f32 %v808_v17  ;;  %v781_v3 = vmul.f32 1.442695, %v720_v59  ;;  %v3886_v53 = vadd.f32 %v3131_v49, %v3638_v37  ;;  %v682_v63 = vpop.f32.mrb[31].mxu0 }
 0x123   : > { %v3274_v32 = vpop.eup %3273  ;;  %v897_v11 = vmul.f32 %v3272_v8, %v3747_v7  ;;  %3293 = vrcp.f32 %v807_v13  ;;  %v779_v34 = vmul.f32 1.442695, %v719_v27  ;;  %v3890_v58 = vadd.f32 %v3638_v37, %v682_v63 }
 0x124   : > { %v3276_v50 = vpop.eup %3275  ;;  %931 = vst.msk [vmem:[#allocation2 + $0xc9] sm:$0xff] %vm279_vm2, %v898_v26  ;;  %v810_v52 = vadd.f32 1.0, %v3274_v32  ;;  %3295 = vpow2.f32 %v775_v60  ;;  %v722_v9 = vsub.f32 0.0, %v3886_v53  ;;  %v3894_v42 = vadd.f32 %v1457_v14, %v1405_v55 }
 0x125   : > { %v3278_v47 = vpop.eup %3277  ;;  %930 = vst.msk [vmem:[#allocation2 + $0xc1] sm:$0xff] %vm279_vm2, %v897_v11  ;;  %v809_v62 = vadd.f32 1.0, %v3276_v50  ;;  %3297 = vpow2.f32 %v781_v3  ;;  %v721_v7 = vsub.f32 0.0, %v3890_v58  ;;  %v1601_v48 = vrot.slane %v1504_v22, 1  ;;  %v1001_v50 = vld [vmem:[#allocation2 + $0x28] sm:$0x3] }
 0x126   : > { %v3280_v56 = vpop.eup %3279  ;;  %v900_v37 = vmul.f32 %v3278_v47, %v3762_v33  ;;  %3299 = vrcp.f32 %v810_v52  ;;  %v785_v57 = vmul.f32 1.442695, %v722_v9  ;;  %v1602_v5 = vrot.slane %v3894_v42, 1  ;;  %v1050_v52 = vld [vmem:[#allocation2 + $0x40] sm:$0x3] }
 0x127   : > { %v3282_v60 = vpop.eup %3281  ;;  %v899_v55 = vmul.f32 %v3280_v56, %v3766_v40  ;;  %3301 = vrcp.f32 %v809_v62  ;;  %v783_v17 = vmul.f32 1.442695, %v721_v7  ;;  %v1801_v59 = vmul.f32 %v3753_v21, %v3805_v18 }
 0x128   : > { %v3284_v14 = vpop.eup %3283  ;;  %933 = vst.msk [vmem:[#allocation2 + $0xe1] sm:$0xff] %vm279_vm2, %v900_v37  ;;  %v812_v15 = vadd.f32 1.0, %v3282_v60  ;;  %3303 = vpow2.f32 %v779_v34  ;;  %v1603_v33 = vsel %vm1600_vm5, %v1601_v48, %v1602_v5  ;;  %v1802_v13 = vmul.f32 %v3753_v21, %v3822_v6 }
 0x129   : > { %v3286_v27 = vpop.eup %3285  ;;  %932 = vst.msk [vmem:[#allocation2 + $0xd9] sm:$0xff] %vm279_vm2, %v899_v55  ;;  %v811_v40 = vadd.f32 1.0, %v3284_v14  ;;  %3305 = vpow2.f32 %v785_v57  ;;  %v1713_v49 = vadd.f32 %v1603_v33, %v3849_v1  ;;  %v1849_v22 = vadd.f32 %v1801_v59, %v3758_v28 }
 0x12a   : > { %v3288_v8 = vpop.eup %3287  ;;  %v902_v26 = vmul.f32 %v3286_v27, %v3785_v43  ;;  %3307 = vrcp.f32 %v812_v15  ;;  %v1850_v3 = vadd.f32 %v1802_v13, %v3770_v29  ;;  %v1901_v63 = vmul.f32 %v3781_v61, %v3824_v10  ;;  %v3935_v13 = vld [vmem:[#allocation2 + $0x48] sm:$0xff] }
 0x12b   : > { %v3290_v32 = vpop.eup %3289  ;;  %3309 = vrcp.f32 %v811_v40  ;;  %v814_v11 = vadd.f32 1.0, %v3288_v8  ;;  %v1902_v34 = vmul.f32 %v3781_v61, %v3867_v41  ;;  %v1137_v28 = vmul.f32 %v3707_v38, %v3822_v6 }
 0x12c   : > { %v3292_v1 = vpop.eup %3291  ;;  %935 = vst.msk [vmem:[#allocation2 + $0xf9] sm:$0xff] %vm279_vm2, %v902_v26  ;;  %v901_v43 = vmul.f32 %v3290_v32, %v3789_v45  ;;  %3311 = vpow2.f32 %v783_v17  ;;  %v1949_v29 = vadd.f32 %v1901_v63, %v1849_v22  ;;  %v1205_v9 = vmul.f32 %v3735_v2, %v3867_v41  ;;  %v3944_v26 = vld [vmem:[%s5092_s4] ss:$0 sm:$0xff] }
 0x12d   : > { %v3294_v47 = vpop.eup %3293  ;;  %v904_v62 = vmul.f32 %v3292_v1, %v3803_v39  ;;  %3313 = vrcp.f32 %v814_v11  ;;  %v1950_v7 = vadd.f32 %v1902_v34, %v1850_v3  ;;  %v1169_v48 = vadd.f32 %v1137_v28, %v3776_v51 }
 0x12e   : > { %v3296_v56 = vpop.eup %3295  ;;  %934 = vst.msk [vmem:[#allocation2 + $0xf1] sm:$0xff] %vm279_vm2, %v901_v43  ;;  %v903_v37 = vmul.f32 %v3294_v47, %v3809_v36  ;;  %v2046_v57 = vrot.slane %v1949_v29, 2  ;;  %v1358_v45 = vmul.f32 %v3700_v30, %v1001_v50  ;;  %v1458_v60 = vmul.f32 %v3744_v12, %v1050_v52 }
 0x12f   : > { %v3298_v55 = vpop.eup %3297  ;;  %937 = vst.msk [vmem:[#allocation2 + $0x111] sm:$0xff] %vm279_vm2, %v904_v62  ;;  %v813_v17 = vadd.f32 1.0, %v3296_v56  ;;  %v2047_v59 = vrot.slane %v1950_v7, 2  ;;  %v1237_v39 = vadd.f32 %v1205_v9, %v1169_v48  ;;  %v1803_v14 = vmul.f32 %v3753_v21, %v1001_v50 }
 0x130   : > { %v3300_v15 = vpop.eup %3299  ;;  %936 = vst.msk [vmem:[#allocation2 + $0x109] sm:$0xff] %vm279_vm2, %v903_v37  ;;  %v816_v51 = vadd.f32 1.0, %v3298_v55  ;;  %v1406_v33 = vadd.f32 %v1358_v45, %v3794_v19  ;;  %v1903_v36 = vmul.f32 %v3781_v61, %v1050_v52  ;;  %v1102_v27 = vmul.f32 %v3690_v23, %v3805_v18  ;;  %v3967_v55 = vld [vmem:[#allocation2 + $0x50] sm:$0xff] }
 0x131   : > { %v3302_v40 = vpop.eup %3301  ;;  %v906_v22 = vmul.f32 %v3300_v15, %v3820_v0  ;;  %3315 = vrcp.f32 %v813_v17  ;;  %v2048_v8 = vsel %vm2045_vm6, %v2046_v57, %v2047_v59  ;;  %v1851_v19 = vadd.f32 %v1803_v14, %v3799_v25 }
 0x132   : > { %v3304_v3 = vpop.eup %3303  ;;  %v905_v63 = vmul.f32 %v3302_v40, %v3829_v16  ;;  %3317 = vrcp.f32 %v816_v51  ;;  %v2158_v32 = vadd.f32 %v2048_v8, %v1713_v49  ;;  %v1506_v11 = vadd.f32 %v1458_v60, %v1406_v33 }
 0x133   : > { %v3306_v34 = vpop.eup %3305  ;;  %939 = vst.msk [vmem:[#allocation2 + $0x129] sm:$0xff] %vm279_vm2, %v906_v22  ;;  %v815_v0 = vadd.f32 1.0, %v3304_v3  ;;  %v1951_v50 = vadd.f32 %v1903_v36, %v1851_v19  ;;  %v1138_v52 = vmul.f32 %v3707_v38, %v3824_v10  ;;  %v1206_v28 = vmul.f32 %v3735_v2, %v3935_v13 }
 0x134   : > { %v3308_v1 = vpop.eup %3307  ;;  %938 = vst.msk [vmem:[#allocation2 + $0x121] sm:$0xff] %vm279_vm2, %v905_v63  ;;  %v818_v25 = vadd.f32 1.0, %v3306_v34  ;;  %v3955_v16 = vadd.f32 %v3944_v26, %v2158_v32  ;;  %v1604_v49 = vrot.slane %v1506_v11, 1  ;;  %v1307_v43 = vmul.f32 %v3693_v24, %v3805_v18 }
 0x135   : > { %v3310_v29 = vpop.eup %3309  ;;  %v908_v9 = vmul.f32 %v3308_v1, %v3841_v35  ;;  %3319 = vrcp.f32 %v815_v0  ;;  %v2049_v47 = vrot.slane %v1951_v50, 2  ;;  %v1170_v62 = vadd.f32 %v1138_v52, %v1102_v27  ;;  %v956_v52 = vld [vmem:[#allocation2 + $0x28] sm:$0x3] }
 0x136   : > { %v3312_v7 = vpop.eup %3311  ;;  %v907_v48 = vmul.f32 %v3310_v29, %v3845_v54  ;;  %3321 = vrcp.f32 %v818_v25  ;;  %v2229_v56 = vsub.f32 0.0, %v3955_v16  ;;  %v1605_v37 = vsel %vm1600_vm5, %v1602_v5, %v1604_v49 }
 0x137   : > { %v3314_v57 = vpop.eup %3313  ;;  %941 = vst.msk [vmem:[#allocation2 + $0x141] sm:$0xff] %vm279_vm2, %v908_v9  ;;  %v817_v45 = vadd.f32 1.0, %v3312_v7  ;;  %v1714_v60 = vadd.f32 %v1605_v37, %v1237_v39  ;;  %v2050_v35 = vsel %vm2045_vm6, %v2047_v59, %v2049_v47  ;;  %v1238_v17 = vadd.f32 %v1206_v28, %v1170_v62  ;;  %v1004_v9 = vld [vmem:[#allocation2 + $0x40] sm:$0x3] }
 0x138   : > { %940 = vst.msk [vmem:[#allocation2 + $0x139] sm:$0xff] %vm279_vm2, %v907_v48  ;;  %v910_v54 = vmul.f32 %v3314_v57, %v3856_v20  ;;  %v2261_v14 = vmul.f32 1.442695, %v2229_v56  ;;  %v1308_v42 = vmul.f32 %v3693_v24, %v3822_v6  ;;  %v1359_v5 = vmul.f32 %v3700_v30, %v3824_v10  ;;  %v1053_v56 = vld [vmem:[#allocation2 + $0x58] sm:$0x3] }
 0x139   : > { %3323 = vrcp.f32 %v817_v45  ;;  %v2159_v15 = vadd.f32 %v2050_v35, %v1714_v60  ;;  %v1360_v39 = vmul.f32 %v3700_v30, %v3867_v41  ;;  %v1459_v59 = vmul.f32 %v3744_v12, %v3935_v13 }
 0x13a   : > { %943 = vst.msk [vmem:[#allocation2 + $0x159] sm:$0xff] %vm279_vm2, %v910_v54  ;;  %3325 = vpow2.f32 %v2261_v14  ;;  %v1407_v51 = vadd.f32 %v1359_v5, %v1307_v43  ;;  %v1460_v20 = vmul.f32 %v3744_v12, %v3967_v55  ;;  %v1752_v33 = vmul.f32 %v3738_v4, %v3805_v18 }
 0x13b   : > { %v3316_v36 = vpop.eup %3315  ;;  %v3985_v27 = vadd.f32 %v3944_v26, %v2159_v15  ;;  %v1408_v40 = vadd.f32 %v1360_v39, %v1308_v42  ;;  %v1753_v22 = vmul.f32 %v3738_v4, %v3822_v6  ;;  %v1804_v8 = vmul.f32 %v3753_v21, %v3824_v10 }
 0x13c   : > { %v3318_v19 = vpop.eup %3317  ;;  %v909_v3 = vmul.f32 %v3316_v36, %v3860_v44  ;;  %v1507_v63 = vadd.f32 %v1459_v59, %v1407_v51  ;;  %v1805_v32 = vmul.f32 %v3753_v21, %v3867_v41  ;;  %v1904_v18 = vmul.f32 %v3781_v61, %v3935_v13  ;;  %v4022_v59 = vld [vmem:[#allocation2 + $0x60] sm:$0xff] }
 0x13d   : > { %v912_v11 = vmul.f32 %v3318_v19, %v3874_v31  ;;  %v2230_v34 = vsub.f32 0.0, %v3985_v27  ;;  %v3998_v0 = vadd.f32 %v1460_v20, %v1408_v40  ;;  %v1852_v50 = vadd.f32 %v1804_v8, %v1752_v33 }
 0x13e   : > { %942 = vst.msk [vmem:[#allocation2 + $0x151] sm:$0xff] %vm279_vm2, %v909_v3  ;;  %v1606_v28 = vrot.slane %v1507_v63, 1  ;;  %v1853_v1 = vadd.f32 %v1805_v32, %v1753_v22  ;;  %v1905_v44 = vmul.f32 %v3781_v61, %v3967_v55  ;;  %v1103_v25 = vmul.f32 %v3690_v23, %v3822_v6  ;;  %v4029_v63 = vld [vmem:[#allocation2 + $0x68] sm:$0xff] }
 0x13f   : > { %v3320_v49 = vpop.eup %3319  ;;  %945 = vst.msk [vmem:[#allocation2 + $0x171] sm:$0xff] %vm279_vm2, %v912_v11  ;;  %v2263_v31 = vmul.f32 1.442695, %v2230_v34  ;;  %v1607_v43 = vrot.slane %v3998_v0, 1  ;;  %v1952_v29 = vadd.f32 %v1904_v18, %v1852_v50  ;;  %v1139_v47 = vmul.f32 %v3707_v38, %v3867_v41 }
 0x140   : > { %v3322_v62 = vpop.eup %3321  ;;  %v911_v7 = vmul.f32 %v3320_v49, %v3877_v46  ;;  %v1953_v48 = vadd.f32 %v1905_v44, %v1853_v1  ;;  %v1207_v37 = vmul.f32 %v3735_v2, %v3967_v55  ;;  %v1309_v6 = vmul.f32 %v3693_v24, %v956_v52 }
 0x141   : > { %v914_v57 = vmul.f32 %v3322_v62, %v3886_v53  ;;  %3327 = vpow2.f32 %v2263_v31  ;;  %v1608_v45 = vsel %vm1600_vm5, %v1606_v28, %v1607_v43  ;;  %v2051_v60 = vrot.slane %v1952_v29, 2 }
 0x142   : > { %944 = vst.msk [vmem:[#allocation2 + $0x169] sm:$0xff] %vm279_vm2, %v911_v7  ;;  %v1715_v35 = vadd.f32 %v1608_v45, %v1238_v17  ;;  %v2052_v54 = vrot.slane %v1953_v48, 2  ;;  %v1171_v14 = vadd.f32 %v1139_v47, %v1103_v25  ;;  %v1361_v46 = vmul.f32 %v3700_v30, %v1004_v9 }
 0x143   : > { %v3324_v42 = vpop.eup %3323  ;;  %947 = vst.msk [vmem:[#allocation2 + $0x189] sm:$0xff] %vm279_vm2, %v914_v57  ;;  %v1461_v5 = vmul.f32 %v3744_v12, %v1053_v56  ;;  %v1754_v15 = vmul.f32 %v3738_v4, %v956_v52  ;;  %v1806_v53 = vmul.f32 %v3753_v21, %v1004_v9  ;;  %v1906_v39 = vmul.f32 %v3781_v61, %v1053_v56 }
 0x144   : > { %v3326_v51 = vpop.eup %3325  ;;  %v913_v17 = vmul.f32 %v3324_v42, %v3890_v58  ;;  %v2053_v20 = vsel %vm2045_vm6, %v2051_v60, %v2052_v54  ;;  %v1239_v33 = vadd.f32 %v1207_v37, %v1171_v14  ;;  %v1409_v36 = vadd.f32 %v1361_v46, %v1309_v6 }
 0x145   : > { %v2325_v40 = vadd.f32 1.0, %v3326_v51  ;;  %v2160_v22 = vadd.f32 %v2053_v20, %v1715_v35  ;;  %v1854_v8 = vadd.f32 %v1806_v53, %v1754_v15  ;;  %v1104_v19 = vmul.f32 %v3690_v23, %v3824_v10  ;;  %v959_v51 = vld [vmem:[#allocation2 + $0x40] sm:$0x3] }
 0x146   : > { %946 = vst.msk [vmem:[#allocation2 + $0x181] sm:$0xff] %vm279_vm2, %v913_v17  ;;  %v1509_v3 = vadd.f32 %v1461_v5, %v1409_v36  ;;  %v1140_v32 = vmul.f32 %v3707_v38, %v3935_v13  ;;  %v1208_v58 = vmul.f32 %v3735_v2, %v4022_v59  ;;  %v1310_v18 = vmul.f32 %v3693_v24, %v3824_v10  ;;  %v1007_v17 = vld [vmem:[#allocation2 + $0x58] sm:$0x3] }
 0x147   : > { %3329 = vrcp.f32 %v2325_v40  ;;  %v4038_v11 = vadd.f32 %v3944_v26, %v2160_v22  ;;  %v1954_v34 = vadd.f32 %v1906_v39, %v1854_v8  ;;  %v1311_v0 = vmul.f32 %v3693_v24, %v3867_v41 }
 0x148   : > { %v1609_v50 = vrot.slane %v1509_v3, 1  ;;  %v1172_v52 = vadd.f32 %v1140_v32, %v1104_v19  ;;  %v1362_v28 = vmul.f32 %v3700_v30, %v3935_v13  ;;  %v1363_v1 = vmul.f32 %v3700_v30, %v3967_v55 }
 0x149   : > { %v2231_v44 = vsub.f32 0.0, %v4038_v11  ;;  %v2054_v25 = vrot.slane %v1954_v34, 2  ;;  %v1462_v49 = vmul.f32 %v3744_v12, %v4022_v59  ;;  %v1463_v31 = vmul.f32 %v3744_v12, %v4029_v63 }
 0x14a   : > { %v1610_v29 = vsel %vm1600_vm5, %v1607_v43, %v1609_v50  ;;  %v1240_v9 = vadd.f32 %v1208_v58, %v1172_v52  ;;  %v1410_v47 = vadd.f32 %v1362_v28, %v1310_v18  ;;  %v1411_v62 = vadd.f32 %v1363_v1, %v1311_v0 }
 0x14b   : > { %v3328_v7 = vpop.eup %3327  ;;  %v2265_v48 = vmul.f32 1.442695, %v2231_v44  ;;  %v1716_v56 = vadd.f32 %v1610_v29, %v1239_v33  ;;  %v2055_v37 = vsel %vm2045_vm6, %v2052_v54, %v2054_v25  ;;  %v1755_v6 = vmul.f32 %v3738_v4, %v3824_v10  ;;  %v1056_v33 = vld [vmem:[#allocation2 + $0x70] sm:$0x3] }
 0x14c   : > { %v2326_v57 = vadd.f32 1.0, %v3328_v7  ;;  %v1510_v45 = vadd.f32 %v1462_v49, %v1410_v47  ;;  %v4055_v60 = vadd.f32 %v1463_v31, %v1411_v62  ;;  %v1756_v35 = vmul.f32 %v3738_v4, %v3867_v41  ;;  %v4086_v31 = vld [vmem:[#allocation2 + $0x78] sm:$0xff] }
 0x14d   : > { %3331 = vpow2.f32 %v2265_v48  ;;  %v2161_v43 = vadd.f32 %v2055_v37, %v1716_v56  ;;  %v1807_v14 = vmul.f32 %v3753_v21, %v3935_v13  ;;  %v1808_v46 = vmul.f32 %v3753_v21, %v3967_v55 }
 0x14e   : > { %3333 = vrcp.f32 %v2326_v57  ;;  %v1611_v54 = vrot.slane %v1510_v45, 1  ;;  %v1612_v42 = vrot.slane %v4055_v60, 1  ;;  %v1907_v10 = vmul.f32 %v3781_v61, %v4022_v59 }
 0x14f   : > { %v4067_v5 = vadd.f32 %v3944_v26, %v2161_v43  ;;  %v1855_v15 = vadd.f32 %v1807_v14, %v1755_v6  ;;  %v1856_v53 = vadd.f32 %v1808_v46, %v1756_v35  ;;  %v1908_v39 = vmul.f32 %v3781_v61, %v4029_v63 }
 0x150   : > { %v1613_v20 = vsel %vm1600_vm5, %v1611_v54, %v1612_v42  ;;  %v1105_v36 = vmul.f32 %v3690_v23, %v3867_v41  ;;  %v1141_v40 = vmul.f32 %v3707_v38, %v3967_v55  ;;  %v1209_v22 = vmul.f32 %v3735_v2, %v4029_v63 }
 0x151   : > { %v3330_v8 = vpop.eup %3329  ;;  %v2232_v19 = vsub.f32 0.0, %v4067_v5  ;;  %v1717_v3 = vadd.f32 %v1613_v20, %v1240_v9  ;;  %v1955_v32 = vadd.f32 %v1907_v10, %v1855_v15  ;;  %v1956_v58 = vadd.f32 %v1908_v39, %v1856_v53  ;;  %v4104_v10 = vld [vmem:[#allocation2 + $0x80] sm:$0xff] }
 0x152   : > { %v2421_v18 = vmul.f32 %v3330_v8, %v3955_v16  ;;  %v1173_v34 = vadd.f32 %v1141_v40, %v1105_v36  ;;  %v1312_v0 = vmul.f32 %v3693_v24, %v959_v51  ;;  %v1364_v50 = vmul.f32 %v3700_v30, %v1007_v17 }
 0x153   : > { %v2267_v41 = vmul.f32 1.442695, %v2232_v19  ;;  %v2056_v52 = vrot.slane %v1955_v32, 2  ;;  %v2057_v28 = vrot.slane %v1956_v58, 2  ;;  %v1464_v1 = vmul.f32 %v3744_v12, %v1056_v33 }
 0x154   : > { %3136 = vmatprep.mubr.msk.f32.mxu1 %vm279_vm2, %v2421_v18  ;;  %v1412_v44 = vadd.f32 %v1364_v50, %v1312_v0  ;;  %v1757_v25 = vmul.f32 %v3738_v4, %v959_v51  ;;  %v1809_v49 = vmul.f32 %v3753_v21, %v1007_v17  ;;  %v1241_v29 = vadd.f32 %v1209_v22, %v1173_v34 }
 0x155   : > { %3335 = vpow2.f32 %v2267_v41  ;;  %v2058_v16 = vsel %vm2045_vm6, %v2056_v52, %v2057_v28  ;;  %v1909_v9 = vmul.f32 %v3781_v61, %v1056_v33  ;;  %v1142_v48 = vmul.f32 %v3707_v38, %v4022_v59 }
 0x156   : > { %v2162_v47 = vadd.f32 %v2058_v16, %v1717_v3  ;;  %v1512_v62 = vadd.f32 %v1464_v1, %v1412_v44  ;;  %v1857_v7 = vadd.f32 %v1809_v49, %v1757_v25  ;;  %v1106_v37 = vmul.f32 %v3690_v23, %v3935_v13 }
 0x157   : > { %v3332_v56 = vpop.eup %3331  ;;  %v1210_v6 = vmul.f32 %v3735_v2, %v4086_v31  ;;  %v1313_v57 = vmul.f32 %v3693_v24, %v3935_v13  ;;  %v1365_v45 = vmul.f32 %v3700_v30, %v4022_v59  ;;  %v1314_v53 = vmul.f32 %v3693_v24, %v3967_v55 }
 0x158   : > { %v3334_v60 = vpop.eup %3333  ;;  %v2327_v35 = vadd.f32 1.0, %v3332_v56  ;;  %v4101_v43 = vadd.f32 %v3944_v26, %v2162_v47  ;;  %v1614_v14 = vrot.slane %v1512_v62, 1  ;;  %v1957_v46 = vadd.f32 %v1909_v9, %v1857_v7  ;;  %v1010_v62 = vld [vmem:[#allocation2 + $0x70] sm:$0x3]  ;;  %v1059_v7 = vld [vmem:[#allocation2 + $0x88] sm:$0x3] }
 0x159   : > { %v2422_v54 = vmul.f32 %v3334_v60, %v3985_v27  ;;  %v1174_v15 = vadd.f32 %v1142_v48, %v1106_v37  ;;  %v1366_v39 = vmul.f32 %v3700_v30, %v4029_v63  ;;  %v1413_v36 = vadd.f32 %v1365_v45, %v1313_v57 }
 0x15a   : > { %3337 = vrcp.f32 %v2327_v35  ;;  %v2233_v51 = vsub.f32 0.0, %v4101_v43  ;;  %v1615_v17 = vsel %vm1600_vm5, %v1612_v42, %v1614_v14  ;;  %v2059_v20 = vrot.slane %v1957_v46, 2 }
 0x15b   : > { %3137 = vmatmul.mubr.msk.f32.vlgmr.msra.gmra.mrb[0].mxu1 %vm279_vm2, %v2422_v54  ;;  %v1718_v33 = vadd.f32 %v1615_v17, %v1241_v29  ;;  %v1414_v27 = vadd.f32 %v1366_v39, %v1314_v53  ;;  %v1465_v40 = vmul.f32 %v3744_v12, %v4086_v31  ;;  %v1466_v19 = vmul.f32 %v3744_v12, %v4104_v10  ;;  %v962_v29 = vld [vmem:[#allocation2 + $0x58] sm:$0x3] }
 0x15c   : > { %v2269_v22 = vmul.f32 1.442695, %v2233_v51  ;;  %v2060_v8 = vsel %vm2045_vm6, %v2057_v28, %v2059_v20  ;;  %v1758_v3 = vmul.f32 %v3738_v4, %v3935_v13  ;;  %v1759_v58 = vmul.f32 %v3738_v4, %v3967_v55  ;;  %v4150_v20 = vld [vmem:[#allocation2 + $0x90] sm:$0xff] }
 0x15d   : > { %v2163_v32 = vadd.f32 %v2060_v8, %v1718_v33  ;;  %v1513_v42 = vadd.f32 %v1465_v40, %v1413_v36  ;;  %v1810_v18 = vmul.f32 %v3753_v21, %v4022_v59  ;;  %v4124_v34 = vadd.f32 %v1466_v19, %v1414_v27 }
 0x15e   : > { %3339 = vpow2.f32 %v2269_v22  ;;  %v1811_v0 = vmul.f32 %v3753_v21, %v4029_v63  ;;  %v1910_v50 = vmul.f32 %v3781_v61, %v4086_v31  ;;  %v1911_v1 = vmul.f32 %v3781_v61, %v4104_v10 }
 0x15f   : > { %v3336_v41 = vpop.eup %3335  ;;  %v4131_v13 = vadd.f32 %v3944_v26, %v2163_v32  ;;  %v1616_v52 = vrot.slane %v1513_v42, 1  ;;  %v1858_v28 = vadd.f32 %v1810_v18, %v1758_v3  ;;  %v1242_v25 = vadd.f32 %v1210_v6, %v1174_v15 }
 0x160   : > { %v2328_v44 = vadd.f32 1.0, %v3336_v41  ;;  %v1617_v49 = vrot.slane %v4124_v34, 1  ;;  %v1859_v16 = vadd.f32 %v1811_v0, %v1759_v58  ;;  %v1107_v48 = vmul.f32 %v3690_v23, %v3967_v55  ;;  %v4168_v41 = vld [vmem:[#allocation2 + $0x98] sm:$0xff] }
 0x161   : > { %v2234_v9 = vsub.f32 0.0, %v4131_v13  ;;  %v1958_v47 = vadd.f32 %v1910_v50, %v1858_v28  ;;  %v1143_v56 = vmul.f32 %v3707_v38, %v4029_v63  ;;  %v1211_v6 = vmul.f32 %v3735_v2, %v4104_v10 }
 0x162   : > { %3341 = vrcp.f32 %v2328_v44  ;;  %v1618_v37 = vsel %vm1600_vm5, %v1616_v52, %v1617_v49  ;;  %v1959_v57 = vadd.f32 %v1911_v1, %v1859_v16  ;;  %v1315_v14 = vmul.f32 %v3693_v24, %v962_v29 }
 0x163   : > { %v2271_v45 = vmul.f32 1.442695, %v2234_v9  ;;  %v1719_v60 = vadd.f32 %v1618_v37, %v1242_v25  ;;  %v2061_v35 = vrot.slane %v1958_v47, 2  ;;  %v1175_v15 = vadd.f32 %v1143_v56, %v1107_v48 }
 0x164   : > { %v3338_v46 = vpop.eup %3337  ;;  %v2062_v54 = vrot.slane %v1959_v57, 2  ;;  %v1367_v55 = vmul.f32 %v3700_v30, %v1010_v62  ;;  %v1467_v53 = vmul.f32 %v3744_v12, %v1059_v7  ;;  %v1760_v51 = vmul.f32 %v3738_v4, %v962_v29 }
 0x165   : > { %v2423_v39 = vmul.f32 %v3338_v46, %v4038_v11  ;;  %3343 = vpow2.f32 %v2271_v45  ;;  %v1812_v17 = vmul.f32 %v3753_v21, %v1010_v62  ;;  %v1243_v36 = vadd.f32 %v1211_v6, %v1175_v15 }
 0x166   : > { %v2063_v33 = vsel %vm2045_vm6, %v2061_v35, %v2062_v54  ;;  %v1415_v27 = vadd.f32 %v1367_v55, %v1315_v14  ;;  %v1912_v40 = vmul.f32 %v3781_v61, %v1059_v7  ;;  %v1108_v11 = vmul.f32 %v3690_v23, %v4022_v59 }
 0x167   : > { %3139 = vmatprep.mubr.msk.f32.mxu1 %vm279_vm2, %v2423_v39  ;;  %v2164_v22 = vadd.f32 %v2063_v33, %v1719_v60  ;;  %v1860_v8 = vadd.f32 %v1812_v17, %v1760_v51  ;;  %v1144_v19 = vmul.f32 %v3707_v38, %v4086_v31  ;;  %v1212_v42 = vmul.f32 %v3735_v2, %v4150_v20 }
 0x168   : > { %v3340_v3 = vpop.eup %3339  ;;  %v1515_v32 = vadd.f32 %v1467_v53, %v1415_v27  ;;  %v1316_v58 = vmul.f32 %v3693_v24, %v4022_v59  ;;  %v1368_v18 = vmul.f32 %v3700_v30, %v4086_v31  ;;  %v1317_v52 = vmul.f32 %v3693_v24, %v4029_v63  ;;  %v965_v27 = vld [vmem:[#allocation2 + $0x70] sm:$0x3] }
 0x169   : > { %v2329_v34 = vadd.f32 1.0, %v3340_v3  ;;  %v4166_v0 = vadd.f32 %v3944_v26, %v2164_v22  ;;  %v1960_v50 = vadd.f32 %v1912_v40, %v1860_v8  ;;  %v1369_v1 = vmul.f32 %v3700_v30, %v4104_v10  ;;  %v1013_v40 = vld [vmem:[#allocation2 + $0x88] sm:$0x3]  ;;  %v1062_v22 = vld [vmem:[#allocation2 + $0xa0] sm:$0x3] }
 0x16a   : > { %v1619_v28 = vrot.slane %v1515_v32, 1  ;;  %v1416_v44 = vadd.f32 %v1368_v18, %v1316_v58  ;;  %v1468_v25 = vmul.f32 %v3744_v12, %v4150_v20  ;;  %v1176_v9 = vadd.f32 %v1144_v19, %v1108_v11 }
 0x16b   : > { %3345 = vrcp.f32 %v2329_v34  ;;  %v2235_v16 = vsub.f32 0.0, %v4166_v0  ;;  %v2064_v29 = vrot.slane %v1960_v50, 2  ;;  %v1417_v7 = vadd.f32 %v1369_v1, %v1317_v52 }
 0x16c   : > { %v3342_v47 = vpop.eup %3341  ;;  %v1620_v62 = vsel %vm1600_vm5, %v1617_v49, %v1619_v28  ;;  %v1469_v48 = vmul.f32 %v3744_v12, %v4168_v41  ;;  %v1516_v56 = vadd.f32 %v1468_v25, %v1416_v44  ;;  %v1761_v14 = vmul.f32 %v3738_v4, %v4022_v59 }
 0x16d   : > { %v2424_v37 = vmul.f32 %v3342_v47, %v4067_v5  ;;  %v2273_v57 = vmul.f32 1.442695, %v2235_v16  ;;  %v1720_v6 = vadd.f32 %v1620_v62, %v1243_v36  ;;  %v2065_v45 = vsel %vm2045_vm6, %v2062_v54, %v2064_v29  ;;  %v4215_v62 = vld [vmem:[#allocation2 + $0xa8] sm:$0xff] }
 0x16e   : > { %v4182_v60 = vadd.f32 %v1469_v48, %v1417_v7  ;;  %v1621_v35 = vrot.slane %v1516_v56, 1  ;;  %v1762_v49 = vmul.f32 %v3738_v4, %v4029_v63  ;;  %v1813_v5 = vmul.f32 %v3753_v21, %v4086_v31 }
 0x16f   : > { %v3344_v46 = vpop.eup %3343  ;;  %3140 = vmatmul.mubr.msk.f32.gmra.mrb[2].mxu1 %vm279_vm2, %v2424_v37  ;;  %3347 = vpow2.f32 %v2273_v57  ;;  %v2165_v15 = vadd.f32 %v2065_v45, %v1720_v6  ;;  %v1814_v54 = vmul.f32 %v3753_v21, %v4104_v10  ;;  %v1913_v59 = vmul.f32 %v3781_v61, %v4150_v20 }
 0x170   : > { %v2330_v55 = vadd.f32 1.0, %v3344_v46  ;;  %v1622_v53 = vrot.slane %v4182_v60, 1  ;;  %v1914_v39 = vmul.f32 %v3781_v61, %v4168_v41  ;;  %v1244_v17 = vadd.f32 %v1212_v42, %v1176_v9 }
 0x171   : > { %v4199_v51 = vadd.f32 %v3944_v26, %v2165_v15  ;;  %v1861_v33 = vadd.f32 %v1813_v5, %v1761_v14  ;;  %v1862_v36 = vadd.f32 %v1814_v54, %v1762_v49  ;;  %v1109_v11 = vmul.f32 %v3690_v23, %v4029_v63 }
 0x172   : > { %3349 = vrcp.f32 %v2330_v55  ;;  %v1623_v8 = vsel %vm1600_vm5, %v1621_v35, %v1622_v53  ;;  %v1145_v19 = vmul.f32 %v3707_v38, %v4104_v10  ;;  %v1213_v42 = vmul.f32 %v3735_v2, %v4168_v41  ;;  %v4233_v55 = vld [vmem:[#allocation2 + $0xb0] sm:$0xff] }
 0x173   : > { %v2236_v3 = vsub.f32 0.0, %v4199_v51  ;;  %v1961_v32 = vadd.f32 %v1913_v59, %v1861_v33  ;;  %v1962_v58 = vadd.f32 %v1914_v39, %v1862_v36  ;;  %v1721_v18 = vadd.f32 %v1623_v8, %v1244_v17 }
 0x174   : > { %v1318_v34 = vmul.f32 %v3693_v24, %v965_v27  ;;  %v1370_v50 = vmul.f32 %v3700_v30, %v1013_v40  ;;  %v1470_v52 = vmul.f32 %v3744_v12, %v1062_v22  ;;  %v1177_v25 = vadd.f32 %v1145_v19, %v1109_v11 }
 0x175   : > { %v3346_v28 = vpop.eup %3345  ;;  %v2275_v1 = vmul.f32 1.442695, %v2236_v3  ;;  %v2066_v63 = vrot.slane %v1961_v32, 2  ;;  %v2067_v44 = vrot.slane %v1962_v58, 2  ;;  %v1763_v9 = vmul.f32 %v3738_v4, %v965_v27 }
 0x176   : > { %v2425_v16 = vmul.f32 %v3346_v28, %v4101_v43  ;;  %v1418_v29 = vadd.f32 %v1370_v50, %v1318_v34  ;;  %v1815_v47 = vmul.f32 %v3753_v21, %v1013_v40  ;;  %v1245_v48 = vadd.f32 %v1213_v42, %v1177_v25 }
 0x177   : > { %3351 = vpow2.f32 %v2275_v1  ;;  %v2068_v7 = vsel %vm2045_vm6, %v2066_v63, %v2067_v44  ;;  %v1915_v56 = vmul.f32 %v3781_v61, %v1062_v22  ;;  %v1110_v43 = vmul.f32 %v3690_v23, %v4086_v31 }
 0x178   : > { %3142 = vmatprep.mubr.msk.f32.mxu1 %vm279_vm2, %v2425_v16  ;;  %v2166_v37 = vadd.f32 %v2068_v7, %v1721_v18  ;;  %v1518_v57 = vadd.f32 %v1470_v52, %v1418_v29  ;;  %v1863_v6 = vadd.f32 %v1815_v47, %v1763_v9  ;;  %v1146_v60 = vmul.f32 %v3707_v38, %v4150_v20 }
 0x179   : > { %v3348_v45 = vpop.eup %3347  ;;  %v1214_v35 = vmul.f32 %v3735_v2, %v4215_v62  ;;  %v1319_v14 = vmul.f32 %v3693_v24, %v4086_v31  ;;  %v1371_v49 = vmul.f32 %v3700_v30, %v4150_v20  ;;  %v1320_v59 = vmul.f32 %v3693_v24, %v4104_v10 }
 0x17a   : > { %v2331_v46 = vadd.f32 1.0, %v3348_v45  ;;  %v4231_v15 = vadd.f32 %v3944_v26, %v2166_v37  ;;  %v1624_v5 = vrot.slane %v1518_v57, 1  ;;  %v1963_v54 = vadd.f32 %v1915_v56, %v1863_v6  ;;  %v1016_v57 = vld [vmem:[#allocation2 + $0xa0] sm:$0x3]  ;;  %v1065_v6 = vld [vmem:[#allocation2 + $0xb8] sm:$0x3] }
 0x17b   : > { %v1372_v39 = vmul.f32 %v3700_v30, %v4168_v41  ;;  %v1419_v17 = vadd.f32 %v1371_v49, %v1319_v14  ;;  %v1471_v33 = vmul.f32 %v3744_v12, %v4215_v62  ;;  %v1178_v19 = vadd.f32 %v1146_v60, %v1110_v43 }
 0x17c   : > { %v3350_v36 = vpop.eup %3349  ;;  %3353 = vrcp.f32 %v2331_v46  ;;  %v2237_v27 = vsub.f32 0.0, %v4231_v15  ;;  %v1625_v40 = vsel %vm1600_vm5, %v1622_v53, %v1624_v5  ;;  %v2069_v22 = vrot.slane %v1963_v54, 2 }
 0x17d   : > { %v2426_v8 = vmul.f32 %v3350_v36, %v4131_v13  ;;  %v1722_v11 = vadd.f32 %v1625_v40, %v1245_v48  ;;  %v1420_v3 = vadd.f32 %v1372_v39, %v1320_v59  ;;  %v1472_v42 = vmul.f32 %v3744_v12, %v4233_v55  ;;  %v968_v48 = vld [vmem:[#allocation2 + $0x88] sm:$0x3] }
 0x17e   : > { %v2277_v32 = vmul.f32 1.442695, %v2237_v27  ;;  %v2070_v58 = vsel %vm2045_vm6, %v2067_v44, %v2069_v22  ;;  %v1519_v18 = vadd.f32 %v1471_v33, %v1419_v17  ;;  %v1764_v50 = vmul.f32 %v3738_v4, %v4086_v31  ;;  %v4280_v22 = vld [vmem:[#allocation2 + $0xc0] sm:$0xff] }
 0x17f   : > { %3143 = vmatmul.mubr.msk.f32.gmra.mrb[4].mxu1 %vm279_vm2, %v2426_v8  ;;  %v2167_v34 = vadd.f32 %v2070_v58, %v1722_v11  ;;  %v1765_v53 = vmul.f32 %v3738_v4, %v4104_v10  ;;  %v1816_v13 = vmul.f32 %v3753_v21, %v4150_v20  ;;  %v4254_v52 = vadd.f32 %v1472_v42, %v1420_v3 }
 0x180   : > { %3355 = vpow2.f32 %v2277_v32  ;;  %v1626_v28 = vrot.slane %v1519_v18, 1  ;;  %v1817_v1 = vmul.f32 %v3753_v21, %v4168_v41  ;;  %v1916_v31 = vmul.f32 %v3781_v61, %v4215_v62 }
 0x181   : > { %v3352_v63 = vpop.eup %3351  ;;  %v4259_v44 = vadd.f32 %v3944_v26, %v2167_v34  ;;  %v1864_v25 = vadd.f32 %v1816_v13, %v1764_v50  ;;  %v1917_v16 = vmul.f32 %v3781_v61, %v4233_v55  ;;  %v1246_v9 = vadd.f32 %v1214_v35, %v1178_v19 }
 0x182   : > { %v2332_v29 = vadd.f32 1.0, %v3352_v63  ;;  %v1627_v47 = vrot.slane %v4254_v52, 1  ;;  %v1865_v7 = vadd.f32 %v1817_v1, %v1765_v53  ;;  %v1111_v43 = vmul.f32 %v3690_v23, %v4104_v10  ;;  %v4298_v63 = vld [vmem:[#allocation2 + $0xc8] sm:$0xff] }
 0x183   : > { %v2238_v56 = vsub.f32 0.0, %v4259_v44  ;;  %v1964_v37 = vadd.f32 %v1916_v31, %v1864_v25  ;;  %v1147_v45 = vmul.f32 %v3707_v38, %v4168_v41  ;;  %v1215_v35 = vmul.f32 %v3735_v2, %v4233_v55 }
 0x184   : > { %3357 = vrcp.f32 %v2332_v29  ;;  %v1628_v60 = vsel %vm1600_vm5, %v1626_v28, %v1627_v47  ;;  %v1965_v14 = vadd.f32 %v1917_v16, %v1865_v7  ;;  %v1321_v54 = vmul.f32 %v3693_v24, %v968_v48 }
 0x185   : > { %v2279_v49 = vmul.f32 1.442695, %v2238_v56  ;;  %v1723_v46 = vadd.f32 %v1628_v60, %v1246_v9  ;;  %v2071_v5 = vrot.slane %v1964_v37, 2  ;;  %v1179_v17 = vadd.f32 %v1147_v45, %v1111_v43 }
 0x186   : > { %v3354_v59 = vpop.eup %3353  ;;  %v2072_v39 = vrot.slane %v1965_v14, 2  ;;  %v1373_v10 = vmul.f32 %v3700_v30, %v1016_v57  ;;  %v1473_v33 = vmul.f32 %v3744_v12, %v1065_v6  ;;  %v1766_v27 = vmul.f32 %v3738_v4, %v968_v48 }
 0x187   : > { %v2427_v36 = vmul.f32 %v3354_v59, %v4166_v0  ;;  %3359 = vpow2.f32 %v2279_v49  ;;  %v1818_v40 = vmul.f32 %v3753_v21, %v1016_v57  ;;  %v1247_v11 = vadd.f32 %v1215_v35, %v1179_v17 }
 0x188   : > { %v2073_v8 = vsel %vm2045_vm6, %v2071_v5, %v2072_v39  ;;  %v1421_v19 = vadd.f32 %v1373_v10, %v1321_v54  ;;  %v1918_v3 = vmul.f32 %v3781_v61, %v1065_v6  ;;  %v1112_v0 = vmul.f32 %v3690_v23, %v4150_v20 }
 0x189   : > { %3145 = vmatprep.mubr.msk.f32.mxu1 %vm279_vm2, %v2427_v36  ;;  %v2168_v32 = vadd.f32 %v2073_v8, %v1723_v46  ;;  %v1866_v58 = vadd.f32 %v1818_v40, %v1766_v27  ;;  %v1148_v42 = vmul.f32 %v3707_v38, %v4215_v62  ;;  %v1216_v50 = vmul.f32 %v3735_v2, %v4280_v22 }
 0x18a   : > { %v3356_v18 = vpop.eup %3355  ;;  %v1521_v34 = vadd.f32 %v1473_v33, %v1421_v19  ;;  %v1322_v53 = vmul.f32 %v3693_v24, %v4150_v20  ;;  %v1374_v13 = vmul.f32 %v3700_v30, %v4215_v62  ;;  %v1323_v25 = vmul.f32 %v3693_v24, %v4168_v41  ;;  %v971_v19 = vld [vmem:[#allocation2 + $0xa0] sm:$0x3] }
 0x18b   : > { %v2333_v52 = vadd.f32 1.0, %v3356_v18  ;;  %v4296_v28 = vadd.f32 %v3944_v26, %v2168_v32  ;;  %v1966_v1 = vadd.f32 %v1918_v3, %v1866_v58  ;;  %v1375_v16 = vmul.f32 %v3700_v30, %v4233_v55  ;;  %v1019_v3 = vld [vmem:[#allocation2 + $0xb8] sm:$0x3]  ;;  %v1068_v32 = vld [vmem:[#allocation2 + $0xd0] sm:$0x3] }
 0x18c   : > { %v1629_v31 = vrot.slane %v1521_v34, 1  ;;  %v1422_v29 = vadd.f32 %v1374_v13, %v1322_v53  ;;  %v1474_v9 = vmul.f32 %v3744_v12, %v4280_v22  ;;  %v1180_v56 = vadd.f32 %v1148_v42, %v1112_v0 }
 0x18d   : > { %3361 = vrcp.f32 %v2333_v52  ;;  %v2239_v7 = vsub.f32 0.0, %v4296_v28  ;;  %v2074_v48 = vrot.slane %v1966_v1, 2  ;;  %v1423_v6 = vadd.f32 %v1375_v16, %v1323_v25 }
 0x18e   : > { %v3358_v37 = vpop.eup %3357  ;;  %v1630_v57 = vsel %vm1600_vm5, %v1627_v47, %v1629_v31  ;;  %v1475_v43 = vmul.f32 %v3744_v12, %v4298_v63  ;;  %v1522_v45 = vadd.f32 %v1474_v9, %v1422_v29  ;;  %v1767_v54 = vmul.f32 %v3738_v4, %v4150_v20 }
 0x18f   : > { %v2428_v60 = vmul.f32 %v3358_v37, %v4199_v51  ;;  %v2281_v14 = vmul.f32 1.442695, %v2239_v7  ;;  %v1724_v35 = vadd.f32 %v1630_v57, %v1247_v11  ;;  %v2075_v49 = vsel %vm2045_vm6, %v2072_v39, %v2074_v48  ;;  %v4345_v57 = vld [vmem:[#allocation2 + $0xd8] sm:$0xff] }
 0x190   : > { %v4312_v46 = vadd.f32 %v1475_v43, %v1423_v6  ;;  %v1631_v5 = vrot.slane %v1522_v45, 1  ;;  %v1768_v47 = vmul.f32 %v3738_v4, %v4168_v41  ;;  %v1819_v51 = vmul.f32 %v3753_v21, %v4215_v62 }
 0x191   : > { %v3360_v59 = vpop.eup %3359  ;;  %3146 = vmatmul.mubr.msk.f32.gmra.mrb[6].mxu1 %vm279_vm2, %v2428_v60  ;;  %3363 = vpow2.f32 %v2281_v14  ;;  %v2169_v17 = vadd.f32 %v2075_v49, %v1724_v35  ;;  %v1820_v39 = vmul.f32 %v3753_v21, %v4233_v55  ;;  %v1919_v20 = vmul.f32 %v3781_v61, %v4280_v22 }
 0x192   : > { %v2334_v10 = vadd.f32 1.0, %v3360_v59  ;;  %v1632_v33 = vrot.slane %v4312_v46, 1  ;;  %v1920_v36 = vmul.f32 %v3781_v61, %v4298_v63  ;;  %v1248_v40 = vadd.f32 %v1216_v50, %v1180_v56 }
 0x193   : > { %v4329_v27 = vadd.f32 %v3944_v26, %v2169_v17  ;;  %v1867_v8 = vadd.f32 %v1819_v51, %v1767_v54  ;;  %v1868_v11 = vadd.f32 %v1820_v39, %v1768_v47  ;;  %v1113_v0 = vmul.f32 %v3690_v23, %v4168_v41 }
 0x194   : > { %3365 = vrcp.f32 %v2334_v10  ;;  %v1633_v58 = vsel %vm1600_vm5, %v1631_v5, %v1632_v33  ;;  %v1149_v42 = vmul.f32 %v3707_v38, %v4233_v55  ;;  %v1217_v50 = vmul.f32 %v3735_v2, %v4298_v63  ;;  %v4363_v10 = vld [vmem:[#allocation2 + $0xe0] sm:$0xff] }
 0x195   : > { %v2240_v18 = vsub.f32 0.0, %v4329_v27  ;;  %v1967_v34 = vadd.f32 %v1919_v20, %v1867_v8  ;;  %v1968_v53 = vadd.f32 %v1920_v36, %v1868_v11  ;;  %v1725_v13 = vadd.f32 %v1633_v58, %v1248_v40 }
 0x196   : > { %v1324_v52 = vmul.f32 %v3693_v24, %v971_v19  ;;  %v1376_v1 = vmul.f32 %v3700_v30, %v1019_v3  ;;  %v1476_v25 = vmul.f32 %v3744_v12, %v1068_v32  ;;  %v1181_v9 = vadd.f32 %v1149_v42, %v1113_v0 }
 0x197   : > { %v3362_v31 = vpop.eup %3361  ;;  %v2283_v16 = vmul.f32 1.442695, %v2240_v18  ;;  %v2076_v41 = vrot.slane %v1967_v34, 2  ;;  %v2077_v29 = vrot.slane %v1968_v53, 2  ;;  %v1769_v56 = vmul.f32 %v3738_v4, %v971_v19 }
 0x198   : > { %v2429_v7 = vmul.f32 %v3362_v31, %v4231_v15  ;;  %v1424_v48 = vadd.f32 %v1376_v1, %v1324_v52  ;;  %v1821_v37 = vmul.f32 %v3753_v21, %v1019_v3  ;;  %v1249_v43 = vadd.f32 %v1217_v50, %v1181_v9 }
 0x199   : > { %3367 = vpow2.f32 %v2283_v16  ;;  %v2078_v6 = vsel %vm2045_vm6, %v2076_v41, %v2077_v29  ;;  %v1921_v45 = vmul.f32 %v3781_v61, %v1068_v32  ;;  %v1114_v15 = vmul.f32 %v3690_v23, %v4215_v62  ;;  %v4391_v41 = vld [vmem:[%s5092_s4] ss:$0 sm:$0xff] }
 0x19a   : > { %3148 = vmatprep.mubr.msk.f32.mxu1 %vm279_vm2, %v2429_v7  ;;  %v2170_v60 = vadd.f32 %v2078_v6, %v1725_v13  ;;  %v1524_v14 = vadd.f32 %v1476_v25, %v1424_v48  ;;  %v1869_v35 = vadd.f32 %v1821_v37, %v1769_v56  ;;  %v1150_v46 = vmul.f32 %v3707_v38, %v4280_v22 }
 0x19b   : > { %v3364_v49 = vpop.eup %3363  ;;  %v1218_v5 = vmul.f32 %v3735_v2, %v4345_v57  ;;  %v1325_v54 = vmul.f32 %v3693_v24, %v4215_v62  ;;  %v1377_v47 = vmul.f32 %v3700_v30, %v4280_v22  ;;  %v1326_v20 = vmul.f32 %v3693_v24, %v4233_v55 }
 0x19c   : > { %v2335_v59 = vadd.f32 1.0, %v3364_v49  ;;  %v4361_v17 = vadd.f32 %v3944_v26, %v2170_v60  ;;  %v1634_v51 = vrot.slane %v1524_v14, 1  ;;  %v1969_v39 = vadd.f32 %v1921_v45, %v1869_v35  ;;  %v1022_v14 = vld [vmem:[#allocation2 + $0xd0] sm:$0x3]  ;;  %v1071_v35 = vld [vmem:[#allocation2 + $0xe8] sm:$0x3] }
 0x19d   : > { %v1378_v36 = vmul.f32 %v3700_v30, %v4298_v63  ;;  %v1425_v40 = vadd.f32 %v1377_v47, %v1325_v54  ;;  %v1477_v8 = vmul.f32 %v3744_v12, %v4345_v57  ;;  %v1182_v0 = vadd.f32 %v1150_v46, %v1114_v15 }
 0x19e   : > { %v3366_v11 = vpop.eup %3365  ;;  %3369 = vrcp.f32 %v2335_v59  ;;  %v2241_v19 = vsub.f32 0.0, %v4361_v17  ;;  %v1635_v26 = vsel %vm1600_vm5, %v1632_v33, %v1634_v51  ;;  %v2079_v3 = vrot.slane %v1969_v39, 2 }
 0x19f   : > { %v2430_v32 = vmul.f32 %v3366_v11, %v4259_v44  ;;  %v1726_v58 = vadd.f32 %v1635_v26, %v1249_v43  ;;  %v1426_v42 = vadd.f32 %v1378_v36, %v1326_v20  ;;  %v1478_v53 = vmul.f32 %v3744_v12, %v4363_v10  ;;  %v974_v43 = vld [vmem:[#allocation2 + $0xb8] sm:$0x3] }
 0x1a0   : > { %v2285_v18 = vmul.f32 1.442695, %v2241_v19  ;;  %v2080_v34 = vsel %vm2045_vm6, %v2077_v29, %v2079_v3  ;;  %v1525_v50 = vadd.f32 %v1477_v8, %v1425_v40  ;;  %v1770_v52 = vmul.f32 %v3738_v4, %v4215_v62  ;;  %v4415_v3 = vld [vmem:[#allocation2 + $0xf0] sm:$0xff] }
 0x1a1   : > { %3149 = vmatmul.mubr.msk.f32.gmra.mrb[8].mxu1 %vm279_vm2, %v2430_v32  ;;  %v2171_v13 = vadd.f32 %v2080_v34, %v1726_v58  ;;  %v1771_v33 = vmul.f32 %v3738_v4, %v4233_v55  ;;  %v1822_v44 = vmul.f32 %v3753_v21, %v4280_v22  ;;  %v4384_v1 = vadd.f32 %v1478_v53, %v1426_v42 }
 0x1a2   : > { %3371 = vpow2.f32 %v2285_v18  ;;  %v1636_v25 = vrot.slane %v1525_v50, 1  ;;  %v1823_v31 = vmul.f32 %v3753_v21, %v4298_v63  ;;  %v1922_v9 = vmul.f32 %v3781_v61, %v4345_v57 }
 0x1a3   : > { %v3368_v16 = vpop.eup %3367  ;;  %v4394_v62 = vadd.f32 %v4391_v41, %v2171_v13  ;;  %v1870_v29 = vadd.f32 %v1822_v44, %v1770_v52  ;;  %v1923_v7 = vmul.f32 %v3781_v61, %v4363_v10  ;;  %v1250_v56 = vadd.f32 %v1218_v5, %v1182_v0 }
 0x1a4   : > { %v2336_v48 = vadd.f32 1.0, %v3368_v16  ;;  %v1637_v37 = vrot.slane %v4384_v1, 1  ;;  %v1871_v6 = vadd.f32 %v1823_v31, %v1771_v33  ;;  %v1115_v15 = vmul.f32 %v3690_v23, %v4233_v55  ;;  %v4433_v16 = vld [vmem:[#allocation2 + $0xf8] sm:$0xff] }
 0x1a5   : > { %v2242_v45 = vsub.f32 0.0, %v4394_v62  ;;  %v1970_v60 = vadd.f32 %v1922_v9, %v1870_v29  ;;  %v1151_v49 = vmul.f32 %v3707_v38, %v4298_v63  ;;  %v1219_v5 = vmul.f32 %v3735_v2, %v4363_v10 }
 0x1a6   : > { %3373 = vrcp.f32 %v2336_v48  ;;  %v1638_v46 = vsel %vm1600_vm5, %v1636_v25, %v1637_v37  ;;  %v1971_v54 = vadd.f32 %v1923_v7, %v1871_v6  ;;  %v1327_v39 = vmul.f32 %v3693_v24, %v974_v43 }
 0x1a7   : > { %v2287_v47 = vmul.f32 1.442695, %v2242_v45  ;;  %v1727_v59 = vadd.f32 %v1638_v46, %v1250_v56  ;;  %v2081_v51 = vrot.slane %v1970_v60, 2  ;;  %v1183_v40 = vadd.f32 %v1151_v49, %v1115_v15 }
 0x1a8   : > { %v3370_v20 = vpop.eup %3369  ;;  %v2082_v36 = vrot.slane %v1971_v54, 2  ;;  %v1379_v55 = vmul.f32 %v3700_v30, %v1022_v14  ;;  %v1479_v8 = vmul.f32 %v3744_v12, %v1071_v35  ;;  %v1772_v19 = vmul.f32 %v3738_v4, %v974_v43 }
 0x1a9   : > { %v2431_v11 = vmul.f32 %v3370_v20, %v4296_v28  ;;  %3375 = vpow2.f32 %v2287_v47  ;;  %v1824_v26 = vmul.f32 %v3753_v21, %v1022_v14  ;;  %v1251_v58 = vadd.f32 %v1219_v5, %v1183_v40 }
 0x1aa   : > { %v2083_v32 = vsel %vm2045_vm6, %v2081_v51, %v2082_v36  ;;  %v1427_v0 = vadd.f32 %v1379_v55, %v1327_v39  ;;  %v1924_v42 = vmul.f32 %v3781_v61, %v1071_v35  ;;  %v1116_v28 = vmul.f32 %v3690_v23, %v4280_v22 }
 0x1ab   : > { %3151 = vmatprep.mubr.msk.f32.mxu1 %vm279_vm2, %v2431_v11  ;;  %v2172_v18 = vadd.f32 %v2083_v32, %v1727_v59  ;;  %v1872_v34 = vadd.f32 %v1824_v26, %v1772_v19  ;;  %v1152_v53 = vmul.f32 %v3707_v38, %v4345_v57  ;;  %v1220_v52 = vmul.f32 %v3735_v2, %v4415_v3 }
 0x1ac   : > { %v3372_v50 = vpop.eup %3371  ;;  %v1527_v13 = vadd.f32 %v1479_v8, %v1427_v0  ;;  %v1328_v33 = vmul.f32 %v3693_v24, %v4280_v22  ;;  %v1380_v44 = vmul.f32 %v3700_v30, %v4345_v57  ;;  %v1329_v29 = vmul.f32 %v3693_v24, %v4298_v63  ;;  %v977_v0 = vld [vmem:[#allocation2 + $0xd0] sm:$0x3] }
 0x1ad   : > { %v2337_v1 = vadd.f32 1.0, %v3372_v50  ;;  %v4431_v25 = vadd.f32 %v4391_v41, %v2172_v18  ;;  %v1972_v31 = vadd.f32 %v1924_v42, %v1872_v34  ;;  %v1381_v7 = vmul.f32 %v3700_v30, %v4363_v10  ;;  %v1025_v42 = vld [vmem:[#allocation2 + $0xe8] sm:$0x3]  ;;  %v1074_v18 = vld [vmem:[#allocation2 + $0x100] sm:$0x3] }
 0x1ae   : > { %v1639_v9 = vrot.slane %v1527_v13, 1  ;;  %v1428_v48 = vadd.f32 %v1380_v44, %v1328_v33  ;;  %v1480_v56 = vmul.f32 %v3744_v12, %v4415_v3  ;;  %v1184_v45 = vadd.f32 %v1152_v53, %v1116_v28 }
 0x1af   : > { %3377 = vrcp.f32 %v2337_v1  ;;  %v2243_v6 = vsub.f32 0.0, %v4431_v25  ;;  %v2084_v43 = vrot.slane %v1972_v31, 2  ;;  %v1429_v35 = vadd.f32 %v1381_v7, %v1329_v29 }
 0x1b0   : > { %v3374_v60 = vpop.eup %3373  ;;  %v1640_v14 = vsel %vm1600_vm5, %v1637_v37, %v1639_v9  ;;  %v1481_v15 = vmul.f32 %v3744_v12, %v4433_v16  ;;  %v1528_v49 = vadd.f32 %v1480_v56, %v1428_v48  ;;  %v1773_v39 = vmul.f32 %v3738_v4, %v4280_v22 }
 0x1b1   : > { %v2432_v46 = vmul.f32 %v3374_v60, %v4329_v27  ;;  %v2289_v54 = vmul.f32 1.442695, %v2243_v6  ;;  %v1728_v5 = vadd.f32 %v1640_v14, %v1251_v58  ;;  %v2085_v47 = vsel %vm2045_vm6, %v2082_v36, %v2084_v43  ;;  %v4480_v14 = vld [vmem:[#allocation2 + $0x108] sm:$0xff] }
 0x1b2   : > { %v4447_v59 = vadd.f32 %v1481_v15, %v1429_v35  ;;  %v1641_v51 = vrot.slane %v1528_v49, 1  ;;  %v1774_v37 = vmul.f32 %v3738_v4, %v4298_v63  ;;  %v1825_v27 = vmul.f32 %v3753_v21, %v4345_v57 }
 0x1b3   : > { %v3376_v20 = vpop.eup %3375  ;;  %3152 = vmatmul.mubr.msk.f32.gmra.mrb[10].mxu1 %vm279_vm2, %v2432_v46  ;;  %3379 = vpow2.f32 %v2289_v54  ;;  %v2173_v40 = vadd.f32 %v2085_v47, %v1728_v5  ;;  %v1826_v36 = vmul.f32 %v3753_v21, %v4363_v10  ;;  %v1925_v22 = vmul.f32 %v3781_v61, %v4415_v3 }
 0x1b4   : > { %v2338_v55 = vadd.f32 1.0, %v3376_v20  ;;  %v1642_v8 = vrot.slane %v4447_v59, 1  ;;  %v1926_v11 = vmul.f32 %v3781_v61, %v4433_v16  ;;  %v1252_v26 = vadd.f32 %v1220_v52, %v1184_v45 }
 0x1b5   : > { %v4464_v19 = vadd.f32 %v4391_v41, %v2173_v40  ;;  %v1873_v32 = vadd.f32 %v1825_v27, %v1773_v39  ;;  %v1874_v58 = vadd.f32 %v1826_v36, %v1774_v37  ;;  %v1117_v28 = vmul.f32 %v3690_v23, %v4298_v63 }
 0x1b6   : > { %3381 = vrcp.f32 %v2338_v55  ;;  %v1643_v34 = vsel %vm1600_vm5, %v1641_v51, %v1642_v8  ;;  %v1153_v53 = vmul.f32 %v3707_v38, %v4363_v10  ;;  %v1221_v52 = vmul.f32 %v3735_v2, %v4433_v16  ;;  %v4498_v55 = vld [vmem:[#allocation2 + $0x110] sm:$0xff] }
 0x1b7   : > { %v2244_v50 = vsub.f32 0.0, %v4464_v19  ;;  %v1973_v13 = vadd.f32 %v1925_v22, %v1873_v32  ;;  %v1974_v33 = vadd.f32 %v1926_v11, %v1874_v58  ;;  %v1729_v44 = vadd.f32 %v1643_v34, %v1252_v26 }
 0x1b8   : > { %v1330_v1 = vmul.f32 %v3693_v24, %v977_v0  ;;  %v1382_v31 = vmul.f32 %v3700_v30, %v1025_v42  ;;  %v1482_v29 = vmul.f32 %v3744_v12, %v1074_v18  ;;  %v1185_v56 = vadd.f32 %v1153_v53, %v1117_v28 }
 0x1b9   : > { %v3378_v9 = vpop.eup %3377  ;;  %v2291_v7 = vmul.f32 1.442695, %v2244_v50  ;;  %v2086_v63 = vrot.slane %v1973_v13, 2  ;;  %v2087_v48 = vrot.slane %v1974_v33, 2  ;;  %v1775_v45 = vmul.f32 %v3738_v4, %v977_v0 }
 0x1ba   : > { %v2433_v6 = vmul.f32 %v3378_v9, %v4361_v17  ;;  %v1430_v43 = vadd.f32 %v1382_v31, %v1330_v1  ;;  %v1827_v60 = vmul.f32 %v3753_v21, %v1025_v42  ;;  %v1253_v15 = vadd.f32 %v1221_v52, %v1185_v56 }
 0x1bb   : > { %3383 = vpow2.f32 %v2291_v7  ;;  %v2088_v35 = vsel %vm2045_vm6, %v2086_v63, %v2087_v48  ;;  %v1927_v49 = vmul.f32 %v3781_v61, %v1074_v18  ;;  %v1118_v17 = vmul.f32 %v3690_v23, %v4345_v57 }
 0x1bc   : > { %3154 = vmatprep.mubr.msk.f32.mxu1 %vm279_vm2, %v2433_v6  ;;  %v2174_v46 = vadd.f32 %v2088_v35, %v1729_v44  ;;  %v1530_v54 = vadd.f32 %v1482_v29, %v1430_v43  ;;  %v1875_v5 = vadd.f32 %v1827_v60, %v1775_v45  ;;  %v1154_v59 = vmul.f32 %v3707_v38, %v4415_v3 }
 0x1bd   : > { %v3380_v47 = vpop.eup %3379  ;;  %v1222_v51 = vmul.f32 %v3735_v2, %v4480_v14  ;;  %v1331_v39 = vmul.f32 %v3693_v24, %v4345_v57  ;;  %v1383_v37 = vmul.f32 %v3700_v30, %v4415_v3  ;;  %v1332_v22 = vmul.f32 %v3693_v24, %v4363_v10 }
 0x1be   : > { %v2339_v20 = vadd.f32 1.0, %v3380_v47  ;;  %v4496_v40 = vadd.f32 %v4391_v41, %v2174_v46  ;;  %v1644_v27 = vrot.slane %v1530_v54, 1  ;;  %v1975_v36 = vadd.f32 %v1927_v49, %v1875_v5  ;;  %v1028_v54 = vld [vmem:[#allocation2 + $0x100] sm:$0x3]  ;;  %v1077_v5 = vld [vmem:[#allocation2 + $0x118] sm:$0x3] }
 0x1bf   : > { %v1384_v11 = vmul.f32 %v3700_v30, %v4433_v16  ;;  %v1431_v26 = vadd.f32 %v1383_v37, %v1331_v39  ;;  %v1483_v32 = vmul.f32 %v3744_v12, %v4480_v14  ;;  %v1186_v53 = vadd.f32 %v1154_v59, %v1118_v17 }
 0x1c0   : > { %v3382_v58 = vpop.eup %3381  ;;  %3385 = vrcp.f32 %v2339_v20  ;;  %v2245_v0 = vsub.f32 0.0, %v4496_v40  ;;  %v1645_v42 = vsel %vm1600_vm5, %v1642_v8, %v1644_v27  ;;  %v2089_v18 = vrot.slane %v1975_v36, 2 }
 0x1c1   : > { %v2434_v34 = vmul.f32 %v3382_v58, %v4394_v62  ;;  %v1730_v28 = vadd.f32 %v1645_v42, %v1253_v15  ;;  %v1432_v50 = vadd.f32 %v1384_v11, %v1332_v22  ;;  %v1484_v52 = vmul.f32 %v3744_v12, %v4498_v55  ;;  %v980_v15 = vld [vmem:[#allocation2 + $0xe8] sm:$0x3] }
 0x1c2   : > { %v2293_v13 = vmul.f32 1.442695, %v2245_v0  ;;  %v2090_v33 = vsel %vm2045_vm6, %v2087_v48, %v2089_v18  ;;  %v1531_v44 = vadd.f32 %v1483_v32, %v1431_v26  ;;  %v1776_v31 = vmul.f32 %v3738_v4, %v4345_v57  ;;  %v4545_v18 = vld [vmem:[#allocation2 + $0x120] sm:$0xff] }
 0x1c3   : > { %3155 = vmatmul.mubr.msk.f32.gmra.mrb[12].mxu1 %vm279_vm2, %v2434_v34  ;;  %v2175_v1 = vadd.f32 %v2090_v33, %v1730_v28  ;;  %v1777_v8 = vmul.f32 %v3738_v4, %v4363_v10  ;;  %v1828_v62 = vmul.f32 %v3753_v21, %v4415_v3  ;;  %v4519_v29 = vadd.f32 %v1484_v52, %v1432_v50 }
 0x1c4   : > { %3387 = vpow2.f32 %v2293_v13  ;;  %v1646_v9 = vrot.slane %v1531_v44, 1  ;;  %v1829_v7 = vmul.f32 %v3753_v21, %v4433_v16  ;;  %v1928_v57 = vmul.f32 %v3781_v61, %v4480_v14 }
 0x1c5   : > { %v3384_v63 = vpop.eup %3383  ;;  %v4524_v48 = vadd.f32 %v4391_v41, %v2175_v1  ;;  %v1876_v56 = vadd.f32 %v1828_v62, %v1776_v31  ;;  %v1929_v6 = vmul.f32 %v3781_v61, %v4498_v55  ;;  %v1254_v45 = vadd.f32 %v1222_v51, %v1186_v53 }
 0x1c6   : > { %v2340_v43 = vadd.f32 1.0, %v3384_v63  ;;  %v1647_v60 = vrot.slane %v4519_v29, 1  ;;  %v1877_v35 = vadd.f32 %v1829_v7, %v1777_v8  ;;  %v1119_v17 = vmul.f32 %v3690_v23, %v4363_v10  ;;  %v4563_v63 = vld [vmem:[#allocation2 + $0x128] sm:$0xff] }
 0x1c7   : > { %v2246_v49 = vsub.f32 0.0, %v4524_v48  ;;  %v1976_v46 = vadd.f32 %v1928_v57, %v1876_v56  ;;  %v1155_v47 = vmul.f32 %v3707_v38, %v4433_v16  ;;  %v1223_v51 = vmul.f32 %v3735_v2, %v4498_v55 }
 0x1c8   : > { %3389 = vrcp.f32 %v2340_v43  ;;  %v1648_v59 = vsel %vm1600_vm5, %v1646_v9, %v1647_v60  ;;  %v1977_v39 = vadd.f32 %v1929_v6, %v1877_v35  ;;  %v1333_v36 = vmul.f32 %v3693_v24, %v980_v15 }
 0x1c9   : > { %v2295_v37 = vmul.f32 1.442695, %v2246_v49  ;;  %v1731_v20 = vadd.f32 %v1648_v59, %v1254_v45  ;;  %v2091_v27 = vrot.slane %v1976_v46, 2  ;;  %v1187_v26 = vadd.f32 %v1155_v47, %v1119_v17 }
 0x1ca   : > { %v3386_v22 = vpop.eup %3385  ;;  %v2092_v11 = vrot.slane %v1977_v39, 2  ;;  %v1385_v10 = vmul.f32 %v3700_v30, %v1028_v54  ;;  %v1485_v32 = vmul.f32 %v3744_v12, %v1077_v5  ;;  %v1778_v0 = vmul.f32 %v3738_v4, %v980_v15 }
 0x1cb   : > { %v2435_v58 = vmul.f32 %v3386_v22, %v4431_v25  ;;  %3391 = vpow2.f32 %v2295_v37  ;;  %v1830_v42 = vmul.f32 %v3753_v21, %v1028_v54  ;;  %v1255_v28 = vadd.f32 %v1223_v51, %v1187_v26 }
 0x1cc   : > { %v2093_v34 = vsel %vm2045_vm6, %v2091_v27, %v2092_v11  ;;  %v1433_v53 = vadd.f32 %v1385_v10, %v1333_v36  ;;  %v1930_v50 = vmul.f32 %v3781_v61, %v1077_v5  ;;  %v1120_v25 = vmul.f32 %v3690_v23, %v4415_v3 }
 0x1cd   : > { %3157 = vmatprep.mubr.msk.f32.mxu1 %vm279_vm2, %v2435_v58  ;;  %v2176_v13 = vadd.f32 %v2093_v34, %v1731_v20  ;;  %v1878_v33 = vadd.f32 %v1830_v42, %v1778_v0  ;;  %v1156_v52 = vmul.f32 %v3707_v38, %v4480_v14  ;;  %v1224_v31 = vmul.f32 %v3735_v2, %v4545_v18 }
 0x1ce   : > { %v3388_v44 = vpop.eup %3387  ;;  %v1533_v1 = vadd.f32 %v1485_v32, %v1433_v53  ;;  %v1334_v8 = vmul.f32 %v3693_v24, %v4415_v3  ;;  %v1386_v62 = vmul.f32 %v3700_v30, %v4480_v14  ;;  %v1335_v56 = vmul.f32 %v3693_v24, %v4433_v16  ;;  %v983_v53 = vld [vmem:[#allocation2 + $0x100] sm:$0x3] }
 0x1cf   : > { %v2341_v29 = vadd.f32 1.0, %v3388_v44  ;;  %v4561_v9 = vadd.f32 %v4391_v41, %v2176_v13  ;;  %v1978_v7 = vadd.f32 %v1930_v50, %v1878_v33  ;;  %v1387_v6 = vmul.f32 %v3700_v30, %v4498_v55  ;;  %v1031_v50 = vld [vmem:[#allocation2 + $0x118] sm:$0x3]  ;;  %v1080_v13 = vld [vmem:[#allocation2 + $0x130] sm:$0x3] }
 0x1d0   : > { %v1649_v57 = vrot.slane %v1533_v1, 1  ;;  %v1434_v43 = vadd.f32 %v1386_v62, %v1334_v8  ;;  %v1486_v45 = vmul.f32 %v3744_v12, %v4545_v18  ;;  %v1188_v49 = vadd.f32 %v1156_v52, %v1120_v25 }
 0x1d1   : > { %3393 = vrcp.f32 %v2341_v29  ;;  %v2247_v35 = vsub.f32 0.0, %v4561_v9  ;;  %v2094_v15 = vrot.slane %v1978_v7, 2  ;;  %v1435_v5 = vadd.f32 %v1387_v6, %v1335_v56 }
 0x1d2   : > { %v3390_v46 = vpop.eup %3389  ;;  %v1650_v54 = vsel %vm1600_vm5, %v1647_v60, %v1649_v57  ;;  %v1487_v17 = vmul.f32 %v3744_v12, %v4563_v63  ;;  %v1534_v47 = vadd.f32 %v1486_v45, %v1434_v43  ;;  %v1779_v36 = vmul.f32 %v3738_v4, %v4415_v3 }
 0x1d3   : > { %v2436_v59 = vmul.f32 %v3390_v46, %v4464_v19  ;;  %v2297_v39 = vmul.f32 1.442695, %v2247_v35  ;;  %v1732_v51 = vadd.f32 %v1650_v54, %v1255_v28  ;;  %v2095_v37 = vsel %vm2045_vm6, %v2092_v11, %v2094_v15  ;;  %v4610_v54 = vld [vmem:[#allocation2 + $0x138] sm:$0xff] }
 0x1d4   : > { %v4577_v20 = vadd.f32 %v1487_v17, %v1435_v5  ;;  %v1651_v27 = vrot.slane %v1534_v47, 1  ;;  %v1780_v60 = vmul.f32 %v3738_v4, %v4433_v16  ;;  %v1831_v19 = vmul.f32 %v3753_v21, %v4480_v14 }
 0x1d5   : > { %v3392_v22 = vpop.eup %3391  ;;  %3158 = vmatmul.mubr.msk.f32.gmra.mrb[14].mxu1 %vm279_vm2, %v2436_v59  ;;  %3395 = vpow2.f32 %v2297_v39  ;;  %v2177_v26 = vadd.f32 %v2095_v37, %v1732_v51  ;;  %v1832_v11 = vmul.f32 %v3753_v21, %v4498_v55  ;;  %v1931_v3 = vmul.f32 %v3781_v61, %v4545_v18 }
 0x1d6   : > { %v2342_v10 = vadd.f32 1.0, %v3392_v22  ;;  %v1652_v32 = vrot.slane %v4577_v20, 1  ;;  %v1932_v58 = vmul.f32 %v3781_v61, %v4563_v63  ;;  %v1256_v42 = vadd.f32 %v1224_v31, %v1188_v49 }
 0x1d7   : > { %v4594_v0 = vadd.f32 %v4391_v41, %v2177_v26  ;;  %v1879_v34 = vadd.f32 %v1831_v19, %v1779_v36  ;;  %v1880_v28 = vadd.f32 %v1832_v11, %v1780_v60  ;;  %v1121_v25 = vmul.f32 %v3690_v23, %v4433_v16 }
 0x1d8   : > { %3397 = vrcp.f32 %v2342_v10  ;;  %v1653_v33 = vsel %vm1600_vm5, %v1651_v27, %v1652_v32  ;;  %v1157_v52 = vmul.f32 %v3707_v38, %v4498_v55  ;;  %v1225_v31 = vmul.f32 %v3735_v2, %v4563_v63  ;;  %v4628_v10 = vld [vmem:[#allocation2 + $0x140] sm:$0xff] }
 0x1d9   : > { %v2248_v44 = vsub.f32 0.0, %v4594_v0  ;;  %v1979_v1 = vadd.f32 %v1931_v3, %v1879_v34  ;;  %v1980_v8 = vadd.f32 %v1932_v58, %v1880_v28  ;;  %v1733_v62 = vadd.f32 %v1653_v33, %v1256_v42 }
 0x1da   : > { %v1336_v29 = vmul.f32 %v3693_v24, %v983_v53  ;;  %v1388_v7 = vmul.f32 %v3700_v30, %v1031_v50  ;;  %v1488_v56 = vmul.f32 %v3744_v12, %v1080_v13  ;;  %v1189_v45 = vadd.f32 %v1157_v52, %v1121_v25 }
 0x1db   : > { %v3394_v57 = vpop.eup %3393  ;;  %v2299_v6 = vmul.f32 1.442695, %v2248_v44  ;;  %v2096_v16 = vrot.slane %v1979_v1, 2  ;;  %v2097_v43 = vrot.slane %v1980_v8, 2  ;;  %v1781_v49 = vmul.f32 %v3738_v4, %v983_v53 }
 0x1dc   : > { %v2437_v35 = vmul.f32 %v3394_v57, %v4496_v40  ;;  %v1436_v15 = vadd.f32 %v1388_v7, %v1336_v29  ;;  %v1833_v46 = vmul.f32 %v3753_v21, %v1031_v50  ;;  %v1257_v17 = vadd.f32 %v1225_v31, %v1189_v45 }
 0x1dd   : > { %3399 = vpow2.f32 %v2299_v6  ;;  %v2098_v5 = vsel %vm2045_vm6, %v2096_v16, %v2097_v43  ;;  %v1933_v47 = vmul.f32 %v3781_v61, %v1080_v13  ;;  %v1122_v40 = vmul.f32 %v3690_v23, %v4480_v14 }
 0x1de   : > { %3160 = vmatprep.mubr.msk.f32.mxu1 %vm279_vm2, %v2437_v35  ;;  %v2178_v59 = vadd.f32 %v2098_v5, %v1733_v62  ;;  %v1536_v39 = vadd.f32 %v1488_v56, %v1436_v15  ;;  %v1881_v51 = vadd.f32 %v1833_v46, %v1781_v49  ;;  %v1158_v20 = vmul.f32 %v3707_v38, %v4545_v18 }
 0x1df   : > { %v3396_v37 = vpop.eup %3395  ;;  %v1226_v27 = vmul.f32 %v3735_v2, %v4610_v54  ;;  %v1337_v36 = vmul.f32 %v3693_v24, %v4480_v14  ;;  %v1389_v60 = vmul.f32 %v3700_v30, %v4545_v18  ;;  %v1338_v3 = vmul.f32 %v3693_v24, %v4498_v55 }
 0x1e0   : > { %v2343_v22 = vadd.f32 1.0, %v3396_v37  ;;  %v4626_v26 = vadd.f32 %v4391_v41, %v2178_v59  ;;  %v1654_v19 = vrot.slane %v1536_v39, 1  ;;  %v1981_v11 = vadd.f32 %v1933_v47, %v1881_v51  ;;  %v1034_v39 = vld [vmem:[#allocation2 + $0x130] sm:$0x3]  ;;  %v1083_v51 = vld [vmem:[#allocation2 + $0x148] sm:$0x3] }
 0x1e1   : > { %v1390_v58 = vmul.f32 %v3700_v30, %v4563_v63  ;;  %v1437_v42 = vadd.f32 %v1389_v60, %v1337_v36  ;;  %v1489_v34 = vmul.f32 %v3744_v12, %v4610_v54  ;;  %v1190_v52 = vadd.f32 %v1158_v20, %v1122_v40 }
 0x1e2   : > { %v3398_v28 = vpop.eup %3397  ;;  %3401 = vrcp.f32 %v2343_v22  ;;  %v2249_v53 = vsub.f32 0.0, %v4626_v26  ;;  %v1655_v50 = vsel %vm1600_vm5, %v1652_v32, %v1654_v19  ;;  %v2099_v13 = vrot.slane %v1981_v11, 2 }
 0x1e3   : > { %v2438_v33 = vmul.f32 %v3398_v28, %v4524_v48  ;;  %v1734_v25 = vadd.f32 %v1655_v50, %v1257_v17  ;;  %v1438_v44 = vadd.f32 %v1390_v58, %v1338_v3  ;;  %v1490_v31 = vmul.f32 %v3744_v12, %v4628_v10  ;;  %v986_v17 = vld [vmem:[#allocation2 + $0x118] sm:$0x3] }
 0x1e4   : > { %v2301_v1 = vmul.f32 1.442695, %v2249_v53  ;;  %v2100_v8 = vsel %vm2045_vm6, %v2097_v43, %v2099_v13  ;;  %v1537_v62 = vadd.f32 %v1489_v34, %v1437_v42  ;;  %v1782_v7 = vmul.f32 %v3738_v4, %v4480_v14  ;;  %v4675_v13 = vld [vmem:[#allocation2 + $0x150] sm:$0xff] }
 0x1e5   : > { %3161 = vmatmul.mubr.msk.f32.gmra.mrb[16].mxu1 %vm279_vm2, %v2438_v33  ;;  %v2179_v29 = vadd.f32 %v2100_v8, %v1734_v25  ;;  %v1783_v32 = vmul.f32 %v3738_v4, %v4498_v55  ;;  %v1834_v48 = vmul.f32 %v3753_v21, %v4545_v18  ;;  %v4649_v56 = vadd.f32 %v1490_v31, %v1438_v44 }
 0x1e6   : > { %3403 = vpow2.f32 %v2301_v1  ;;  %v1656_v57 = vrot.slane %v1537_v62, 1  ;;  %v1835_v6 = vmul.f32 %v3753_v21, %v4563_v63  ;;  %v1934_v14 = vmul.f32 %v3781_v61, %v4610_v54 }
 0x1e7   : > { %v3400_v16 = vpop.eup %3399  ;;  %v4654_v43 = vadd.f32 %v4391_v41, %v2179_v29  ;;  %v1882_v45 = vadd.f32 %v1834_v48, %v1782_v7  ;;  %v1935_v35 = vmul.f32 %v3781_v61, %v4628_v10  ;;  %v1258_v49 = vadd.f32 %v1226_v27, %v1190_v52 }
 0x1e8   : > { %v2344_v15 = vadd.f32 1.0, %v3400_v16  ;;  %v1657_v46 = vrot.slane %v4649_v56, 1  ;;  %v1883_v5 = vadd.f32 %v1835_v6, %v1783_v32  ;;  %v1123_v40 = vmul.f32 %v3690_v23, %v4498_v55  ;;  %v4693_v16 = vld [vmem:[#allocation2 + $0x158] sm:$0xff] }
 0x1e9   : > { %v2250_v47 = vsub.f32 0.0, %v4654_v43  ;;  %v1982_v59 = vadd.f32 %v1934_v14, %v1882_v45  ;;  %v1159_v37 = vmul.f32 %v3707_v38, %v4563_v63  ;;  %v1227_v27 = vmul.f32 %v3735_v2, %v4628_v10 }
 0x1ea   : > { %3405 = vrcp.f32 %v2344_v15  ;;  %v1658_v20 = vsel %vm1600_vm5, %v1656_v57, %v1657_v46  ;;  %v1983_v36 = vadd.f32 %v1935_v35, %v1883_v5  ;;  %v1339_v11 = vmul.f32 %v3693_v24, %v986_v17 }
 0x1eb   : > { %v2303_v60 = vmul.f32 1.442695, %v2250_v47  ;;  %v1735_v22 = vadd.f32 %v1658_v20, %v1258_v49  ;;  %v2101_v19 = vrot.slane %v1982_v59, 2  ;;  %v1191_v42 = vadd.f32 %v1159_v37, %v1123_v40 }
 0x1ec   : > { %v3402_v3 = vpop.eup %3401  ;;  %v2102_v58 = vrot.slane %v1983_v36, 2  ;;  %v1391_v55 = vmul.f32 %v3700_v30, %v1034_v39  ;;  %v1491_v34 = vmul.f32 %v3744_v12, %v1083_v51  ;;  %v1784_v53 = vmul.f32 %v3738_v4, %v986_v17 }
 0x1ed   : > { %v2439_v28 = vmul.f32 %v3402_v3, %v4561_v9  ;;  %3407 = vpow2.f32 %v2303_v60  ;;  %v1836_v50 = vmul.f32 %v3753_v21, %v1034_v39  ;;  %v1259_v25 = vadd.f32 %v1227_v27, %v1191_v42 }
 0x1ee   : > { %v2103_v33 = vsel %vm2045_vm6, %v2101_v19, %v2102_v58  ;;  %v1439_v52 = vadd.f32 %v1391_v55, %v1339_v11  ;;  %v1936_v44 = vmul.f32 %v3781_v61, %v1083_v51  ;;  %v1124_v9 = vmul.f32 %v3690_v23, %v4545_v18 }
 0x1ef   : > { %3163 = vmatprep.mubr.msk.f32.mxu1 %vm279_vm2, %v2439_v28  ;;  %v2180_v1 = vadd.f32 %v2103_v33, %v1735_v22  ;;  %v1884_v8 = vadd.f32 %v1836_v50, %v1784_v53  ;;  %v1160_v31 = vmul.f32 %v3707_v38, %v4610_v54  ;;  %v1228_v7 = vmul.f32 %v3735_v2, %v4675_v13 }
 0x1f0   : > { %v3404_v62 = vpop.eup %3403  ;;  %v1539_v29 = vadd.f32 %v1491_v34, %v1439_v52  ;;  %v1340_v32 = vmul.f32 %v3693_v24, %v4545_v18  ;;  %v1392_v48 = vmul.f32 %v3700_v30, %v4610_v54  ;;  %v1341_v45 = vmul.f32 %v3693_v24, %v4563_v63  ;;  %v989_v52 = vld [vmem:[#allocation2 + $0x130] sm:$0x3] }
 0x1f1   : > { %v2345_v56 = vadd.f32 1.0, %v3404_v62  ;;  %v4691_v57 = vadd.f32 %v4391_v41, %v2180_v1  ;;  %v1984_v6 = vadd.f32 %v1936_v44, %v1884_v8  ;;  %v1393_v35 = vmul.f32 %v3700_v30, %v4628_v10  ;;  %v1037_v44 = vld [vmem:[#allocation2 + $0x148] sm:$0x3]  ;;  %v1086_v1 = vld [vmem:[#allocation2 + $0x160] sm:$0x3] }
 0x1f2   : > { %v1659_v14 = vrot.slane %v1539_v29, 1  ;;  %v1440_v15 = vadd.f32 %v1392_v48, %v1340_v32  ;;  %v1492_v49 = vmul.f32 %v3744_v12, %v4675_v13  ;;  %v1192_v47 = vadd.f32 %v1160_v31, %v1124_v9 }
 0x1f3   : > { %3409 = vrcp.f32 %v2345_v56  ;;  %v2251_v5 = vsub.f32 0.0, %v4691_v57  ;;  %v2104_v17 = vrot.slane %v1984_v6, 2  ;;  %v1441_v51 = vadd.f32 %v1393_v35, %v1341_v45 }
 0x1f4   : > { %v3406_v59 = vpop.eup %3405  ;;  %v1660_v39 = vsel %vm1600_vm5, %v1657_v46, %v1659_v14  ;;  %v1493_v40 = vmul.f32 %v3744_v12, %v4693_v16  ;;  %v1540_v37 = vadd.f32 %v1492_v49, %v1440_v15  ;;  %v1785_v11 = vmul.f32 %v3738_v4, %v4545_v18 }
 0x1f5   : > { %v2440_v20 = vmul.f32 %v3406_v59, %v4594_v0  ;;  %v2305_v36 = vmul.f32 1.442695, %v2251_v5  ;;  %v1736_v27 = vadd.f32 %v1660_v39, %v1259_v25  ;;  %v2105_v60 = vsel %vm2045_vm6, %v2102_v58, %v2104_v17  ;;  %v4740_v39 = vld [vmem:[#allocation2 + $0x168] sm:$0xff] }
 0x1f6   : > { %v4707_v22 = vadd.f32 %v1493_v40, %v1441_v51  ;;  %v1661_v19 = vrot.slane %v1540_v37, 1  ;;  %v1786_v46 = vmul.f32 %v3738_v4, %v4563_v63  ;;  %v1837_v0 = vmul.f32 %v3753_v21, %v4610_v54 }
 0x1f7   : > { %v3408_v3 = vpop.eup %3407  ;;  %3164 = vmatmul.mubr.msk.f32.gmra.mrb[18].mxu1 %vm279_vm2, %v2440_v20  ;;  %3411 = vpow2.f32 %v2305_v36  ;;  %v2181_v42 = vadd.f32 %v2105_v60, %v1736_v27  ;;  %v1838_v58 = vmul.f32 %v3753_v21, %v4628_v10  ;;  %v1937_v18 = vmul.f32 %v3781_v61, %v4675_v13 }
 0x1f8   : > { %v2346_v55 = vadd.f32 1.0, %v3408_v3  ;;  %v1662_v34 = vrot.slane %v4707_v22, 1  ;;  %v1938_v28 = vmul.f32 %v3781_v61, %v4693_v16  ;;  %v1260_v50 = vadd.f32 %v1228_v7, %v1192_v47 }
 0x1f9   : > { %v4724_v53 = vadd.f32 %v4391_v41, %v2181_v42  ;;  %v1885_v33 = vadd.f32 %v1837_v0, %v1785_v11  ;;  %v1886_v25 = vadd.f32 %v1838_v58, %v1786_v46  ;;  %v1125_v9 = vmul.f32 %v3690_v23, %v4563_v63 }
 0x1fa   : > { %3413 = vrcp.f32 %v2346_v55  ;;  %v1663_v8 = vsel %vm1600_vm5, %v1661_v19, %v1662_v34  ;;  %v1161_v31 = vmul.f32 %v3707_v38, %v4628_v10  ;;  %v1229_v7 = vmul.f32 %v3735_v2, %v4693_v16  ;;  %v4758_v55 = vld [vmem:[#allocation2 + $0x170] sm:$0xff] }
 0x1fb   : > { %v2252_v62 = vsub.f32 0.0, %v4724_v53  ;;  %v1985_v29 = vadd.f32 %v1937_v18, %v1885_v33  ;;  %v1986_v32 = vadd.f32 %v1938_v28, %v1886_v25  ;;  %v1737_v48 = vadd.f32 %v1663_v8, %v1260_v50 }
 0x1fc   : > { %v1342_v56 = vmul.f32 %v3693_v24, %v989_v52  ;;  %v1394_v6 = vmul.f32 %v3700_v30, %v1037_v44  ;;  %v1494_v45 = vmul.f32 %v3744_v12, %v1086_v1  ;;  %v1193_v49 = vadd.f32 %v1161_v31, %v1125_v9 }
 0x1fd   : > { %v3410_v14 = vpop.eup %3409  ;;  %v2307_v35 = vmul.f32 1.442695, %v2252_v62  ;;  %v2106_v63 = vrot.slane %v1985_v29, 2  ;;  %v2107_v15 = vrot.slane %v1986_v32, 2  ;;  %v1787_v47 = vmul.f32 %v3738_v4, %v989_v52 }
 0x1fe   : > { %v2441_v5 = vmul.f32 %v3410_v14, %v4626_v26  ;;  %v1442_v17 = vadd.f32 %v1394_v6, %v1342_v56  ;;  %v1839_v59 = vmul.f32 %v3753_v21, %v1037_v44  ;;  %v1261_v40 = vadd.f32 %v1229_v7, %v1193_v49 }
 0x1ff   : > { %3415 = vpow2.f32 %v2307_v35  ;;  %v2108_v51 = vsel %vm2045_vm6, %v2106_v63, %v2107_v15  ;;  %v1939_v37 = vmul.f32 %v3781_v61, %v1086_v1  ;;  %v1126_v26 = vmul.f32 %v3690_v23, %v4610_v54 }
 0x200   : > { %3166 = vmatprep.mubr.msk.f32.mxu1 %vm279_vm2, %v2441_v5  ;;  %v2182_v20 = vadd.f32 %v2108_v51, %v1737_v48  ;;  %v1542_v36 = vadd.f32 %v1494_v45, %v1442_v17  ;;  %v1887_v27 = vadd.f32 %v1839_v59, %v1787_v47  ;;  %v1162_v22 = vmul.f32 %v3707_v38, %v4675_v13 }
 0x201   : > { %v3412_v60 = vpop.eup %3411  ;;  %v1230_v19 = vmul.f32 %v3735_v2, %v4740_v39  ;;  %v1343_v11 = vmul.f32 %v3693_v24, %v4610_v54  ;;  %v1395_v46 = vmul.f32 %v3700_v30, %v4675_v13  ;;  %v1344_v18 = vmul.f32 %v3693_v24, %v4628_v10 }
 0x202   : > { %v2347_v3 = vadd.f32 1.0, %v3412_v60  ;;  %v4756_v42 = vadd.f32 %v4391_v41, %v2182_v20  ;;  %v1664_v0 = vrot.slane %v1542_v36, 1  ;;  %v1987_v58 = vadd.f32 %v1939_v37, %v1887_v27  ;;  %v1040_v36 = vld [vmem:[#allocation2 + $0x160] sm:$0x3]  ;;  %v1089_v27 = vld [vmem:[#allocation2 + $0x178] sm:$0x3] }
 0x203   : > { %v1396_v28 = vmul.f32 %v3700_v30, %v4693_v16  ;;  %v1443_v50 = vadd.f32 %v1395_v46, %v1343_v11  ;;  %v1495_v33 = vmul.f32 %v3744_v12, %v4740_v39  ;;  %v1194_v31 = vadd.f32 %v1162_v22, %v1126_v26 }
 0x204   : > { %v3414_v25 = vpop.eup %3413  ;;  %3417 = vrcp.f32 %v2347_v3  ;;  %v2253_v52 = vsub.f32 0.0, %v4756_v42  ;;  %v1665_v44 = vsel %vm1600_vm5, %v1662_v34, %v1664_v0  ;;  %v2109_v1 = vrot.slane %v1987_v58, 2 }
 0x205   : > { %v2442_v8 = vmul.f32 %v3414_v25, %v4654_v43  ;;  %v1738_v9 = vadd.f32 %v1665_v44, %v1261_v40  ;;  %v1444_v62 = vadd.f32 %v1396_v28, %v1344_v18  ;;  %v1496_v7 = vmul.f32 %v3744_v12, %v4758_v55  ;;  %v992_v40 = vld [vmem:[#allocation2 + $0x148] sm:$0x3]  ;;  %v4805_v44 = vld [vmem:[#allocation2 + $0x180] sm:$0xff] }
 0x206   : > { %v2309_v29 = vmul.f32 1.442695, %v2253_v52  ;;  %v2110_v32 = vsel %vm2045_vm6, %v2107_v15, %v2109_v1  ;;  %v1543_v48 = vadd.f32 %v1495_v33, %v1443_v50  ;;  %v1788_v6 = vmul.f32 %v3738_v4, %v4610_v54 }
 0x207   : > { %3167 = vmatmul.mubr.msk.f32.gmra.mrb[20].mxu1 %vm279_vm2, %v2442_v8  ;;  %v2183_v56 = vadd.f32 %v2110_v32, %v1738_v9  ;;  %v1789_v34 = vmul.f32 %v3738_v4, %v4628_v10  ;;  %v1840_v43 = vmul.f32 %v3753_v21, %v4675_v13  ;;  %v4779_v45 = vadd.f32 %v1496_v7, %v1444_v62 }
 0x208   : > { %3419 = vpow2.f32 %v2309_v29  ;;  %v1666_v14 = vrot.slane %v1543_v48, 1  ;;  %v1841_v35 = vmul.f32 %v3753_v21, %v4693_v16  ;;  %v1940_v54 = vmul.f32 %v3781_v61, %v4740_v39 }
 0x209   : > { %v3416_v63 = vpop.eup %3415  ;;  %v4784_v15 = vadd.f32 %v4391_v41, %v2183_v56  ;;  %v1888_v49 = vadd.f32 %v1840_v43, %v1788_v6  ;;  %v1941_v5 = vmul.f32 %v3781_v61, %v4758_v55  ;;  %v1262_v47 = vadd.f32 %v1230_v19, %v1194_v31 }
 0x20a   : > { %v2348_v17 = vadd.f32 1.0, %v3416_v63  ;;  %v1667_v59 = vrot.slane %v4779_v45, 1  ;;  %v1889_v51 = vadd.f32 %v1841_v35, %v1789_v34  ;;  %v1127_v41 = vmul.f32 %v3690_v23, %v4628_v10  ;;  %v4823_v45 = vld [vmem:[%s5092_s4] ss:$0 sm:$0xff]  ;;  %v4828_v63 = vld [vmem:[#allocation2 + $0x188] sm:$0xff] }
 0x20b   : > { %v2254_v37 = vsub.f32 0.0, %v4784_v15  ;;  %v1988_v20 = vadd.f32 %v1940_v54, %v1888_v49  ;;  %v1163_v26 = vmul.f32 %v3707_v38, %v4693_v16  ;;  %v1231_v19 = vmul.f32 %v3735_v2, %v4758_v55 }
 0x20c   : > { %3421 = vrcp.f32 %v2348_v17  ;;  %v1668_v60 = vsel %vm1600_vm5, %v1666_v14, %v1667_v59  ;;  %v1989_v22 = vadd.f32 %v1941_v5, %v1889_v51  ;;  %v1345_v0 = vmul.f32 %v3693_v24, %v992_v40 }
 0x20d   : > { %v2311_v11 = vmul.f32 1.442695, %v2254_v37  ;;  %v1739_v46 = vadd.f32 %v1668_v60, %v1262_v47  ;;  %v2111_v3 = vrot.slane %v1988_v20, 2  ;;  %v1195_v28 = vadd.f32 %v1163_v26, %v1127_v41 }
 0x20e   : > { %v3418_v58 = vpop.eup %3417  ;;  %v2112_v18 = vrot.slane %v1989_v22, 2  ;;  %v1397_v10 = vmul.f32 %v3700_v30, %v1040_v36  ;;  %v1497_v50 = vmul.f32 %v3744_v12, %v1089_v27  ;;  %v1790_v25 = vmul.f32 %v3738_v4, %v992_v40 }
 0x20f   : > { %v2443_v33 = vmul.f32 %v3418_v58, %v4691_v57  ;;  %3423 = vpow2.f32 %v2311_v11  ;;  %v1842_v52 = vmul.f32 %v3753_v21, %v1040_v36  ;;  %v1263_v8 = vadd.f32 %v1231_v19, %v1195_v28 }
 0x210   : > { %v2113_v1 = vsel %vm2045_vm6, %v2111_v3, %v2112_v18  ;;  %v1445_v9 = vadd.f32 %v1397_v10, %v1345_v0  ;;  %v1942_v31 = vmul.f32 %v3781_v61, %v1089_v27  ;;  %v1128_v57 = vmul.f32 %v3690_v23, %v4675_v13 }
 0x211   : > { %3169 = vmatprep.mubr.msk.f32.mxu1 %vm279_vm2, %v2443_v33  ;;  %v2184_v62 = vadd.f32 %v2113_v1, %v1739_v46  ;;  %v1890_v29 = vadd.f32 %v1842_v52, %v1790_v25  ;;  %v1164_v32 = vmul.f32 %v3707_v38, %v4740_v39  ;;  %v1232_v56 = vmul.f32 %v3735_v2, %v4805_v44 }
 0x212   : > { %v3420_v7 = vpop.eup %3419  ;;  %v1545_v48 = vadd.f32 %v1497_v50, %v1445_v9  ;;  %v1346_v6 = vmul.f32 %v3693_v24, %v4675_v13  ;;  %v1398_v34 = vmul.f32 %v3700_v30, %v4740_v39  ;;  %v1347_v49 = vmul.f32 %v3693_v24, %v4693_v16  ;;  %v995_v9 = vld [vmem:[#allocation2 + $0x160] sm:$0x3] }
 0x213   : > { %v2349_v43 = vadd.f32 1.0, %v3420_v7  ;;  %v4826_v14 = vadd.f32 %v4823_v45, %v2184_v62  ;;  %v1990_v35 = vadd.f32 %v1942_v31, %v1890_v29  ;;  %v1399_v5 = vmul.f32 %v3700_v30, %v4758_v55  ;;  %v1043_v31 = vld [vmem:[#allocation2 + $0x178] sm:$0x3]  ;;  %v1092_v62 = vld [vmem:[#allocation2 + $0x190] sm:$0x3] }
 0x214   : > { %v1669_v54 = vrot.slane %v1545_v48, 1  ;;  %v1446_v17 = vadd.f32 %v1398_v34, %v1346_v6  ;;  %v1498_v47 = vmul.f32 %v3744_v12, %v4805_v44  ;;  %v1196_v37 = vadd.f32 %v1164_v32, %v1128_v57 }
 0x215   : > { %3425 = vrcp.f32 %v2349_v43  ;;  %v2255_v51 = vsub.f32 0.0, %v4826_v14  ;;  %v2114_v40 = vrot.slane %v1990_v35, 2  ;;  %v1447_v27 = vadd.f32 %v1399_v5, %v1347_v49 }
 0x216   : > { %v3422_v20 = vpop.eup %3421  ;;  %v1670_v36 = vsel %vm1600_vm5, %v1667_v59, %v1669_v54  ;;  %v1499_v41 = vmul.f32 %v3744_v12, %v4828_v63  ;;  %v1546_v26 = vadd.f32 %v1498_v47, %v1446_v17  ;;  %v1791_v0 = vmul.f32 %v3738_v4, %v4675_v13 }
 0x217   : > { %v2444_v60 = vmul.f32 %v3422_v20, %v4724_v53  ;;  %v2313_v22 = vmul.f32 1.442695, %v2255_v51  ;;  %v1740_v19 = vadd.f32 %v1670_v36, %v1263_v8  ;;  %v2115_v11 = vsel %vm2045_vm6, %v2112_v18, %v2114_v40  ;;  %v1093_v36 = vld [vmem:[#allocation2 + $0x198] sm:$0xff] }
 0x218   : > { %v4842_v46 = vadd.f32 %v1499_v41, %v1447_v27  ;;  %v1671_v3 = vrot.slane %v1546_v26, 1  ;;  %v1792_v59 = vmul.f32 %v3738_v4, %v4693_v16  ;;  %v1843_v53 = vmul.f32 %v3753_v21, %v4740_v39 }
 0x219   : > { %v3424_v58 = vpop.eup %3423  ;;  %3170 = vmatmul.mubr.msk.f32.gmra.mrb[22].mxu1 %vm279_vm2, %v2444_v60  ;;  %3427 = vpow2.f32 %v2313_v22  ;;  %v2185_v28 = vadd.f32 %v2115_v11, %v1740_v19  ;;  %v1844_v18 = vmul.f32 %v3753_v21, %v4758_v55  ;;  %v1943_v13 = vmul.f32 %v3781_v61, %v4805_v44 }
 0x21a   : > { %v2350_v10 = vadd.f32 1.0, %v3424_v58  ;;  %v1672_v50 = vrot.slane %v4842_v46, 1  ;;  %v1944_v33 = vmul.f32 %v3781_v61, %v4828_v63  ;;  %v1264_v52 = vadd.f32 %v1232_v56, %v1196_v37 }
 0x21b   : > { %v4859_v25 = vadd.f32 %v4823_v45, %v2185_v28  ;;  %v1891_v1 = vadd.f32 %v1843_v53, %v1791_v0  ;;  %v1892_v8 = vadd.f32 %v1844_v18, %v1792_v59  ;;  %v1129_v57 = vmul.f32 %v3690_v23, %v4693_v16 }
 0x21c   : > { %3429 = vrcp.f32 %v2350_v10  ;;  %v1673_v29 = vsel %vm1600_vm5, %v1671_v3, %v1672_v50  ;;  %v1165_v32 = vmul.f32 %v3707_v38, %v4758_v55  ;;  %v1233_v56 = vmul.f32 %v3735_v2, %v4828_v63  ;;  %v1094_v10 = vld [vmem:[#allocation2 + $0x1a0] sm:$0xff] }
 0x21d   : > { %v2256_v7 = vsub.f32 0.0, %v4859_v25  ;;  %v1991_v48 = vadd.f32 %v1943_v13, %v1891_v1  ;;  %v1992_v6 = vadd.f32 %v1944_v33, %v1892_v8  ;;  %v1741_v34 = vadd.f32 %v1673_v29, %v1264_v52 }
 0x21e   : > { %v1348_v43 = vmul.f32 %v3693_v24, %v995_v9  ;;  %v1400_v35 = vmul.f32 %v3700_v30, %v1043_v31  ;;  %v1500_v49 = vmul.f32 %v3744_v12, %v1092_v62  ;;  %v1197_v47 = vadd.f32 %v1165_v32, %v1129_v57 }
 0x21f   : > { %v3426_v54 = vpop.eup %3425  ;;  %v2315_v5 = vmul.f32 1.442695, %v2256_v7  ;;  %v2116_v16 = vrot.slane %v1991_v48, 2  ;;  %v2117_v17 = vrot.slane %v1992_v6, 2  ;;  %v1793_v37 = vmul.f32 %v3738_v4, %v995_v9 }
 0x220   : > { %v2445_v51 = vmul.f32 %v3426_v54, %v4756_v42  ;;  %v1448_v40 = vadd.f32 %v1400_v35, %v1348_v43  ;;  %v1845_v20 = vmul.f32 %v3753_v21, %v1043_v31  ;;  %v1265_v41 = vadd.f32 %v1233_v56, %v1197_v47 }
 0x221   : > { %3431 = vpow2.f32 %v2315_v5  ;;  %v2118_v27 = vsel %vm2045_vm6, %v2116_v16, %v2117_v17  ;;  %v1945_v26 = vmul.f32 %v3781_v61, %v1092_v62  ;;  %v1130_v42 = vmul.f32 %v3690_v23, %v4740_v39 }
 0x222   : > { %3172 = vmatprep.mubr.msk.f32.mxu1 %vm279_vm2, %v2445_v51  ;;  %v2186_v60 = vadd.f32 %v2118_v27, %v1741_v34  ;;  %v1548_v22 = vadd.f32 %v1500_v49, %v1448_v40  ;;  %v1893_v19 = vadd.f32 %v1845_v20, %v1793_v37  ;;  %v1166_v46 = vmul.f32 %v3707_v38, %v4805_v44  ;;  %v998_v20 = vld [vmem:[#allocation2 + $0x178] sm:$0x3] }
 0x223   : > { %v3428_v11 = vpop.eup %3427  ;;  %v1234_v3 = vmul.f32 %v3735_v2, %v1093_v36  ;;  %v1349_v0 = vmul.f32 %v3693_v24, %v4740_v39  ;;  %v1401_v59 = vmul.f32 %v3700_v30, %v4805_v44  ;;  %v1350_v13 = vmul.f32 %v3693_v24, %v4758_v55 }
 0x224   : > { %v2351_v58 = vadd.f32 1.0, %v3428_v11  ;;  %v4888_v28 = vadd.f32 %v4823_v45, %v2186_v60  ;;  %v1674_v53 = vrot.slane %v1548_v22, 1  ;;  %v1993_v18 = vadd.f32 %v1945_v26, %v1893_v19  ;;  %v1046_v60 = vld [vmem:[#allocation2 + $0x190] sm:$0x3]  ;;  %v1095_v22 = vld [vmem:[#allocation2 + $0x1a8] sm:$0x3] }
 0x225   : > { %v1402_v33 = vmul.f32 %v3700_v30, %v4828_v63  ;;  %v1449_v52 = vadd.f32 %v1401_v59, %v1349_v0  ;;  %v1501_v1 = vmul.f32 %v3744_v12, %v1093_v36  ;;  %v1198_v32 = vadd.f32 %v1166_v46, %v1130_v42 }
 0x226   : > { %v3430_v8 = vpop.eup %3429  ;;  %3433 = vrcp.f32 %v2351_v58  ;;  %v2257_v9 = vsub.f32 0.0, %v4888_v28  ;;  %v1675_v31 = vsel %vm1600_vm5, %v1672_v50, %v1674_v53  ;;  %v2119_v62 = vrot.slane %v1993_v18, 2  ;;  %v4927_v53 = vld [vmem:[%s5094_s6] ss:$0 sm:$0xff] }
 0x227   : > { %v2446_v29 = vmul.f32 %v3430_v8, %v4784_v15  ;;  %v1742_v57 = vadd.f32 %v1675_v31, %v1265_v41  ;;  %v1450_v7 = vadd.f32 %v1402_v33, %v1350_v13  ;;  %v1502_v56 = vmul.f32 %v3744_v12, %v1094_v10  ;;  %v2783_v31 = vld [vmem:[%s3523_s8] sm:$0xff] }
 0x228   : > { %v2317_v48 = vmul.f32 1.442695, %v2257_v9  ;;  %v2120_v6 = vsel %vm2045_vm6, %v2117_v17, %v2119_v62  ;;  %v1549_v34 = vadd.f32 %v1501_v1, %v1449_v52  ;;  %v1794_v35 = vmul.f32 %v3738_v4, %v4740_v39  ;;  %v2784_v52 = vld [vmem:[%s3523_s8 + $0x8] sm:$0xff] }
 0x229   : > { %3173 = vmatmul.mubr.msk.f32.gmra.mrb[24].mxu1 %vm279_vm2, %v2446_v29  ;;  %v2187_v43 = vadd.f32 %v2120_v6, %v1742_v57  ;;  %v1795_v50 = vmul.f32 %v3738_v4, %v4758_v55  ;;  %v1846_v15 = vmul.f32 %v3753_v21, %v4805_v44  ;;  %v4907_v49 = vadd.f32 %v1502_v56, %v1450_v7 }
 0x22a   : > { %3435 = vpow2.f32 %v2317_v48  ;;  %v1676_v54 = vrot.slane %v1549_v34, 1  ;;  %v1847_v5 = vmul.f32 %v3753_v21, %v4828_v63  ;;  %v1946_v39 = vmul.f32 %v3781_v61, %v1093_v36 }
 0x22b   : > { %v3432_v16 = vpop.eup %3431  ;;  %v4912_v17 = vadd.f32 %v4823_v45, %v2187_v43  ;;  %v1894_v47 = vadd.f32 %v1846_v15, %v1794_v35  ;;  %v1947_v51 = vmul.f32 %v3781_v61, %v1094_v10  ;;  %v1677_v37 = vrot.slane %v4907_v49, 1 }
 0x22c   : > { %v2352_v40 = vadd.f32 1.0, %v3432_v16  ;;  %v1895_v44 = vadd.f32 %v1847_v5, %v1795_v50  ;;  %v1266_v41 = vadd.f32 %v1234_v3, %v1198_v32  ;;  %v1131_v19 = vmul.f32 %v3690_v23, %v4758_v55 }
 0x22d   : > { %v2258_v27 = vsub.f32 0.0, %v4912_v17  ;;  %v1994_v26 = vadd.f32 %v1946_v39, %v1894_v47  ;;  %v1678_v42 = vsel %vm1600_vm5, %v1676_v54, %v1677_v37  ;;  %v1167_v11 = vmul.f32 %v3707_v38, %v4828_v63 }
 0x22e   : > { %3437 = vrcp.f32 %v2352_v40  ;;  %v1995_v36 = vadd.f32 %v1947_v51, %v1895_v44  ;;  %v3138_v46 = vpop.f32.mrb[0].mxu1  ;;  %v1743_v59 = vadd.f32 %v1678_v42, %v1266_v41  ;;  %v1235_v3 = vmul.f32 %v3735_v2, %v1094_v10 }
 0x22f   : > { %v2319_v0 = vmul.f32 1.442695, %v2258_v27  ;;  %v2121_v58 = vrot.slane %v1994_v26, 2  ;;  %v2624_v23 = vpop.f32.mrb[1].mxu1  ;;  %v1351_v13 = vmul.f32 %v3693_v24, %v998_v20  ;;  %v1403_v38 = vmul.f32 %v3700_v30, %v1046_v60  ;;  %v2785_v26 = vld [vmem:[%s3523_s8 + $0x10] sm:$0xff] }
 0x230   : > { %v3434_v55 = vpop.eup %3433  ;;  %v2122_v18 = vrot.slane %v1995_v36, 2  ;;  %v1503_v63 = vmul.f32 %v3744_v12, %v1095_v22  ;;  %v1796_v2 = vmul.f32 %v3738_v4, %v998_v20  ;;  %v1848_v10 = vmul.f32 %v3753_v21, %v1046_v60  ;;  %v2786_v20 = vld [vmem:[%s3523_s8 + $0x18] sm:$0xff] }
 0x231   : > { %v2447_v33 = vmul.f32 %v3434_v55, %v4826_v14  ;;  %3439 = vpow2.f32 %v2319_v0  ;;  %v1451_v8 = vadd.f32 %v1403_v38, %v1351_v13  ;;  %v1948_v9 = vmul.f32 %v3781_v61, %v1095_v22 }
 0x232   : > { %v2123_v1 = vsel %vm2045_vm6, %v2121_v58, %v2122_v18  ;;  %v2630_v24 = vadd.f32 %v3138_v46, %v4927_v53  ;;  %v1199_v12 = vadd.f32 %v1167_v11, %v1131_v19  ;;  %v1896_v62 = vadd.f32 %v1848_v10, %v1796_v2  ;;  %v2788_v58 = vld [vmem:[%s3523_s8 + $0x28] sm:$0xff]  ;;  %v2790_v10 = vld [vmem:[%s3523_s8 + $0x38] sm:$0xff] }
 0x233   : > { %3175 = vmatprep.mubr.msk.f32.mxu1 %vm279_vm2, %v2447_v33  ;;  %v2188_v30 = vadd.f32 %v2123_v1, %v1743_v59  ;;  %v2625_v4 = vadd.f32 %v4927_v53, %v2624_v23  ;;  %v1551_v61 = vadd.f32 %v1503_v63, %v1451_v8  ;;  %v2789_v8 = vld [vmem:[%s3523_s8 + $0x30] sm:$0xff] }
 0x234   : > { %v3436_v21 = vpop.eup %3435  ;;  %v2816_v14 = vadd.f32 %v2784_v52, %v2630_v24  ;;  %v1996_v32 = vadd.f32 %v1948_v9, %v1896_v62  ;;  %v1267_v56 = vadd.f32 %v1235_v3, %v1199_v12  ;;  %v2792_v12 = vld [vmem:[%s3523_s8 + $0x48] sm:$0xff] }
 0x235   : > { %v2353_v29 = vadd.f32 1.0, %v3436_v21  ;;  %v2227_v57 = vadd.f32 %v4823_v45, %v2188_v30  ;;  %v2815_v7 = vadd.f32 %v2783_v31, %v2625_v4  ;;  %v1679_v48 = vrot.slane %v1551_v61, 1  ;;  %v2791_v21 = vld [vmem:[%s3523_s8 + $0x40] sm:$0xff] }
 0x236   : > { %2848 = vst.msk [vmem:[%s4946_s12 + $0x8] sm:$0xff] %vm365_vm1, %v2816_v14  ;;  %v2124_v34 = vrot.slane %v1996_v32, 2  ;;  %v2794_v32 = vld [vmem:[%s3523_s8 + $0x58] sm:$0xff] }
 0x237   : > { %3441 = vrcp.f32 %v2353_v29  ;;  %v2259_v6 = vsub.f32 0.0, %v2227_v57  ;;  %2847 = vst.msk [vmem:[%s4946_s12] sm:$0xff] %vm365_vm1, %v2815_v7  ;;  %v1680_v35 = vsel %vm1600_vm5, %v1677_v37, %v1679_v48 }
 0x238   : > { %v3438_v43 = vpop.eup %3437  ;;  %v1744_v49 = vadd.f32 %v1680_v35, %v1267_v56  ;;  %v2125_v54 = vsel %vm2045_vm6, %v2122_v18, %v2124_v34  ;;  %v2787_v18 = vld [vmem:[%s3523_s8 + $0x20] sm:$0xff] }
 0x239   : > { %v2448_v50 = vmul.f32 %v3438_v43, %v4859_v25  ;;  %v2321_v15 = vmul.f32 1.442695, %v2259_v6  ;;  %v2793_v6 = vld [vmem:[%s3523_s8 + $0x50] sm:$0xff] }
 0x23a   : > { %v2189_v16 = vadd.f32 %v2125_v54, %v1744_v49  ;;  %v2795_v54 = vld [vmem:[%s3523_s8 + $0x60] sm:$0xff] }
 0x23b   : > { %v3440_v5 = vpop.eup %3439  ;;  %3176 = vmatmul.mubr.msk.f32.gmra.mrb[26].mxu1 %vm279_vm2, %v2448_v50  ;;  %3443 = vpow2.f32 %v2321_v15  ;;  %v2796_v50 = vld [vmem:[%s3523_s8 + $0x68] sm:$0xff] }
 0x23c   : > { %v2354_v47 = vadd.f32 1.0, %v3440_v5  ;;  %v2228_v39 = vadd.f32 %v4823_v45, %v2189_v16 }
 0x23e   : > { %3445 = vrcp.f32 %v2354_v47  ;;  %v2260_v51 = vsub.f32 0.0, %v2228_v39 }
 0x240   : > { %v2323_v37 = vmul.f32 1.442695, %v2260_v51  ;;  %v2798_v51 = vld [vmem:[%s3523_s8 + $0x78] sm:$0xff] }
 0x241   : > { %v3442_v40 = vpop.eup %3441 }
 0x242   : > { %v2449_v25 = vmul.f32 %v3442_v40, %v4888_v28  ;;  %v3141_v44 = vpop.f32.mrb[2].mxu1  ;;  %3447 = vpow2.f32 %v2323_v37 }
 0x243   : > { %v2640_v27 = vadd.f32 %v3141_v44, %v4927_v53  ;;  %v2634_v41 = vpop.f32.mrb[3].mxu1 }
 0x244   : > { %3178 = vmatprep.mubr.msk.f32.mxu1 %vm279_vm2, %v2449_v25  ;;  %v2635_v60 = vadd.f32 %v4927_v53, %v2634_v41  ;;  %v2797_v25 = vld [vmem:[%s3523_s8 + $0x70] sm:$0xff] }
 0x245   : > { %v3444_v45 = vpop.eup %3443  ;;  %v2818_v22 = vadd.f32 %v2786_v20, %v2640_v27 }
 0x246   : > { %v2355_v19 = vadd.f32 1.0, %v3444_v45  ;;  %v2817_v42 = vadd.f32 %v2785_v26, %v2635_v60  ;;  %v2800_v26 = vld [vmem:[%s3523_s8 + $0x88] sm:$0xff] }
 0x247   : > { %2850 = vst.msk [vmem:[%s4946_s12 + $0x18] sm:$0xff] %vm365_vm1, %v2818_v22  ;;  %v2799_v22 = vld [vmem:[%s3523_s8 + $0x80] sm:$0xff] }
 0x248   : > { %v3446_v28 = vpop.eup %3445  ;;  %3449 = vrcp.f32 %v2355_v19  ;;  %2849 = vst.msk [vmem:[%s4946_s12 + $0x10] sm:$0xff] %vm365_vm1, %v2817_v42 }
 0x249   : > { %v2450_v36 = vmul.f32 %v3446_v28, %v4912_v17 }
 0x24b   : > { %3179 = vmatmul.mubr.msk.f32.gmra.mrb[28].mxu1 %vm279_vm2, %v2450_v36 }
 0x24c   : > { %v3448_v11 = vpop.eup %3447 }
 0x24d   : > { %v2356_v46 = vadd.f32 1.0, %v3448_v11  ;;  %v2802_v11 = vld [vmem:[%s3523_s8 + $0x98] sm:$0xff] }
 0x24f   : > { %3451 = vrcp.f32 %v2356_v46 }
 0x252   : > { %v3450_v0 = vpop.eup %3449  ;;  %v3144_v59 = vpop.f32.mrb[4].mxu1 }
 0x253   : > { %v2451_v3 = vmul.f32 %v3450_v0, %v2227_v57  ;;  %v2650_v23 = vadd.f32 %v3144_v59, %v4927_v53  ;;  %v2644_v55 = vpop.f32.mrb[5].mxu1  ;;  %v2801_v59 = vld [vmem:[%s3523_s8 + $0x90] sm:$0xff] }
 0x254   : > { %v2645_v13 = vadd.f32 %v4927_v53, %v2644_v55 }
 0x255   : > { %3181 = vmatprep.mubr.msk.f32.mxu1 %vm279_vm2, %v2451_v3  ;;  %v2820_v17 = vadd.f32 %v2788_v58, %v2650_v23 }
 0x256   : > { %v2819_v38 = vadd.f32 %v2787_v18, %v2645_v13  ;;  %v2804_v18 = vld [vmem:[%s3523_s8 + $0xa8] sm:$0xff] }
 0x257   : > { %2852 = vst.msk [vmem:[%s4946_s12 + $0x28] sm:$0xff] %vm365_vm1, %v2820_v17 }
 0x258   : > { %2851 = vst.msk [vmem:[%s4946_s12 + $0x20] sm:$0xff] %vm365_vm1, %v2819_v38  ;;  %v2803_v38 = vld [vmem:[%s3523_s8 + $0xa0] sm:$0xff] }
 0x259   : > { %v3452_v63 = vpop.eup %3451 }
 0x25a   : > { %v2452_v33 = vmul.f32 %v3452_v63, %v2228_v39 }
 0x25c   : > { %3182 = vmatmul.mubr.msk.f32.gmra.mrb[30].mxu1 %vm279_vm2, %v2452_v33 }
 0x264   : > { %v3147_v2 = vpop.f32.mrb[6].mxu1 }
 0x265   : > { %v2660_v52 = vadd.f32 %v3147_v2, %v4927_v53  ;;  %v2654_v1 = vpop.f32.mrb[7].mxu1 }
 0x266   : > { %v2655_v9 = vadd.f32 %v4927_v53, %v2654_v1 }
 0x267   : > { %v2822_v24 = vadd.f32 %v2790_v10, %v2660_v52  ;;  %v2806_v52 = vld [vmem:[%s3523_s8 + $0xb8] sm:$0xff] }
 0x268   : > { %v2821_v31 = vadd.f32 %v2789_v8, %v2655_v9  ;;  %v2805_v9 = vld [vmem:[%s3523_s8 + $0xb0] sm:$0xff] }
 0x269   : > { %2854 = vst.msk [vmem:[%s4946_s12 + $0x38] sm:$0xff] %vm365_vm1, %v2822_v24 }
 0x26a   : > { %2853 = vst.msk [vmem:[%s4946_s12 + $0x30] sm:$0xff] %vm365_vm1, %v2821_v31 }
 0x274   : > { %v3150_v30 = vpop.f32.mrb[8].mxu1 }
 0x275   : > { %v2670_v62 = vadd.f32 %v3150_v30, %v4927_v53  ;;  %v2664_v4 = vpop.f32.mrb[9].mxu1 }
 0x276   : > { %v2665_v61 = vadd.f32 %v4927_v53, %v2664_v4 }
 0x277   : > { %v2824_v14 = vadd.f32 %v2792_v12, %v2670_v62  ;;  %v2808_v62 = vld [vmem:[%s3523_s8 + $0xc8] sm:$0xff] }
 0x278   : > { %v2823_v29 = vadd.f32 %v2791_v21, %v2665_v61  ;;  %v2807_v61 = vld [vmem:[%s3523_s8 + $0xc0] sm:$0xff] }
 0x279   : > { %2856 = vst.msk [vmem:[%s4946_s12 + $0x48] sm:$0xff] %vm365_vm1, %v2824_v14 }
 0x27a   : > { %2855 = vst.msk [vmem:[%s4946_s12 + $0x40] sm:$0xff] %vm365_vm1, %v2823_v29 }
 0x286   : > { %v3153_v57 = vpop.f32.mrb[10].mxu1 }
 0x287   : > { %v2680_v7 = vadd.f32 %v3153_v57, %v4927_v53  ;;  %v2674_v48 = vpop.f32.mrb[11].mxu1 }
 0x288   : > { %v2675_v56 = vadd.f32 %v4927_v53, %v2674_v48 }
 0x289   : > { %v2826_v34 = vadd.f32 %v2794_v32, %v2680_v7  ;;  %v2810_v7 = vld [vmem:[%s3523_s8 + $0xd8] sm:$0xff] }
 0x28a   : > { %v2825_v43 = vadd.f32 %v2793_v6, %v2675_v56  ;;  %v2809_v56 = vld [vmem:[%s3523_s8 + $0xd0] sm:$0xff] }
 0x28b   : > { %2858 = vst.msk [vmem:[%s4946_s12 + $0x58] sm:$0xff] %vm365_vm1, %v2826_v34 }
 0x28c   : > { %2857 = vst.msk [vmem:[%s4946_s12 + $0x50] sm:$0xff] %vm365_vm1, %v2825_v43 }
 0x296   : > { %v3156_v35 = vpop.f32.mrb[12].mxu1 }
 0x297   : > { %v2690_v15 = vadd.f32 %v3156_v35, %v4927_v53  ;;  %v2684_v49 = vpop.f32.mrb[13].mxu1 }
 0x298   : > { %v2685_v5 = vadd.f32 %v4927_v53, %v2684_v49 }
 0x299   : > { %v2828_v16 = vadd.f32 %v2796_v50, %v2690_v15  ;;  %v2812_v15 = vld [vmem:[%s3523_s8 + $0xe8] sm:$0xff] }
 0x29a   : > { %v2827_v47 = vadd.f32 %v2795_v54, %v2685_v5  ;;  %v2811_v5 = vld [vmem:[%s3523_s8 + $0xe0] sm:$0xff] }
 0x29b   : > { %2860 = vst.msk [vmem:[%s4946_s12 + $0x68] sm:$0xff] %vm365_vm1, %v2828_v16 }
 0x29c   : > { %2859 = vst.msk [vmem:[%s4946_s12 + $0x60] sm:$0xff] %vm365_vm1, %v2827_v47 }
 0x2a8   : > { %v3159_v39 = vpop.f32.mrb[14].mxu1 }
 0x2a9   : > { %v2700_v40 = vadd.f32 %v3159_v39, %v4927_v53  ;;  %v2694_v37 = vpop.f32.mrb[15].mxu1 }
 0x2aa   : > { %v2695_v44 = vadd.f32 %v4927_v53, %v2694_v37 }
 0x2ab   : > { %v2830_v20 = vadd.f32 %v2798_v51, %v2700_v40  ;;  %v2814_v40 = vld [vmem:[%s3523_s8 + $0xf8] sm:$0xff] }
 0x2ac   : > { %v2829_v27 = vadd.f32 %v2797_v25, %v2695_v44  ;;  %v2813_v44 = vld [vmem:[%s3523_s8 + $0xf0] sm:$0xff] }
 0x2ad   : > { %2862 = vst.msk [vmem:[%s4946_s12 + $0x78] sm:$0xff] %vm365_vm1, %v2830_v20 }
 0x2ae   : > { %2861 = vst.msk [vmem:[%s4946_s12 + $0x70] sm:$0xff] %vm365_vm1, %v2829_v27 }
 0x2b8   : > { %v3162_v41 = vpop.f32.mrb[16].mxu1 }
 0x2b9   : > { %v2710_v60 = vadd.f32 %v3162_v41, %v4927_v53  ;;  %v2704_v45 = vpop.f32.mrb[17].mxu1 }
 0x2ba   : > { %v2705_v19 = vadd.f32 %v4927_v53, %v2704_v45 }
 0x2bb   : > { %v2832_v42 = vadd.f32 %v2800_v26, %v2710_v60 }
 0x2bc   : > { %v2831_v28 = vadd.f32 %v2799_v22, %v2705_v19 }
 0x2bd   : > { %2864 = vst.msk [vmem:[%s4946_s12 + $0x88] sm:$0xff] %vm365_vm1, %v2832_v42 }
 0x2be   : > { %2863 = vst.msk [vmem:[%s4946_s12 + $0x80] sm:$0xff] %vm365_vm1, %v2831_v28 }
 0x2ca   : > { %v3165_v36 = vpop.f32.mrb[18].mxu1 }
 0x2cb   : > { %v2720_v46 = vadd.f32 %v3165_v36, %v4927_v53  ;;  %v2714_v0 = vpop.f32.mrb[19].mxu1 }
 0x2cc   : > { %v2715_v58 = vadd.f32 %v4927_v53, %v2714_v0 }
 0x2cd   : > { %v2834_v3 = vadd.f32 %v2802_v11, %v2720_v46 }
 0x2ce   : > { %v2833_v23 = vadd.f32 %v2801_v59, %v2715_v58 }
 0x2cf   : > { %2866 = vst.msk [vmem:[%s4946_s12 + $0x98] sm:$0xff] %vm365_vm1, %v2834_v3 }
 0x2d0   : > { %2865 = vst.msk [vmem:[%s4946_s12 + $0x90] sm:$0xff] %vm365_vm1, %v2833_v23 }
 0x2da   : > { %v3168_v55 = vpop.f32.mrb[20].mxu1 }
 0x2db   : > { %v2730_v13 = vadd.f32 %v3168_v55, %v4927_v53  ;;  %v2724_v17 = vpop.f32.mrb[21].mxu1 }
 0x2dc   : > { %v2725_v63 = vadd.f32 %v4927_v53, %v2724_v17 }
 0x2dd   : > { %v2836_v33 = vadd.f32 %v2804_v18, %v2730_v13 }
 0x2de   : > { %v2835_v2 = vadd.f32 %v2803_v38, %v2725_v63 }
 0x2df   : > { %2868 = vst.msk [vmem:[%s4946_s12 + $0xa8] sm:$0xff] %vm365_vm1, %v2836_v33 }
 0x2e0   : > { %2867 = vst.msk [vmem:[%s4946_s12 + $0xa0] sm:$0xff] %vm365_vm1, %v2835_v2 }
 0x2ec   : > { %v3171_v10 = vpop.f32.mrb[22].mxu1 }
 0x2ed   : > { %v2740_v1 = vadd.f32 %v3171_v10, %v4927_v53  ;;  %v2734_v8 = vpop.f32.mrb[23].mxu1 }
 0x2ee   : > { %v2735_v24 = vadd.f32 %v4927_v53, %v2734_v8 }
 0x2ef   : > { %v2838_v31 = vadd.f32 %v2806_v52, %v2740_v1 }
 0x2f0   : > { %v2837_v30 = vadd.f32 %v2805_v9, %v2735_v24 }
 0x2f1   : > { %2870 = vst.msk [vmem:[%s4946_s12 + $0xb8] sm:$0xff] %vm365_vm1, %v2838_v31 }
 0x2f2   : > { %2869 = vst.msk [vmem:[%s4946_s12 + $0xb0] sm:$0xff] %vm365_vm1, %v2837_v30 }
 0x2fc   : > { %v3174_v12 = vpop.f32.mrb[24].mxu1 }
 0x2fd   : > { %v2750_v4 = vadd.f32 %v3174_v12, %v4927_v53  ;;  %v2744_v21 = vpop.f32.mrb[25].mxu1 }
 0x2fe   : > { %v2745_v14 = vadd.f32 %v4927_v53, %v2744_v21 }
 0x2ff   : > { %v2840_v29 = vadd.f32 %v2808_v62, %v2750_v4 }
 0x300   : > { %v2839_v57 = vadd.f32 %v2807_v61, %v2745_v14 }
 0x301   : > { %2872 = vst.msk [vmem:[%s4946_s12 + $0xc8] sm:$0xff] %vm365_vm1, %v2840_v29 }
 0x302   : > { %2871 = vst.msk [vmem:[%s4946_s12 + $0xc0] sm:$0xff] %vm365_vm1, %v2839_v57 }
 0x30e   : > { %v3177_v32 = vpop.f32.mrb[26].mxu1 }
 0x30f   : > { %v2760_v48 = vadd.f32 %v3177_v32, %v4927_v53  ;;  %v2754_v6 = vpop.f32.mrb[27].mxu1 }
 0x310   : > { %v2755_v34 = vadd.f32 %v4927_v53, %v2754_v6 }
 0x311   : > { %v2842_v43 = vadd.f32 %v2810_v7, %v2760_v48 }
 0x312   : > { %v2841_v35 = vadd.f32 %v2809_v56, %v2755_v34 }
 0x313   : > { %2874 = vst.msk [vmem:[%s4946_s12 + $0xd8] sm:$0xff] %vm365_vm1, %v2842_v43 }
 0x314   : > { %2873 = vst.msk [vmem:[%s4946_s12 + $0xd0] sm:$0xff] %vm365_vm1, %v2841_v35 }
 0x31e   : > { %v3180_v50 = vpop.f32.mrb[28].mxu1 }
 0x31f   : > { %v2770_v49 = vadd.f32 %v3180_v50, %v4927_v53  ;;  %v2764_v54 = vpop.f32.mrb[29].mxu1 }
 0x320   : > { %v2765_v16 = vadd.f32 %v4927_v53, %v2764_v54 }
 0x321   : > { %v2844_v47 = vadd.f32 %v2812_v15, %v2770_v49 }
 0x322   : > { %v2843_v39 = vadd.f32 %v2811_v5, %v2765_v16 }
 0x323   : > { %2876 = vst.msk [vmem:[%s4946_s12 + $0xe8] sm:$0xff] %vm365_vm1, %v2844_v47 }
 0x324   : > { %2875 = vst.msk [vmem:[%s4946_s12 + $0xe0] sm:$0xff] %vm365_vm1, %v2843_v39 }
 0x32f   : > { %v3183_v51 = vpop.f32.mrb[30].mxu1 }
 0x330   : > { %v2780_v37 = vadd.f32 %v3183_v51, %v4927_v53  ;;  %v2774_v25 = vpop.f32.mrb[31].mxu1 }
 0x331   : > { %v2775_v20 = vadd.f32 %v4927_v53, %v2774_v25 }
 0x332   : > { %v2846_v27 = vadd.f32 %v2814_v40, %v2780_v37 }
 0x333   : > { %v2845_v41 = vadd.f32 %v2813_v44, %v2775_v20 }
 0x334   : > { %2878 = vst.msk [vmem:[%s4946_s12 + $0xf8] sm:$0xff] %vm365_vm1, %v2846_v27 }
 0x335   : > { %2877 = vst.msk [vmem:[%s4946_s12 + $0xf0] sm:$0xff] %vm365_vm1, %v2845_v41 }
 0x336 PF: > { %s17_s24 = sadd.s32 1, %s3461_s24  }
 0x337   : > { %p14_p4 = scmp.ge.s32.totalorder %s17_s24, 4  }
 0x339   :  { %16 = sbr.rel (!%p14_p4) target bundleno = 1 (0x1), region = 81 }

</bundles_post_ra>
